<compile_context>
chip_gen: v5e
topology: v5e:2x2
jax: 0.10.0
libtpu: 0.0.40
codegen_flags: <defaults>
</compile_context>

<pallas_src>
import functools

import jax
import jax.numpy as jnp
from jax.experimental import pallas as pl
from jax.experimental.pallas import tpu as pltpu


# ------------------------------ fused kernel ------------------------------- #

def _fused_lstm_kernel(*refs, num_layers):
    n_fixed = 11
    (z_ref, ex_ref, ey_ref, dx_ref, dy_ref,
     wsa_ref, bsa_ref, wfcx_ref, wfcsa_ref, wfcz_ref, bfc_ref) = refs[:n_fixed]
    lrefs = refs[n_fixed:n_fixed + 3 * num_layers]
    (w1_ref, b1h_ref, gam_ref, bet_ref, w2_ref, b2h_ref) = refs[
        n_fixed + 3 * num_layers:n_fixed + 3 * num_layers + 6]
    out_ref = refs[n_fixed + 3 * num_layers + 6]
    gx_sc, y_sc = refs[n_fixed + 3 * num_layers + 7:]

    B = z_ref.shape[0]
    H = wsa_ref.shape[1]
    Cx = ex_ref.shape[1]
    Cy = ey_ref.shape[1]
    Te = ex_ref.shape[0] // B
    Td = dx_ref.shape[0] // B

    f32 = lambda a: a.astype(jnp.float32)
    w_sa = f32(wsa_ref[...])                       # (1, H)
    b_sa = f32(bsa_ref[...])                       # (1, H)

    # -- fused SineActivation + concat + fc on time-major flattened rows ---- #
    def embed(x_ref, y_ref, T):
        y = f32(y_ref[...])                                      # (T*B, Cy)
        cols = [y[:, i:i + 1] * w_sa + b_sa for i in range(Cy)]  # (T*B, H) each
        f = jnp.concatenate(cols, axis=-1)                       # (T*B, Cy*H)
        lane = jax.lax.broadcasted_iota(jnp.int32, f.shape, 1)
        sa = jnp.where(lane % H < H - 1, jnp.sin(f), f)          # keep last col
        # fc([x | sa | z]) = x@Wx + sa@Wsa + z@Wz + b  (column-split weights)
        emb = jnp.dot(sa, f32(wfcsa_ref[...]),
                      preferred_element_type=jnp.float32)        # (T*B, H)
        if Cx == 1:
            emb = emb + f32(x_ref[...]) * f32(wfcx_ref[...])     # (T*B,1)*(1,H)
        else:
            emb = emb + jnp.dot(f32(x_ref[...]), f32(wfcx_ref[...]),
                                preferred_element_type=jnp.float32)
        zc = jnp.dot(f32(z_ref[...]), f32(wfcz_ref[...]),
                     preferred_element_type=jnp.float32) + f32(bfc_ref[...])
        # z is constant over time: compute (B, H) once, replicate over T rows.
        return emb + jnp.concatenate([zc] * T, axis=0)           # (T*B, H)

    # -- one LSTM layer: batched input projection + serial recurrence ------- #
    def run_layer(layer, T, x_rows, h0, c0, store_y):
        w_ih = f32(lrefs[3 * layer][...])          # (Hin, 4H), gates [i|f|o|g]
        w_hh = f32(lrefs[3 * layer + 1][...])      # (H,   4H)
        bias = f32(lrefs[3 * layer + 2][...])      # (1,   4H) = b_ih + b_hh
        R = T * B
        # One big MXU op for all timesteps; only the recurrent matmul remains
        # inside the serial loop.
        gx_sc[0:R, :] = jnp.dot(x_rows, w_ih,
                                preferred_element_type=jnp.float32) + bias

        def step(t, carry):
            h, c = carry
            g = gx_sc[pl.ds(t * B, B), :] + jnp.dot(
                h, w_hh, preferred_element_type=jnp.float32)     # (B, 4H)
            # Gates packed [i | f | o | g]: ONE sigmoid over 3H lanes, ONE tanh.
            s = jax.nn.sigmoid(g[:, :3 * H])
            i_g = s[:, 0 * H:1 * H]
            f_g = s[:, 1 * H:2 * H]
            o_g = s[:, 2 * H:3 * H]
            g_g = jnp.tanh(g[:, 3 * H:])
            c_new = f_g * c + i_g * g_g
            h_new = o_g * jnp.tanh(c_new)
            if store_y:
                y_sc[pl.ds(t * B, B), :] = h_new
            return h_new, c_new

        return jax.lax.fori_loop(0, T, step, (h0, c0), unroll=True)

    zeros = jnp.zeros((B, H), jnp.float32)

    # ---------------------------- encoder pass ----------------------------- #
    x_rows = embed(ex_ref, ey_ref, Te)             # (Te*B, H)
    states = []
    for l in range(num_layers):
        last = l == num_layers - 1
        # The encoder's last-layer output sequence is discarded by the module;
        # skip those per-step stores entirely.
        h, c = run_layer(l, Te, x_rows, zeros, zeros, store_y=not last)
        states.append((h, c))
        if not last:
            x_rows = y_sc[0:Te * B, :]

    # ---------------------------- decoder pass ----------------------------- #
    x_rows = embed(dx_ref, dy_ref, Td)             # (Td*B, H)
    for l in range(num_layers):
        h0, c0 = states[l]
        run_layer(l, Td, x_rows, h0, c0, store_y=True)
        x_rows = y_sc[0:Td * B, :]

    # ------- forward1: Linear -> BatchNorm1d(train stats) -> ReLU -> Linear - #
    h1 = jnp.dot(x_rows, f32(w1_ref[...]),
                 preferred_element_type=jnp.float32) + f32(b1h_ref[...])
    mean = jnp.mean(h1, axis=0, keepdims=True)
    var = jnp.mean((h1 - mean) ** 2, axis=0, keepdims=True)      # biased var
    h1 = (h1 - mean) * jax.lax.rsqrt(var + 1e-5)
    h1 = h1 * f32(gam_ref[...]) + f32(bet_ref[...])
    h1 = jnp.maximum(h1, 0.0)
    res = jnp.dot(h1, f32(w2_ref[...]),
                  preferred_element_type=jnp.float32) + f32(b2h_ref[...])

    # Emit batch-major (B, Td, OUT) directly — no XLA transpose afterwards.
    for b in range(B):
        rows = jnp.concatenate(
            [res[t * B + b:t * B + b + 1, :] for t in range(Td)], axis=0)
        out_ref[b] = rows.astype(out_ref.dtype)


# ------------------------------ model forward ------------------------------ #

def lstm_model_forward(p, static_variable, encoder_y, encoder_x,
                       decoder_y, decoder_x=None):
    B, Te, Cy = encoder_y.shape
    Cx = encoder_x.shape[2]
    Td = decoder_y.shape[1]
    if decoder_x is None:
        decoder_x = jnp.zeros((B, Td, Cx), encoder_x.dtype)
    H = p["w_sa"].shape[1]
    OUT = p["w2T"].shape[1]
    L = len(p["w_ih"])

    # Time-major flattened rows (row = t*B + b).  These are tiny (<=64 floats)
    # reorderings of the raw inputs; all activation-sized layout work happens
    # inside the single fused kernel.
    def tm_flat(a):
        return jnp.transpose(a, (1, 0, 2)).reshape(a.shape[1] * B, a.shape[2])

    args = [static_variable,
            tm_flat(encoder_x), tm_flat(encoder_y),
            tm_flat(decoder_x), tm_flat(decoder_y),
            p["w_sa"], p["b_sa"], p["w_fc_x"], p["w_fc_sa"], p["w_fc_z"],
            p["b_fc"]]
    for l in range(L):
        args += [p["w_ih"][l], p["w_hh"][l], p["b_lstm"][l]]
    args += [p["w1T"], p["b1"], p["gamma"], p["beta"], p["w2T"], p["b2"]]

    Rmax = max(Te, Td) * B
    return pl.pallas_call(
        functools.partial(_fused_lstm_kernel, num_layers=L),
        out_shape=jax.ShapeDtypeStruct((B, Td, OUT), encoder_y.dtype),
        scratch_shapes=[pltpu.VMEM((Rmax, 4 * H), jnp.float32),   # gx per layer
                        pltpu.VMEM((Rmax, H), jnp.float32)],      # inter-layer y
    )(*args)


# ------------------------------ param handling ------------------------------ #

def init_params(key, hidden_size, output_size, num_layers,
                static_dim=16, x_dim=1, y_dim=2):
    """Raw parameters in PyTorch layout."""
    H = hidden_size
    F_in = x_dim + y_dim * H + static_dim          # = 1 + 2H + 16 (self.fc)
    n_keys = 8 + 4 * num_layers
    keys = list(jax.random.split(key, n_keys))

    def rnd(shape, scale):
        k = keys.pop(0)
        return jax.random.uniform(k, shape, jnp.float32, -1.0, 1.0) * scale

    s_fc = 1.0 / (F_in ** 0.5)
    s_h = 1.0 / (H ** 0.5)
    params = {
        "w_fc": rnd((H, F_in), s_fc), "b_fc": rnd((H,), s_fc),
        "w_sa": rnd((H, 1), 1.0), "b_sa": rnd((H,), 1.0),
        "w_ih": [], "w_hh": [], "b_ih": [], "b_hh": [],
    }
    for _ in range(num_layers):
        params["w_ih"].append(rnd((4 * H, H), s_h))
        params["w_hh"].append(rnd((4 * H, H), s_h))
        params["b_ih"].append(rnd((4 * H,), s_h))
        params["b_hh"].append(rnd((4 * H,), s_h))
    params["w1"] = rnd((H, H), s_h)
    params["b1"] = rnd((H,), s_h)
    params["gamma"] = jnp.ones((H,), jnp.float32)  # BatchNorm1d init
    params["beta"] = jnp.zeros((H,), jnp.float32)
    params["w2"] = rnd((output_size, H), s_h)
    params["b2"] = rnd((output_size,), s_h)
    return params


def pack_params(raw, x_dim=1, y_dim=2, static_dim=16):
    """One-time repack of PyTorch-layout weights into kernel-friendly layout:
    transposed, gate-packed LSTM weights with gate order [i|f|o|g] (so sigmoid
    covers lanes 0:3H and tanh covers 3H:4H), column-split fc, row biases."""
    H = raw["w_sa"].shape[0]

    def repack(m):   # last dim is 4H with PyTorch order [i|f|g|o] -> [i|f|o|g]
        return jnp.concatenate(
            [m[..., :2 * H], m[..., 3 * H:4 * H], m[..., 2 * H:3 * H]], axis=-1)

    p = {}
    p["w_sa"] = raw["w_sa"].reshape(1, H)
    p["b_sa"] = raw["b_sa"].reshape(1, H)

    wfcT = raw["w_fc"].T                           # (F, H), F = Cx + Cy*H + Z
    p["w_fc_x"] = wfcT[:x_dim]                     # (Cx, H)
    p["w_fc_sa"] = wfcT[x_dim:x_dim + y_dim * H]   # (Cy*H, H)
    p["w_fc_z"] = wfcT[x_dim + y_dim * H:]         # (Z, H)
    p["b_fc"] = raw["b_fc"].reshape(1, H)

    p["w_ih"] = [repack(w.T) for w in raw["w_ih"]]      # (Hin, 4H)
    p["w_hh"] = [repack(w.T) for w in raw["w_hh"]]      # (H,   4H)
    p["b_lstm"] = [repack((bi + bh).reshape(1, 4 * H))
                   for bi, bh in zip(raw["b_ih"], raw["b_hh"])]

    p["w1T"] = raw["w1"].T                         # (H, H)
    p["b1"] = raw["b1"].reshape(1, H)
    p["gamma"] = raw["gamma"].reshape(1, H)
    p["beta"] = raw["beta"].reshape(1, H)
    p["w2T"] = raw["w2"].T                         # (H, OUT)
    p["b2"] = raw["b2"].reshape(1, -1)
    return p


# ---------------------------------- main ------------------------------------ #

if __name__ == "__main__":
    hidden_size, output_size, num_layers = 32, 8, 2
    B, T = 2, 8          # encoder and decoder sequence lengths match

    key = jax.random.PRNGKey(0)
    k1, k2, k3, k4, kp = jax.random.split(key, 5)
    static_variable = jax.random.normal(k1, (B, 16), jnp.float32)
    encoder_y = jax.random.normal(k2, (B, T, 2), jnp.float32)
    encoder_x = jax.random.normal(k3, (B, T, 1), jnp.float32)
    decoder_y = jax.random.normal(k4, (B, T, 2), jnp.float32)

    raw_params = init_params(kp, hidden_size, output_size, num_layers)
    params = pack_params(raw_params)               # pack ONCE, outside jit

    fwd = jax.jit(functools.partial(lstm_model_forward, params))
    out = fwd(static_variable, encoder_y, encoder_x, decoder_y)
    out = jax.block_until_ready(out)

    assert out.shape == (B, T, output_size), out.shape
    assert bool(jnp.all(jnp.isfinite(out)))
    print("KERNEL_OK")
</pallas_src>

<mosaic_0001>
module attributes {stable_mosaic.version = 11 : i64} {
  func.func @_fused_lstm_kernel(%arg0: memref<2x16xf32, #tpu.memory_space<vmem>>, %arg1: memref<16x1xf32, #tpu.memory_space<vmem>>, %arg2: memref<16x2xf32, #tpu.memory_space<vmem>>, %arg3: memref<16x1xf32, #tpu.memory_space<vmem>>, %arg4: memref<16x2xf32, #tpu.memory_space<vmem>>, %arg5: memref<1x32xf32, #tpu.memory_space<vmem>>, %arg6: memref<1x32xf32, #tpu.memory_space<vmem>>, %arg7: memref<1x32xf32, #tpu.memory_space<vmem>>, %arg8: memref<64x32xf32, #tpu.memory_space<vmem>>, %arg9: memref<16x32xf32, #tpu.memory_space<vmem>>, %arg10: memref<1x32xf32, #tpu.memory_space<vmem>>, %arg11: memref<32x128xf32, #tpu.memory_space<vmem>>, %arg12: memref<32x128xf32, #tpu.memory_space<vmem>>, %arg13: memref<1x128xf32, #tpu.memory_space<vmem>>, %arg14: memref<32x128xf32, #tpu.memory_space<vmem>>, %arg15: memref<32x128xf32, #tpu.memory_space<vmem>>, %arg16: memref<1x128xf32, #tpu.memory_space<vmem>>, %arg17: memref<32x32xf32, #tpu.memory_space<vmem>>, %arg18: memref<1x32xf32, #tpu.memory_space<vmem>>, %arg19: memref<1x32xf32, #tpu.memory_space<vmem>>, %arg20: memref<1x32xf32, #tpu.memory_space<vmem>>, %arg21: memref<32x8xf32, #tpu.memory_space<vmem>>, %arg22: memref<1x8xf32, #tpu.memory_space<vmem>>, %arg23: memref<2x8x8xf32, #tpu.memory_space<vmem>>, %arg24: memref<16x128xf32, #tpu.memory_space<vmem>>, %arg25: memref<16x32xf32, #tpu.memory_space<vmem>>) attributes {dimension_semantics = [], scalar_prefetch = 0 : i64, scratch_operands = 2 : i64, tpu.core_type = #tpu.core_type<tc>} {
    %c0 = arith.constant 0 : index
    %c0_0 = arith.constant 0 : index
    %0 = vector.load %arg5[%c0, %c0_0] : memref<1x32xf32, #tpu.memory_space<vmem>>, vector<1x32xf32>
    %c0_1 = arith.constant 0 : index
    %c0_2 = arith.constant 0 : index
    %1 = vector.load %arg6[%c0_1, %c0_2] : memref<1x32xf32, #tpu.memory_space<vmem>>, vector<1x32xf32>
    %cst = arith.constant 0.000000e+00 : f32
    %2 = vector.broadcast %cst : f32 to vector<2x32xf32>
    %c0_3 = arith.constant 0 : index
    %c0_4 = arith.constant 0 : index
    %3 = vector.load %arg2[%c0_3, %c0_4] : memref<16x2xf32, #tpu.memory_space<vmem>>, vector<16x2xf32>
    %4 = vector.extract_strided_slice %3 {offsets = [0, 0], sizes = [16, 1], strides = [1, 1]} : vector<16x2xf32> to vector<16x1xf32>
    %5 = vector.broadcast %4 : vector<16x1xf32> to vector<16x32xf32>
    %6 = vector.broadcast %0 : vector<1x32xf32> to vector<16x32xf32>
    %7 = arith.mulf %5, %6 : vector<16x32xf32>
    %8 = vector.broadcast %1 : vector<1x32xf32> to vector<16x32xf32>
    %9 = arith.addf %7, %8 : vector<16x32xf32>
    %10 = vector.extract_strided_slice %3 {offsets = [0, 1], sizes = [16, 1], strides = [1, 1]} : vector<16x2xf32> to vector<16x1xf32>
    %11 = vector.broadcast %10 : vector<16x1xf32> to vector<16x32xf32>
    %12 = vector.broadcast %0 : vector<1x32xf32> to vector<16x32xf32>
    %13 = arith.mulf %11, %12 : vector<16x32xf32>
    %14 = vector.broadcast %1 : vector<1x32xf32> to vector<16x32xf32>
    %15 = arith.addf %13, %14 : vector<16x32xf32>
    %16 = tpu.concatenate %9, %15 in 1 : vector<16x32xf32>, vector<16x32xf32> -> vector<16x64xf32>
    %17 = tpu.iota {dimensions = array<i32: 1>} : vector<16x64xi32>
    %c32_i32 = arith.constant 32 : i32
    %c0_i32 = arith.constant 0 : i32
    %18 = arith.cmpi eq, %c32_i32, %c0_i32 : i32
    %c1_i32 = arith.constant 1 : i32
    %19 = arith.select %18, %c1_i32, %c32_i32 : i32
    %20 = vector.broadcast %19 : i32 to vector<16x64xi32>
    %21 = arith.remsi %17, %20 : vector<16x64xi32>
    %c0_i32_5 = arith.constant 0 : i32
    %22 = vector.broadcast %c0_i32_5 : i32 to vector<16x64xi32>
    %23 = arith.cmpi ne, %21, %22 : vector<16x64xi32>
    %c0_i32_6 = arith.constant 0 : i32
    %24 = vector.broadcast %c0_i32_6 : i32 to vector<16x64xi32>
    %25 = arith.cmpi slt, %21, %24 : vector<16x64xi32>
    %c0_i32_7 = arith.constant 0 : i32
    %26 = arith.cmpi slt, %19, %c0_i32_7 : i32
    %27 = vector.broadcast %26 : i1 to vector<16x64xi1>
    %28 = vector.broadcast %27 : vector<16x64xi1> to vector<16x64xi1>
    %29 = arith.xori %25, %28 : vector<16x64xi1>
    %30 = arith.andi %29, %23 : vector<16x64xi1>
    %31 = vector.broadcast %19 : i32 to vector<16x64xi32>
    %32 = arith.addi %21, %31 : vector<16x64xi32>
    %33 = arith.select %30, %32, %21 : vector<16x64xi1>, vector<16x64xi32>
    %c31_i32 = arith.constant 31 : i32
    %34 = vector.broadcast %c31_i32 : i32 to vector<16x64xi32>
    %35 = arith.cmpi slt, %33, %34 : vector<16x64xi32>
    %36 = math.sin %16 : vector<16x64xf32>
    %37 = arith.select %35, %36, %16 : vector<16x64xi1>, vector<16x64xf32>
    %c0_8 = arith.constant 0 : index
    %c0_9 = arith.constant 0 : index
    %38 = vector.load %arg8[%c0_8, %c0_9] : memref<64x32xf32, #tpu.memory_space<vmem>>, vector<64x32xf32>
    %cst_10 = arith.constant dense<0.000000e+00> : vector<16x32xf32>
    %39 = tpu.matmul %37, %38, %cst_10 {dimension_numbers = #tpu.dot_dimension_numbers<[1], [0], [0], [1], [0, 0, 1, 1], [], []>} : vector<16x64xf32>, vector<64x32xf32>, vector<16x32xf32> -> vector<16x32xf32>
    %c0_11 = arith.constant 0 : index
    %c0_12 = arith.constant 0 : index
    %40 = vector.load %arg1[%c0_11, %c0_12] : memref<16x1xf32, #tpu.memory_space<vmem>>, vector<16x1xf32>
    %c0_13 = arith.constant 0 : index
    %c0_14 = arith.constant 0 : index
    %41 = vector.load %arg7[%c0_13, %c0_14] : memref<1x32xf32, #tpu.memory_space<vmem>>, vector<1x32xf32>
    %42 = vector.broadcast %40 : vector<16x1xf32> to vector<16x32xf32>
    %43 = vector.broadcast %41 : vector<1x32xf32> to vector<16x32xf32>
    %44 = arith.mulf %42, %43 : vector<16x32xf32>
    %45 = arith.addf %39, %44 : vector<16x32xf32>
    %c0_15 = arith.constant 0 : index
    %c0_16 = arith.constant 0 : index
    %46 = vector.load %arg0[%c0_15, %c0_16] : memref<2x16xf32, #tpu.memory_space<vmem>>, vector<2x16xf32>
    %c0_17 = arith.constant 0 : index
    %c0_18 = arith.constant 0 : index
    %47 = vector.load %arg9[%c0_17, %c0_18] : memref<16x32xf32, #tpu.memory_space<vmem>>, vector<16x32xf32>
    %cst_19 = arith.constant dense<0.000000e+00> : vector<2x32xf32>
    %48 = tpu.matmul %46, %47, %cst_19 {dimension_numbers = #tpu.dot_dimension_numbers<[1], [0], [0], [1], [0, 0, 1, 1], [], []>} : vector<2x16xf32>, vector<16x32xf32>, vector<2x32xf32> -> vector<2x32xf32>
    %c0_20 = arith.constant 0 : index
    %c0_21 = arith.constant 0 : index
    %49 = vector.load %arg10[%c0_20, %c0_21] : memref<1x32xf32, #tpu.memory_space<vmem>>, vector<1x32xf32>
    %50 = vector.broadcast %49 : vector<1x32xf32> to vector<2x32xf32>
    %51 = arith.addf %48, %50 : vector<2x32xf32>
    %52 = tpu.concatenate %51, %51, %51, %51, %51, %51, %51, %51 in 0 : vector<2x32xf32>, vector<2x32xf32>, vector<2x32xf32>, vector<2x32xf32>, vector<2x32xf32>, vector<2x32xf32>, vector<2x32xf32>, vector<2x32xf32> -> vector<16x32xf32>
    %53 = arith.addf %45, %52 : vector<16x32xf32>
    %c0_22 = arith.constant 0 : index
    %c0_23 = arith.constant 0 : index
    %54 = vector.load %arg11[%c0_22, %c0_23] : memref<32x128xf32, #tpu.memory_space<vmem>>, vector<32x128xf32>
    %c0_24 = arith.constant 0 : index
    %c0_25 = arith.constant 0 : index
    %55 = vector.load %arg12[%c0_24, %c0_25] : memref<32x128xf32, #tpu.memory_space<vmem>>, vector<32x128xf32>
    %c0_26 = arith.constant 0 : index
    %c0_27 = arith.constant 0 : index
    %56 = vector.load %arg13[%c0_26, %c0_27] : memref<1x128xf32, #tpu.memory_space<vmem>>, vector<1x128xf32>
    %cst_28 = arith.constant dense<0.000000e+00> : vector<16x128xf32>
    %57 = tpu.matmul %53, %54, %cst_28 {dimension_numbers = #tpu.dot_dimension_numbers<[1], [0], [0], [1], [0, 0, 1, 1], [], []>} : vector<16x32xf32>, vector<32x128xf32>, vector<16x128xf32> -> vector<16x128xf32>
    %58 = vector.broadcast %56 : vector<1x128xf32> to vector<16x128xf32>
    %59 = arith.addf %57, %58 : vector<16x128xf32>
    %c0_29 = arith.constant 0 : index
    %c0_30 = arith.constant 0 : index
    %60 = vector.load %arg24[%c0_29, %c0_30] : memref<16x128xf32, #tpu.memory_space<vmem>>, vector<16x128xf32>
    tpu.vector_store %arg24[%c0_29, %c0_30], %59 {strides = array<i32>} : memref<16x128xf32, #tpu.memory_space<vmem>>, vector<16x128xf32>,
    %c0_i32_31 = arith.constant 0 : i32
    %c2_i32 = arith.constant 2 : i32
    %61 = arith.muli %c0_i32_31, %c2_i32 : i32
    %62 = arith.index_cast %61 : i32 to index
    %c0_32 = arith.constant 0 : index
    %63 = vector.load %arg24[%62, %c0_32] : memref<16x128xf32, #tpu.memory_space<vmem>>, vector<2x128xf32>
    %cst_33 = arith.constant dense<0.000000e+00> : vector<2x128xf32>
    %64 = tpu.matmul %2, %55, %cst_33 {dimension_numbers = #tpu.dot_dimension_numbers<[1], [0], [0], [1], [0, 0, 1, 1], [], []>} : vector<2x32xf32>, vector<32x128xf32>, vector<2x128xf32> -> vector<2x128xf32>
    %65 = arith.addf %63, %64 : vector<2x128xf32>
    %66 = vector.extract_strided_slice %65 {offsets = [0, 0], sizes = [2, 96], strides = [1, 1]} : vector<2x128xf32> to vector<2x96xf32>
    %67 = arith.negf %66 : vector<2x96xf32>
    %68 = math.exp %67 : vector<2x96xf32>
    %cst_34 = arith.constant 1.000000e+00 : f32
    %69 = vector.broadcast %cst_34 : f32 to vector<2x96xf32>
    %70 = arith.addf %69, %68 : vector<2x96xf32>
    %71 = arith.divf %69, %70 : vector<2x96xf32>
    %72 = vector.extract_strided_slice %71 {offsets = [0, 0], sizes = [2, 32], strides = [1, 1]} : vector<2x96xf32> to vector<2x32xf32>
    %73 = vector.extract_strided_slice %71 {offsets = [0, 32], sizes = [2, 32], strides = [1, 1]} : vector<2x96xf32> to vector<2x32xf32>
    %74 = vector.extract_strided_slice %71 {offsets = [0, 64], sizes = [2, 32], strides = [1, 1]} : vector<2x96xf32> to vector<2x32xf32>
    %75 = vector.extract_strided_slice %65 {offsets = [0, 96], sizes = [2, 32], strides = [1, 1]} : vector<2x128xf32> to vector<2x32xf32>
    %76 = math.tanh %75 : vector<2x32xf32>
    %77 = arith.mulf %73, %2 : vector<2x32xf32>
    %78 = arith.mulf %72, %76 : vector<2x32xf32>
    %79 = arith.addf %77, %78 : vector<2x32xf32>
    %80 = math.tanh %79 : vector<2x32xf32>
    %81 = arith.mulf %74, %80 : vector<2x32xf32>
    %c2_i32_35 = arith.constant 2 : i32
    %82 = arith.muli %c0_i32_31, %c2_i32_35 : i32
    %83 = arith.index_cast %82 : i32 to index
    %c0_36 = arith.constant 0 : index
    %84 = vector.load %arg25[%83, %c0_36] : memref<16x32xf32, #tpu.memory_space<vmem>>, vector<2x32xf32>
    tpu.vector_store %arg25[%83, %c0_36], %81 {strides = array<i32>} : memref<16x32xf32, #tpu.memory_space<vmem>>, vector<2x32xf32>,
    %c1_i32_37 = arith.constant 1 : i32
    %c2_i32_38 = arith.constant 2 : i32
    %85 = arith.muli %c1_i32_37, %c2_i32_38 : i32
    %86 = arith.index_cast %85 : i32 to index
    %c0_39 = arith.constant 0 : index
    %87 = vector.load %arg24[%86, %c0_39] : memref<16x128xf32, #tpu.memory_space<vmem>>, vector<2x128xf32>
    %cst_40 = arith.constant dense<0.000000e+00> : vector<2x128xf32>
    %88 = tpu.matmul %81, %55, %cst_40 {dimension_numbers = #tpu.dot_dimension_numbers<[1], [0], [0], [1], [0, 0, 1, 1], [], []>} : vector<2x32xf32>, vector<32x128xf32>, vector<2x128xf32> -> vector<2x128xf32>
    %89 = arith.addf %87, %88 : vector<2x128xf32>
    %90 = vector.extract_strided_slice %89 {offsets = [0, 0], sizes = [2, 96], strides = [1, 1]} : vector<2x128xf32> to vector<2x96xf32>
    %91 = arith.negf %90 : vector<2x96xf32>
    %92 = math.exp %91 : vector<2x96xf32>
    %cst_41 = arith.constant 1.000000e+00 : f32
    %93 = vector.broadcast %cst_41 : f32 to vector<2x96xf32>
    %94 = arith.addf %93, %92 : vector<2x96xf32>
    %95 = arith.divf %93, %94 : vector<2x96xf32>
    %96 = vector.extract_strided_slice %95 {offsets = [0, 0], sizes = [2, 32], strides = [1, 1]} : vector<2x96xf32> to vector<2x32xf32>
    %97 = vector.extract_strided_slice %95 {offsets = [0, 32], sizes = [2, 32], strides = [1, 1]} : vector<2x96xf32> to vector<2x32xf32>
    %98 = vector.extract_strided_slice %95 {offsets = [0, 64], sizes = [2, 32], strides = [1, 1]} : vector<2x96xf32> to vector<2x32xf32>
    %99 = vector.extract_strided_slice %89 {offsets = [0, 96], sizes = [2, 32], strides = [1, 1]} : vector<2x128xf32> to vector<2x32xf32>
    %100 = math.tanh %99 : vector<2x32xf32>
    %101 = arith.mulf %97, %79 : vector<2x32xf32>
    %102 = arith.mulf %96, %100 : vector<2x32xf32>
    %103 = arith.addf %101, %102 : vector<2x32xf32>
    %104 = math.tanh %103 : vector<2x32xf32>
    %105 = arith.mulf %98, %104 : vector<2x32xf32>
    %c2_i32_42 = arith.constant 2 : i32
    %106 = arith.muli %c1_i32_37, %c2_i32_42 : i32
    %107 = arith.index_cast %106 : i32 to index
    %c0_43 = arith.constant 0 : index
    %108 = vector.load %arg25[%107, %c0_43] : memref<16x32xf32, #tpu.memory_space<vmem>>, vector<2x32xf32>
    tpu.vector_store %arg25[%107, %c0_43], %105 {strides = array<i32>} : memref<16x32xf32, #tpu.memory_space<vmem>>, vector<2x32xf32>,
    %c2_i32_44 = arith.constant 2 : i32
    %c2_i32_45 = arith.constant 2 : i32
    %109 = arith.muli %c2_i32_44, %c2_i32_45 : i32
    %110 = arith.index_cast %109 : i32 to index
    %c0_46 = arith.constant 0 : index
    %111 = vector.load %arg24[%110, %c0_46] : memref<16x128xf32, #tpu.memory_space<vmem>>, vector<2x128xf32>
    %cst_47 = arith.constant dense<0.000000e+00> : vector<2x128xf32>
    %112 = tpu.matmul %105, %55, %cst_47 {dimension_numbers = #tpu.dot_dimension_numbers<[1], [0], [0], [1], [0, 0, 1, 1], [], []>} : vector<2x32xf32>, vector<32x128xf32>, vector<2x128xf32> -> vector<2x128xf32>
    %113 = arith.addf %111, %112 : vector<2x128xf32>
    %114 = vector.extract_strided_slice %113 {offsets = [0, 0], sizes = [2, 96], strides = [1, 1]} : vector<2x128xf32> to vector<2x96xf32>
    %115 = arith.negf %114 : vector<2x96xf32>
    %116 = math.exp %115 : vector<2x96xf32>
    %cst_48 = arith.constant 1.000000e+00 : f32
    %117 = vector.broadcast %cst_48 : f32 to vector<2x96xf32>
    %118 = arith.addf %117, %116 : vector<2x96xf32>
    %119 = arith.divf %117, %118 : vector<2x96xf32>
    %120 = vector.extract_strided_slice %119 {offsets = [0, 0], sizes = [2, 32], strides = [1, 1]} : vector<2x96xf32> to vector<2x32xf32>
    %121 = vector.extract_strided_slice %119 {offsets = [0, 32], sizes = [2, 32], strides = [1, 1]} : vector<2x96xf32> to vector<2x32xf32>
    %122 = vector.extract_strided_slice %119 {offsets = [0, 64], sizes = [2, 32], strides = [1, 1]} : vector<2x96xf32> to vector<2x32xf32>
    %123 = vector.extract_strided_slice %113 {offsets = [0, 96], sizes = [2, 32], strides = [1, 1]} : vector<2x128xf32> to vector<2x32xf32>
    %124 = math.tanh %123 : vector<2x32xf32>
    %125 = arith.mulf %121, %103 : vector<2x32xf32>
    %126 = arith.mulf %120, %124 : vector<2x32xf32>
    %127 = arith.addf %125, %126 : vector<2x32xf32>
    %128 = math.tanh %127 : vector<2x32xf32>
    %129 = arith.mulf %122, %128 : vector<2x32xf32>
    %c2_i32_49 = arith.constant 2 : i32
    %130 = arith.muli %c2_i32_44, %c2_i32_49 : i32
    %131 = arith.index_cast %130 : i32 to index
    %c0_50 = arith.constant 0 : index
    %132 = vector.load %arg25[%131, %c0_50] : memref<16x32xf32, #tpu.memory_space<vmem>>, vector<2x32xf32>
    tpu.vector_store %arg25[%131, %c0_50], %129 {strides = array<i32>} : memref<16x32xf32, #tpu.memory_space<vmem>>, vector<2x32xf32>,
    %c3_i32 = arith.constant 3 : i32
    %c2_i32_51 = arith.constant 2 : i32
    %133 = arith.muli %c3_i32, %c2_i32_51 : i32
    %134 = arith.index_cast %133 : i32 to index
    %c0_52 = arith.constant 0 : index
    %135 = vector.load %arg24[%134, %c0_52] : memref<16x128xf32, #tpu.memory_space<vmem>>, vector<2x128xf32>
    %cst_53 = arith.constant dense<0.000000e+00> : vector<2x128xf32>
    %136 = tpu.matmul %129, %55, %cst_53 {dimension_numbers = #tpu.dot_dimension_numbers<[1], [0], [0], [1], [0, 0, 1, 1], [], []>} : vector<2x32xf32>, vector<32x128xf32>, vector<2x128xf32> -> vector<2x128xf32>
    %137 = arith.addf %135, %136 : vector<2x128xf32>
    %138 = vector.extract_strided_slice %137 {offsets = [0, 0], sizes = [2, 96], strides = [1, 1]} : vector<2x128xf32> to vector<2x96xf32>
    %139 = arith.negf %138 : vector<2x96xf32>
    %140 = math.exp %139 : vector<2x96xf32>
    %cst_54 = arith.constant 1.000000e+00 : f32
    %141 = vector.broadcast %cst_54 : f32 to vector<2x96xf32>
    %142 = arith.addf %141, %140 : vector<2x96xf32>
    %143 = arith.divf %141, %142 : vector<2x96xf32>
    %144 = vector.extract_strided_slice %143 {offsets = [0, 0], sizes = [2, 32], strides = [1, 1]} : vector<2x96xf32> to vector<2x32xf32>
    %145 = vector.extract_strided_slice %143 {offsets = [0, 32], sizes = [2, 32], strides = [1, 1]} : vector<2x96xf32> to vector<2x32xf32>
    %146 = vector.extract_strided_slice %143 {offsets = [0, 64], sizes = [2, 32], strides = [1, 1]} : vector<2x96xf32> to vector<2x32xf32>
    %147 = vector.extract_strided_slice %137 {offsets = [0, 96], sizes = [2, 32], strides = [1, 1]} : vector<2x128xf32> to vector<2x32xf32>
    %148 = math.tanh %147 : vector<2x32xf32>
    %149 = arith.mulf %145, %127 : vector<2x32xf32>
    %150 = arith.mulf %144, %148 : vector<2x32xf32>
    %151 = arith.addf %149, %150 : vector<2x32xf32>
    %152 = math.tanh %151 : vector<2x32xf32>
    %153 = arith.mulf %146, %152 : vector<2x32xf32>
    %c2_i32_55 = arith.constant 2 : i32
    %154 = arith.muli %c3_i32, %c2_i32_55 : i32
    %155 = arith.index_cast %154 : i32 to index
    %c0_56 = arith.constant 0 : index
    %156 = vector.load %arg25[%155, %c0_56] : memref<16x32xf32, #tpu.memory_space<vmem>>, vector<2x32xf32>
    tpu.vector_store %arg25[%155, %c0_56], %153 {strides = array<i32>} : memref<16x32xf32, #tpu.memory_space<vmem>>, vector<2x32xf32>,
    %c4_i32 = arith.constant 4 : i32
    %c2_i32_57 = arith.constant 2 : i32
    %157 = arith.muli %c4_i32, %c2_i32_57 : i32
    %158 = arith.index_cast %157 : i32 to index
    %c0_58 = arith.constant 0 : index
    %159 = vector.load %arg24[%158, %c0_58] : memref<16x128xf32, #tpu.memory_space<vmem>>, vector<2x128xf32>
    %cst_59 = arith.constant dense<0.000000e+00> : vector<2x128xf32>
    %160 = tpu.matmul %153, %55, %cst_59 {dimension_numbers = #tpu.dot_dimension_numbers<[1], [0], [0], [1], [0, 0, 1, 1], [], []>} : vector<2x32xf32>, vector<32x128xf32>, vector<2x128xf32> -> vector<2x128xf32>
    %161 = arith.addf %159, %160 : vector<2x128xf32>
    %162 = vector.extract_strided_slice %161 {offsets = [0, 0], sizes = [2, 96], strides = [1, 1]} : vector<2x128xf32> to vector<2x96xf32>
    %163 = arith.negf %162 : vector<2x96xf32>
    %164 = math.exp %163 : vector<2x96xf32>
    %cst_60 = arith.constant 1.000000e+00 : f32
    %165 = vector.broadcast %cst_60 : f32 to vector<2x96xf32>
    %166 = arith.addf %165, %164 : vector<2x96xf32>
    %167 = arith.divf %165, %166 : vector<2x96xf32>
    %168 = vector.extract_strided_slice %167 {offsets = [0, 0], sizes = [2, 32], strides = [1, 1]} : vector<2x96xf32> to vector<2x32xf32>
    %169 = vector.extract_strided_slice %167 {offsets = [0, 32], sizes = [2, 32], strides = [1, 1]} : vector<2x96xf32> to vector<2x32xf32>
    %170 = vector.extract_strided_slice %167 {offsets = [0, 64], sizes = [2, 32], strides = [1, 1]} : vector<2x96xf32> to vector<2x32xf32>
    %171 = vector.extract_strided_slice %161 {offsets = [0, 96], sizes = [2, 32], strides = [1, 1]} : vector<2x128xf32> to vector<2x32xf32>
    %172 = math.tanh %171 : vector<2x32xf32>
    %173 = arith.mulf %169, %151 : vector<2x32xf32>
    %174 = arith.mulf %168, %172 : vector<2x32xf32>
    %175 = arith.addf %173, %174 : vector<2x32xf32>
    %176 = math.tanh %175 : vector<2x32xf32>
    %177 = arith.mulf %170, %176 : vector<2x32xf32>
    %c2_i32_61 = arith.constant 2 : i32
    %178 = arith.muli %c4_i32, %c2_i32_61 : i32
    %179 = arith.index_cast %178 : i32 to index
    %c0_62 = arith.constant 0 : index
    %180 = vector.load %arg25[%179, %c0_62] : memref<16x32xf32, #tpu.memory_space<vmem>>, vector<2x32xf32>
    tpu.vector_store %arg25[%179, %c0_62], %177 {strides = array<i32>} : memref<16x32xf32, #tpu.memory_space<vmem>>, vector<2x32xf32>,
    %c5_i32 = arith.constant 5 : i32
    %c2_i32_63 = arith.constant 2 : i32
    %181 = arith.muli %c5_i32, %c2_i32_63 : i32
    %182 = arith.index_cast %181 : i32 to index
    %c0_64 = arith.constant 0 : index
    %183 = vector.load %arg24[%182, %c0_64] : memref<16x128xf32, #tpu.memory_space<vmem>>, vector<2x128xf32>
    %cst_65 = arith.constant dense<0.000000e+00> : vector<2x128xf32>
    %184 = tpu.matmul %177, %55, %cst_65 {dimension_numbers = #tpu.dot_dimension_numbers<[1], [0], [0], [1], [0, 0, 1, 1], [], []>} : vector<2x32xf32>, vector<32x128xf32>, vector<2x128xf32> -> vector<2x128xf32>
    %185 = arith.addf %183, %184 : vector<2x128xf32>
    %186 = vector.extract_strided_slice %185 {offsets = [0, 0], sizes = [2, 96], strides = [1, 1]} : vector<2x128xf32> to vector<2x96xf32>
    %187 = arith.negf %186 : vector<2x96xf32>
    %188 = math.exp %187 : vector<2x96xf32>
    %cst_66 = arith.constant 1.000000e+00 : f32
    %189 = vector.broadcast %cst_66 : f32 to vector<2x96xf32>
    %190 = arith.addf %189, %188 : vector<2x96xf32>
    %191 = arith.divf %189, %190 : vector<2x96xf32>
    %192 = vector.extract_strided_slice %191 {offsets = [0, 0], sizes = [2, 32], strides = [1, 1]} : vector<2x96xf32> to vector<2x32xf32>
    %193 = vector.extract_strided_slice %191 {offsets = [0, 32], sizes = [2, 32], strides = [1, 1]} : vector<2x96xf32> to vector<2x32xf32>
    %194 = vector.extract_strided_slice %191 {offsets = [0, 64], sizes = [2, 32], strides = [1, 1]} : vector<2x96xf32> to vector<2x32xf32>
    %195 = vector.extract_strided_slice %185 {offsets = [0, 96], sizes = [2, 32], strides = [1, 1]} : vector<2x128xf32> to vector<2x32xf32>
    %196 = math.tanh %195 : vector<2x32xf32>
    %197 = arith.mulf %193, %175 : vector<2x32xf32>
    %198 = arith.mulf %192, %196 : vector<2x32xf32>
    %199 = arith.addf %197, %198 : vector<2x32xf32>
    %200 = math.tanh %199 : vector<2x32xf32>
    %201 = arith.mulf %194, %200 : vector<2x32xf32>
    %c2_i32_67 = arith.constant 2 : i32
    %202 = arith.muli %c5_i32, %c2_i32_67 : i32
    %203 = arith.index_cast %202 : i32 to index
    %c0_68 = arith.constant 0 : index
    %204 = vector.load %arg25[%203, %c0_68] : memref<16x32xf32, #tpu.memory_space<vmem>>, vector<2x32xf32>
    tpu.vector_store %arg25[%203, %c0_68], %201 {strides = array<i32>} : memref<16x32xf32, #tpu.memory_space<vmem>>, vector<2x32xf32>,
    %c6_i32 = arith.constant 6 : i32
    %c2_i32_69 = arith.constant 2 : i32
    %205 = arith.muli %c6_i32, %c2_i32_69 : i32
    %206 = arith.index_cast %205 : i32 to index
    %c0_70 = arith.constant 0 : index
    %207 = vector.load %arg24[%206, %c0_70] : memref<16x128xf32, #tpu.memory_space<vmem>>, vector<2x128xf32>
    %cst_71 = arith.constant dense<0.000000e+00> : vector<2x128xf32>
    %208 = tpu.matmul %201, %55, %cst_71 {dimension_numbers = #tpu.dot_dimension_numbers<[1], [0], [0], [1], [0, 0, 1, 1], [], []>} : vector<2x32xf32>, vector<32x128xf32>, vector<2x128xf32> -> vector<2x128xf32>
    %209 = arith.addf %207, %208 : vector<2x128xf32>
    %210 = vector.extract_strided_slice %209 {offsets = [0, 0], sizes = [2, 96], strides = [1, 1]} : vector<2x128xf32> to vector<2x96xf32>
    %211 = arith.negf %210 : vector<2x96xf32>
    %212 = math.exp %211 : vector<2x96xf32>
    %cst_72 = arith.constant 1.000000e+00 : f32
    %213 = vector.broadcast %cst_72 : f32 to vector<2x96xf32>
    %214 = arith.addf %213, %212 : vector<2x96xf32>
    %215 = arith.divf %213, %214 : vector<2x96xf32>
    %216 = vector.extract_strided_slice %215 {offsets = [0, 0], sizes = [2, 32], strides = [1, 1]} : vector<2x96xf32> to vector<2x32xf32>
    %217 = vector.extract_strided_slice %215 {offsets = [0, 32], sizes = [2, 32], strides = [1, 1]} : vector<2x96xf32> to vector<2x32xf32>
    %218 = vector.extract_strided_slice %215 {offsets = [0, 64], sizes = [2, 32], strides = [1, 1]} : vector<2x96xf32> to vector<2x32xf32>
    %219 = vector.extract_strided_slice %209 {offsets = [0, 96], sizes = [2, 32], strides = [1, 1]} : vector<2x128xf32> to vector<2x32xf32>
    %220 = math.tanh %219 : vector<2x32xf32>
    %221 = arith.mulf %217, %199 : vector<2x32xf32>
    %222 = arith.mulf %216, %220 : vector<2x32xf32>
    %223 = arith.addf %221, %222 : vector<2x32xf32>
    %224 = math.tanh %223 : vector<2x32xf32>
    %225 = arith.mulf %218, %224 : vector<2x32xf32>
    %c2_i32_73 = arith.constant 2 : i32
    %226 = arith.muli %c6_i32, %c2_i32_73 : i32
    %227 = arith.index_cast %226 : i32 to index
    %c0_74 = arith.constant 0 : index
    %228 = vector.load %arg25[%227, %c0_74] : memref<16x32xf32, #tpu.memory_space<vmem>>, vector<2x32xf32>
    tpu.vector_store %arg25[%227, %c0_74], %225 {strides = array<i32>} : memref<16x32xf32, #tpu.memory_space<vmem>>, vector<2x32xf32>,
    %c7_i32 = arith.constant 7 : i32
    %c2_i32_75 = arith.constant 2 : i32
    %229 = arith.muli %c7_i32, %c2_i32_75 : i32
    %230 = arith.index_cast %229 : i32 to index
    %c0_76 = arith.constant 0 : index
    %231 = vector.load %arg24[%230, %c0_76] : memref<16x128xf32, #tpu.memory_space<vmem>>, vector<2x128xf32>
    %cst_77 = arith.constant dense<0.000000e+00> : vector<2x128xf32>
    %232 = tpu.matmul %225, %55, %cst_77 {dimension_numbers = #tpu.dot_dimension_numbers<[1], [0], [0], [1], [0, 0, 1, 1], [], []>} : vector<2x32xf32>, vector<32x128xf32>, vector<2x128xf32> -> vector<2x128xf32>
    %233 = arith.addf %231, %232 : vector<2x128xf32>
    %234 = vector.extract_strided_slice %233 {offsets = [0, 0], sizes = [2, 96], strides = [1, 1]} : vector<2x128xf32> to vector<2x96xf32>
    %235 = arith.negf %234 : vector<2x96xf32>
    %236 = math.exp %235 : vector<2x96xf32>
    %cst_78 = arith.constant 1.000000e+00 : f32
    %237 = vector.broadcast %cst_78 : f32 to vector<2x96xf32>
    %238 = arith.addf %237, %236 : vector<2x96xf32>
    %239 = arith.divf %237, %238 : vector<2x96xf32>
    %240 = vector.extract_strided_slice %239 {offsets = [0, 0], sizes = [2, 32], strides = [1, 1]} : vector<2x96xf32> to vector<2x32xf32>
    %241 = vector.extract_strided_slice %239 {offsets = [0, 32], sizes = [2, 32], strides = [1, 1]} : vector<2x96xf32> to vector<2x32xf32>
    %242 = vector.extract_strided_slice %239 {offsets = [0, 64], sizes = [2, 32], strides = [1, 1]} : vector<2x96xf32> to vector<2x32xf32>
    %243 = vector.extract_strided_slice %233 {offsets = [0, 96], sizes = [2, 32], strides = [1, 1]} : vector<2x128xf32> to vector<2x32xf32>
    %244 = math.tanh %243 : vector<2x32xf32>
    %245 = arith.mulf %241, %223 : vector<2x32xf32>
    %246 = arith.mulf %240, %244 : vector<2x32xf32>
    %247 = arith.addf %245, %246 : vector<2x32xf32>
    %248 = math.tanh %247 : vector<2x32xf32>
    %249 = arith.mulf %242, %248 : vector<2x32xf32>
    %c2_i32_79 = arith.constant 2 : i32
    %250 = arith.muli %c7_i32, %c2_i32_79 : i32
    %251 = arith.index_cast %250 : i32 to index
    %c0_80 = arith.constant 0 : index
    %252 = vector.load %arg25[%251, %c0_80] : memref<16x32xf32, #tpu.memory_space<vmem>>, vector<2x32xf32>
    tpu.vector_store %arg25[%251, %c0_80], %249 {strides = array<i32>} : memref<16x32xf32, #tpu.memory_space<vmem>>, vector<2x32xf32>,
    %c8_i32 = arith.constant 8 : i32
    %c0_81 = arith.constant 0 : index
    %c0_82 = arith.constant 0 : index
    %253 = vector.load %arg25[%c0_81, %c0_82] : memref<16x32xf32, #tpu.memory_space<vmem>>, vector<16x32xf32>
    %c0_83 = arith.constant 0 : index
    %c0_84 = arith.constant 0 : index
    %254 = vector.load %arg14[%c0_83, %c0_84] : memref<32x128xf32, #tpu.memory_space<vmem>>, vector<32x128xf32>
    %c0_85 = arith.constant 0 : index
    %c0_86 = arith.constant 0 : index
    %255 = vector.load %arg15[%c0_85, %c0_86] : memref<32x128xf32, #tpu.memory_space<vmem>>, vector<32x128xf32>
    %c0_87 = arith.constant 0 : index
    %c0_88 = arith.constant 0 : index
    %256 = vector.load %arg16[%c0_87, %c0_88] : memref<1x128xf32, #tpu.memory_space<vmem>>, vector<1x128xf32>
    %cst_89 = arith.constant dense<0.000000e+00> : vector<16x128xf32>
    %257 = tpu.matmul %253, %254, %cst_89 {dimension_numbers = #tpu.dot_dimension_numbers<[1], [0], [0], [1], [0, 0, 1, 1], [], []>} : vector<16x32xf32>, vector<32x128xf32>, vector<16x128xf32> -> vector<16x128xf32>
    %258 = vector.broadcast %256 : vector<1x128xf32> to vector<16x128xf32>
    %259 = arith.addf %257, %258 : vector<16x128xf32>
    %c0_90 = arith.constant 0 : index
    %c0_91 = arith.constant 0 : index
    %260 = vector.load %arg24[%c0_90, %c0_91] : memref<16x128xf32, #tpu.memory_space<vmem>>, vector<16x128xf32>
    tpu.vector_store %arg24[%c0_90, %c0_91], %259 {strides = array<i32>} : memref<16x128xf32, #tpu.memory_space<vmem>>, vector<16x128xf32>,
    %c0_i32_92 = arith.constant 0 : i32
    %c2_i32_93 = arith.constant 2 : i32
    %261 = arith.muli %c0_i32_92, %c2_i32_93 : i32
    %262 = arith.index_cast %261 : i32 to index
    %c0_94 = arith.constant 0 : index
    %263 = vector.load %arg24[%262, %c0_94] : memref<16x128xf32, #tpu.memory_space<vmem>>, vector<2x128xf32>
    %cst_95 = arith.constant dense<0.000000e+00> : vector<2x128xf32>
    %264 = tpu.matmul %2, %255, %cst_95 {dimension_numbers = #tpu.dot_dimension_numbers<[1], [0], [0], [1], [0, 0, 1, 1], [], []>} : vector<2x32xf32>, vector<32x128xf32>, vector<2x128xf32> -> vector<2x128xf32>
    %265 = arith.addf %263, %264 : vector<2x128xf32>
    %266 = vector.extract_strided_slice %265 {offsets = [0, 0], sizes = [2, 96], strides = [1, 1]} : vector<2x128xf32> to vector<2x96xf32>
    %267 = arith.negf %266 : vector<2x96xf32>
    %268 = math.exp %267 : vector<2x96xf32>
    %cst_96 = arith.constant 1.000000e+00 : f32
    %269 = vector.broadcast %cst_96 : f32 to vector<2x96xf32>
    %270 = arith.addf %269, %268 : vector<2x96xf32>
    %271 = arith.divf %269, %270 : vector<2x96xf32>
    %272 = vector.extract_strided_slice %271 {offsets = [0, 0], sizes = [2, 32], strides = [1, 1]} : vector<2x96xf32> to vector<2x32xf32>
    %273 = vector.extract_strided_slice %271 {offsets = [0, 32], sizes = [2, 32], strides = [1, 1]} : vector<2x96xf32> to vector<2x32xf32>
    %274 = vector.extract_strided_slice %271 {offsets = [0, 64], sizes = [2, 32], strides = [1, 1]} : vector<2x96xf32> to vector<2x32xf32>
    %275 = vector.extract_strided_slice %265 {offsets = [0, 96], sizes = [2, 32], strides = [1, 1]} : vector<2x128xf32> to vector<2x32xf32>
    %276 = math.tanh %275 : vector<2x32xf32>
    %277 = arith.mulf %273, %2 : vector<2x32xf32>
    %278 = arith.mulf %272, %276 : vector<2x32xf32>
    %279 = arith.addf %277, %278 : vector<2x32xf32>
    %280 = math.tanh %279 : vector<2x32xf32>
    %281 = arith.mulf %274, %280 : vector<2x32xf32>
    %c1_i32_97 = arith.constant 1 : i32
    %c2_i32_98 = arith.constant 2 : i32
    %282 = arith.muli %c1_i32_97, %c2_i32_98 : i32
    %283 = arith.index_cast %282 : i32 to index
    %c0_99 = arith.constant 0 : index
    %284 = vector.load %arg24[%283, %c0_99] : memref<16x128xf32, #tpu.memory_space<vmem>>, vector<2x128xf32>
    %cst_100 = arith.constant dense<0.000000e+00> : vector<2x128xf32>
    %285 = tpu.matmul %281, %255, %cst_100 {dimension_numbers = #tpu.dot_dimension_numbers<[1], [0], [0], [1], [0, 0, 1, 1], [], []>} : vector<2x32xf32>, vector<32x128xf32>, vector<2x128xf32> -> vector<2x128xf32>
    %286 = arith.addf %284, %285 : vector<2x128xf32>
    %287 = vector.extract_strided_slice %286 {offsets = [0, 0], sizes = [2, 96], strides = [1, 1]} : vector<2x128xf32> to vector<2x96xf32>
    %288 = arith.negf %287 : vector<2x96xf32>
    %289 = math.exp %288 : vector<2x96xf32>
    %cst_101 = arith.constant 1.000000e+00 : f32
    %290 = vector.broadcast %cst_101 : f32 to vector<2x96xf32>
    %291 = arith.addf %290, %289 : vector<2x96xf32>
    %292 = arith.divf %290, %291 : vector<2x96xf32>
    %293 = vector.extract_strided_slice %292 {offsets = [0, 0], sizes = [2, 32], strides = [1, 1]} : vector<2x96xf32> to vector<2x32xf32>
    %294 = vector.extract_strided_slice %292 {offsets = [0, 32], sizes = [2, 32], strides = [1, 1]} : vector<2x96xf32> to vector<2x32xf32>
    %295 = vector.extract_strided_slice %292 {offsets = [0, 64], sizes = [2, 32], strides = [1, 1]} : vector<2x96xf32> to vector<2x32xf32>
    %296 = vector.extract_strided_slice %286 {offsets = [0, 96], sizes = [2, 32], strides = [1, 1]} : vector<2x128xf32> to vector<2x32xf32>
    %297 = math.tanh %296 : vector<2x32xf32>
    %298 = arith.mulf %294, %279 : vector<2x32xf32>
    %299 = arith.mulf %293, %297 : vector<2x32xf32>
    %300 = arith.addf %298, %299 : vector<2x32xf32>
    %301 = math.tanh %300 : vector<2x32xf32>
    %302 = arith.mulf %295, %301 : vector<2x32xf32>
    %c2_i32_102 = arith.constant 2 : i32
    %c2_i32_103 = arith.constant 2 : i32
    %303 = arith.muli %c2_i32_102, %c2_i32_103 : i32
    %304 = arith.index_cast %303 : i32 to index
    %c0_104 = arith.constant 0 : index
    %305 = vector.load %arg24[%304, %c0_104] : memref<16x128xf32, #tpu.memory_space<vmem>>, vector<2x128xf32>
    %cst_105 = arith.constant dense<0.000000e+00> : vector<2x128xf32>
    %306 = tpu.matmul %302, %255, %cst_105 {dimension_numbers = #tpu.dot_dimension_numbers<[1], [0], [0], [1], [0, 0, 1, 1], [], []>} : vector<2x32xf32>, vector<32x128xf32>, vector<2x128xf32> -> vector<2x128xf32>
    %307 = arith.addf %305, %306 : vector<2x128xf32>
    %308 = vector.extract_strided_slice %307 {offsets = [0, 0], sizes = [2, 96], strides = [1, 1]} : vector<2x128xf32> to vector<2x96xf32>
    %309 = arith.negf %308 : vector<2x96xf32>
    %310 = math.exp %309 : vector<2x96xf32>
    %cst_106 = arith.constant 1.000000e+00 : f32
    %311 = vector.broadcast %cst_106 : f32 to vector<2x96xf32>
    %312 = arith.addf %311, %310 : vector<2x96xf32>
    %313 = arith.divf %311, %312 : vector<2x96xf32>
    %314 = vector.extract_strided_slice %313 {offsets = [0, 0], sizes = [2, 32], strides = [1, 1]} : vector<2x96xf32> to vector<2x32xf32>
    %315 = vector.extract_strided_slice %313 {offsets = [0, 32], sizes = [2, 32], strides = [1, 1]} : vector<2x96xf32> to vector<2x32xf32>
    %316 = vector.extract_strided_slice %313 {offsets = [0, 64], sizes = [2, 32], strides = [1, 1]} : vector<2x96xf32> to vector<2x32xf32>
    %317 = vector.extract_strided_slice %307 {offsets = [0, 96], sizes = [2, 32], strides = [1, 1]} : vector<2x128xf32> to vector<2x32xf32>
    %318 = math.tanh %317 : vector<2x32xf32>
    %319 = arith.mulf %315, %300 : vector<2x32xf32>
    %320 = arith.mulf %314, %318 : vector<2x32xf32>
    %321 = arith.addf %319, %320 : vector<2x32xf32>
    %322 = math.tanh %321 : vector<2x32xf32>
    %323 = arith.mulf %316, %322 : vector<2x32xf32>
    %c3_i32_107 = arith.constant 3 : i32
    %c2_i32_108 = arith.constant 2 : i32
    %324 = arith.muli %c3_i32_107, %c2_i32_108 : i32
    %325 = arith.index_cast %324 : i32 to index
    %c0_109 = arith.constant 0 : index
    %326 = vector.load %arg24[%325, %c0_109] : memref<16x128xf32, #tpu.memory_space<vmem>>, vector<2x128xf32>
    %cst_110 = arith.constant dense<0.000000e+00> : vector<2x128xf32>
    %327 = tpu.matmul %323, %255, %cst_110 {dimension_numbers = #tpu.dot_dimension_numbers<[1], [0], [0], [1], [0, 0, 1, 1], [], []>} : vector<2x32xf32>, vector<32x128xf32>, vector<2x128xf32> -> vector<2x128xf32>
    %328 = arith.addf %326, %327 : vector<2x128xf32>
    %329 = vector.extract_strided_slice %328 {offsets = [0, 0], sizes = [2, 96], strides = [1, 1]} : vector<2x128xf32> to vector<2x96xf32>
    %330 = arith.negf %329 : vector<2x96xf32>
    %331 = math.exp %330 : vector<2x96xf32>
    %cst_111 = arith.constant 1.000000e+00 : f32
    %332 = vector.broadcast %cst_111 : f32 to vector<2x96xf32>
    %333 = arith.addf %332, %331 : vector<2x96xf32>
    %334 = arith.divf %332, %333 : vector<2x96xf32>
    %335 = vector.extract_strided_slice %334 {offsets = [0, 0], sizes = [2, 32], strides = [1, 1]} : vector<2x96xf32> to vector<2x32xf32>
    %336 = vector.extract_strided_slice %334 {offsets = [0, 32], sizes = [2, 32], strides = [1, 1]} : vector<2x96xf32> to vector<2x32xf32>
    %337 = vector.extract_strided_slice %334 {offsets = [0, 64], sizes = [2, 32], strides = [1, 1]} : vector<2x96xf32> to vector<2x32xf32>
    %338 = vector.extract_strided_slice %328 {offsets = [0, 96], sizes = [2, 32], strides = [1, 1]} : vector<2x128xf32> to vector<2x32xf32>
    %339 = math.tanh %338 : vector<2x32xf32>
    %340 = arith.mulf %336, %321 : vector<2x32xf32>
    %341 = arith.mulf %335, %339 : vector<2x32xf32>
    %342 = arith.addf %340, %341 : vector<2x32xf32>
    %343 = math.tanh %342 : vector<2x32xf32>
    %344 = arith.mulf %337, %343 : vector<2x32xf32>
    %c4_i32_112 = arith.constant 4 : i32
    %c2_i32_113 = arith.constant 2 : i32
    %345 = arith.muli %c4_i32_112, %c2_i32_113 : i32
    %346 = arith.index_cast %345 : i32 to index
    %c0_114 = arith.constant 0 : index
    %347 = vector.load %arg24[%346, %c0_114] : memref<16x128xf32, #tpu.memory_space<vmem>>, vector<2x128xf32>
    %cst_115 = arith.constant dense<0.000000e+00> : vector<2x128xf32>
    %348 = tpu.matmul %344, %255, %cst_115 {dimension_numbers = #tpu.dot_dimension_numbers<[1], [0], [0], [1], [0, 0, 1, 1], [], []>} : vector<2x32xf32>, vector<32x128xf32>, vector<2x128xf32> -> vector<2x128xf32>
    %349 = arith.addf %347, %348 : vector<2x128xf32>
    %350 = vector.extract_strided_slice %349 {offsets = [0, 0], sizes = [2, 96], strides = [1, 1]} : vector<2x128xf32> to vector<2x96xf32>
    %351 = arith.negf %350 : vector<2x96xf32>
    %352 = math.exp %351 : vector<2x96xf32>
    %cst_116 = arith.constant 1.000000e+00 : f32
    %353 = vector.broadcast %cst_116 : f32 to vector<2x96xf32>
    %354 = arith.addf %353, %352 : vector<2x96xf32>
    %355 = arith.divf %353, %354 : vector<2x96xf32>
    %356 = vector.extract_strided_slice %355 {offsets = [0, 0], sizes = [2, 32], strides = [1, 1]} : vector<2x96xf32> to vector<2x32xf32>
    %357 = vector.extract_strided_slice %355 {offsets = [0, 32], sizes = [2, 32], strides = [1, 1]} : vector<2x96xf32> to vector<2x32xf32>
    %358 = vector.extract_strided_slice %355 {offsets = [0, 64], sizes = [2, 32], strides = [1, 1]} : vector<2x96xf32> to vector<2x32xf32>
    %359 = vector.extract_strided_slice %349 {offsets = [0, 96], sizes = [2, 32], strides = [1, 1]} : vector<2x128xf32> to vector<2x32xf32>
    %360 = math.tanh %359 : vector<2x32xf32>
    %361 = arith.mulf %357, %342 : vector<2x32xf32>
    %362 = arith.mulf %356, %360 : vector<2x32xf32>
    %363 = arith.addf %361, %362 : vector<2x32xf32>
    %364 = math.tanh %363 : vector<2x32xf32>
    %365 = arith.mulf %358, %364 : vector<2x32xf32>
    %c5_i32_117 = arith.constant 5 : i32
    %c2_i32_118 = arith.constant 2 : i32
    %366 = arith.muli %c5_i32_117, %c2_i32_118 : i32
    %367 = arith.index_cast %366 : i32 to index
    %c0_119 = arith.constant 0 : index
    %368 = vector.load %arg24[%367, %c0_119] : memref<16x128xf32, #tpu.memory_space<vmem>>, vector<2x128xf32>
    %cst_120 = arith.constant dense<0.000000e+00> : vector<2x128xf32>
    %369 = tpu.matmul %365, %255, %cst_120 {dimension_numbers = #tpu.dot_dimension_numbers<[1], [0], [0], [1], [0, 0, 1, 1], [], []>} : vector<2x32xf32>, vector<32x128xf32>, vector<2x128xf32> -> vector<2x128xf32>
    %370 = arith.addf %368, %369 : vector<2x128xf32>
    %371 = vector.extract_strided_slice %370 {offsets = [0, 0], sizes = [2, 96], strides = [1, 1]} : vector<2x128xf32> to vector<2x96xf32>
    %372 = arith.negf %371 : vector<2x96xf32>
    %373 = math.exp %372 : vector<2x96xf32>
    %cst_121 = arith.constant 1.000000e+00 : f32
    %374 = vector.broadcast %cst_121 : f32 to vector<2x96xf32>
    %375 = arith.addf %374, %373 : vector<2x96xf32>
    %376 = arith.divf %374, %375 : vector<2x96xf32>
    %377 = vector.extract_strided_slice %376 {offsets = [0, 0], sizes = [2, 32], strides = [1, 1]} : vector<2x96xf32> to vector<2x32xf32>
    %378 = vector.extract_strided_slice %376 {offsets = [0, 32], sizes = [2, 32], strides = [1, 1]} : vector<2x96xf32> to vector<2x32xf32>
    %379 = vector.extract_strided_slice %376 {offsets = [0, 64], sizes = [2, 32], strides = [1, 1]} : vector<2x96xf32> to vector<2x32xf32>
    %380 = vector.extract_strided_slice %370 {offsets = [0, 96], sizes = [2, 32], strides = [1, 1]} : vector<2x128xf32> to vector<2x32xf32>
    %381 = math.tanh %380 : vector<2x32xf32>
    %382 = arith.mulf %378, %363 : vector<2x32xf32>
    %383 = arith.mulf %377, %381 : vector<2x32xf32>
    %384 = arith.addf %382, %383 : vector<2x32xf32>
    %385 = math.tanh %384 : vector<2x32xf32>
    %386 = arith.mulf %379, %385 : vector<2x32xf32>
    %c6_i32_122 = arith.constant 6 : i32
    %c2_i32_123 = arith.constant 2 : i32
    %387 = arith.muli %c6_i32_122, %c2_i32_123 : i32
    %388 = arith.index_cast %387 : i32 to index
    %c0_124 = arith.constant 0 : index
    %389 = vector.load %arg24[%388, %c0_124] : memref<16x128xf32, #tpu.memory_space<vmem>>, vector<2x128xf32>
    %cst_125 = arith.constant dense<0.000000e+00> : vector<2x128xf32>
    %390 = tpu.matmul %386, %255, %cst_125 {dimension_numbers = #tpu.dot_dimension_numbers<[1], [0], [0], [1], [0, 0, 1, 1], [], []>} : vector<2x32xf32>, vector<32x128xf32>, vector<2x128xf32> -> vector<2x128xf32>
    %391 = arith.addf %389, %390 : vector<2x128xf32>
    %392 = vector.extract_strided_slice %391 {offsets = [0, 0], sizes = [2, 96], strides = [1, 1]} : vector<2x128xf32> to vector<2x96xf32>
    %393 = arith.negf %392 : vector<2x96xf32>
    %394 = math.exp %393 : vector<2x96xf32>
    %cst_126 = arith.constant 1.000000e+00 : f32
    %395 = vector.broadcast %cst_126 : f32 to vector<2x96xf32>
    %396 = arith.addf %395, %394 : vector<2x96xf32>
    %397 = arith.divf %395, %396 : vector<2x96xf32>
    %398 = vector.extract_strided_slice %397 {offsets = [0, 0], sizes = [2, 32], strides = [1, 1]} : vector<2x96xf32> to vector<2x32xf32>
    %399 = vector.extract_strided_slice %397 {offsets = [0, 32], sizes = [2, 32], strides = [1, 1]} : vector<2x96xf32> to vector<2x32xf32>
    %400 = vector.extract_strided_slice %397 {offsets = [0, 64], sizes = [2, 32], strides = [1, 1]} : vector<2x96xf32> to vector<2x32xf32>
    %401 = vector.extract_strided_slice %391 {offsets = [0, 96], sizes = [2, 32], strides = [1, 1]} : vector<2x128xf32> to vector<2x32xf32>
    %402 = math.tanh %401 : vector<2x32xf32>
    %403 = arith.mulf %399, %384 : vector<2x32xf32>
    %404 = arith.mulf %398, %402 : vector<2x32xf32>
    %405 = arith.addf %403, %404 : vector<2x32xf32>
    %406 = math.tanh %405 : vector<2x32xf32>
    %407 = arith.mulf %400, %406 : vector<2x32xf32>
    %c7_i32_127 = arith.constant 7 : i32
    %c2_i32_128 = arith.constant 2 : i32
    %408 = arith.muli %c7_i32_127, %c2_i32_128 : i32
    %409 = arith.index_cast %408 : i32 to index
    %c0_129 = arith.constant 0 : index
    %410 = vector.load %arg24[%409, %c0_129] : memref<16x128xf32, #tpu.memory_space<vmem>>, vector<2x128xf32>
    %cst_130 = arith.constant dense<0.000000e+00> : vector<2x128xf32>
    %411 = tpu.matmul %407, %255, %cst_130 {dimension_numbers = #tpu.dot_dimension_numbers<[1], [0], [0], [1], [0, 0, 1, 1], [], []>} : vector<2x32xf32>, vector<32x128xf32>, vector<2x128xf32> -> vector<2x128xf32>
    %412 = arith.addf %410, %411 : vector<2x128xf32>
    %413 = vector.extract_strided_slice %412 {offsets = [0, 0], sizes = [2, 96], strides = [1, 1]} : vector<2x128xf32> to vector<2x96xf32>
    %414 = arith.negf %413 : vector<2x96xf32>
    %415 = math.exp %414 : vector<2x96xf32>
    %cst_131 = arith.constant 1.000000e+00 : f32
    %416 = vector.broadcast %cst_131 : f32 to vector<2x96xf32>
    %417 = arith.addf %416, %415 : vector<2x96xf32>
    %418 = arith.divf %416, %417 : vector<2x96xf32>
    %419 = vector.extract_strided_slice %418 {offsets = [0, 0], sizes = [2, 32], strides = [1, 1]} : vector<2x96xf32> to vector<2x32xf32>
    %420 = vector.extract_strided_slice %418 {offsets = [0, 32], sizes = [2, 32], strides = [1, 1]} : vector<2x96xf32> to vector<2x32xf32>
    %421 = vector.extract_strided_slice %418 {offsets = [0, 64], sizes = [2, 32], strides = [1, 1]} : vector<2x96xf32> to vector<2x32xf32>
    %422 = vector.extract_strided_slice %412 {offsets = [0, 96], sizes = [2, 32], strides = [1, 1]} : vector<2x128xf32> to vector<2x32xf32>
    %423 = math.tanh %422 : vector<2x32xf32>
    %424 = arith.mulf %420, %405 : vector<2x32xf32>
    %425 = arith.mulf %419, %423 : vector<2x32xf32>
    %426 = arith.addf %424, %425 : vector<2x32xf32>
    %427 = math.tanh %426 : vector<2x32xf32>
    %428 = arith.mulf %421, %427 : vector<2x32xf32>
    %c8_i32_132 = arith.constant 8 : i32
    %c0_133 = arith.constant 0 : index
    %c0_134 = arith.constant 0 : index
    %429 = vector.load %arg4[%c0_133, %c0_134] : memref<16x2xf32, #tpu.memory_space<vmem>>, vector<16x2xf32>
    %430 = vector.extract_strided_slice %429 {offsets = [0, 0], sizes = [16, 1], strides = [1, 1]} : vector<16x2xf32> to vector<16x1xf32>
    %431 = vector.broadcast %430 : vector<16x1xf32> to vector<16x32xf32>
    %432 = vector.broadcast %0 : vector<1x32xf32> to vector<16x32xf32>
    %433 = arith.mulf %431, %432 : vector<16x32xf32>
    %434 = vector.broadcast %1 : vector<1x32xf32> to vector<16x32xf32>
    %435 = arith.addf %433, %434 : vector<16x32xf32>
    %436 = vector.extract_strided_slice %429 {offsets = [0, 1], sizes = [16, 1], strides = [1, 1]} : vector<16x2xf32> to vector<16x1xf32>
    %437 = vector.broadcast %436 : vector<16x1xf32> to vector<16x32xf32>
    %438 = vector.broadcast %0 : vector<1x32xf32> to vector<16x32xf32>
    %439 = arith.mulf %437, %438 : vector<16x32xf32>
    %440 = vector.broadcast %1 : vector<1x32xf32> to vector<16x32xf32>
    %441 = arith.addf %439, %440 : vector<16x32xf32>
    %442 = tpu.concatenate %435, %441 in 1 : vector<16x32xf32>, vector<16x32xf32> -> vector<16x64xf32>
    %443 = tpu.iota {dimensions = array<i32: 1>} : vector<16x64xi32>
    %c32_i32_135 = arith.constant 32 : i32
    %c0_i32_136 = arith.constant 0 : i32
    %444 = arith.cmpi eq, %c32_i32_135, %c0_i32_136 : i32
    %c1_i32_137 = arith.constant 1 : i32
    %445 = arith.select %444, %c1_i32_137, %c32_i32_135 : i32
    %446 = vector.broadcast %445 : i32 to vector<16x64xi32>
    %447 = arith.remsi %443, %446 : vector<16x64xi32>
    %c0_i32_138 = arith.constant 0 : i32
    %448 = vector.broadcast %c0_i32_138 : i32 to vector<16x64xi32>
    %449 = arith.cmpi ne, %447, %448 : vector<16x64xi32>
    %c0_i32_139 = arith.constant 0 : i32
    %450 = vector.broadcast %c0_i32_139 : i32 to vector<16x64xi32>
    %451 = arith.cmpi slt, %447, %450 : vector<16x64xi32>
    %c0_i32_140 = arith.constant 0 : i32
    %452 = arith.cmpi slt, %445, %c0_i32_140 : i32
    %453 = vector.broadcast %452 : i1 to vector<16x64xi1>
    %454 = vector.broadcast %453 : vector<16x64xi1> to vector<16x64xi1>
    %455 = arith.xori %451, %454 : vector<16x64xi1>
    %456 = arith.andi %455, %449 : vector<16x64xi1>
    %457 = vector.broadcast %445 : i32 to vector<16x64xi32>
    %458 = arith.addi %447, %457 : vector<16x64xi32>
    %459 = arith.select %456, %458, %447 : vector<16x64xi1>, vector<16x64xi32>
    %c31_i32_141 = arith.constant 31 : i32
    %460 = vector.broadcast %c31_i32_141 : i32 to vector<16x64xi32>
    %461 = arith.cmpi slt, %459, %460 : vector<16x64xi32>
    %462 = math.sin %442 : vector<16x64xf32>
    %463 = arith.select %461, %462, %442 : vector<16x64xi1>, vector<16x64xf32>
    %c0_142 = arith.constant 0 : index
    %c0_143 = arith.constant 0 : index
    %464 = vector.load %arg8[%c0_142, %c0_143] : memref<64x32xf32, #tpu.memory_space<vmem>>, vector<64x32xf32>
    %cst_144 = arith.constant dense<0.000000e+00> : vector<16x32xf32>
    %465 = tpu.matmul %463, %464, %cst_144 {dimension_numbers = #tpu.dot_dimension_numbers<[1], [0], [0], [1], [0, 0, 1, 1], [], []>} : vector<16x64xf32>, vector<64x32xf32>, vector<16x32xf32> -> vector<16x32xf32>
    %c0_145 = arith.constant 0 : index
    %c0_146 = arith.constant 0 : index
    %466 = vector.load %arg3[%c0_145, %c0_146] : memref<16x1xf32, #tpu.memory_space<vmem>>, vector<16x1xf32>
    %c0_147 = arith.constant 0 : index
    %c0_148 = arith.constant 0 : index
    %467 = vector.load %arg7[%c0_147, %c0_148] : memref<1x32xf32, #tpu.memory_space<vmem>>, vector<1x32xf32>
    %468 = vector.broadcast %466 : vector<16x1xf32> to vector<16x32xf32>
    %469 = vector.broadcast %467 : vector<1x32xf32> to vector<16x32xf32>
    %470 = arith.mulf %468, %469 : vector<16x32xf32>
    %471 = arith.addf %465, %470 : vector<16x32xf32>
    %c0_149 = arith.constant 0 : index
    %c0_150 = arith.constant 0 : index
    %472 = vector.load %arg0[%c0_149, %c0_150] : memref<2x16xf32, #tpu.memory_space<vmem>>, vector<2x16xf32>
    %c0_151 = arith.constant 0 : index
    %c0_152 = arith.constant 0 : index
    %473 = vector.load %arg9[%c0_151, %c0_152] : memref<16x32xf32, #tpu.memory_space<vmem>>, vector<16x32xf32>
    %cst_153 = arith.constant dense<0.000000e+00> : vector<2x32xf32>
    %474 = tpu.matmul %472, %473, %cst_153 {dimension_numbers = #tpu.dot_dimension_numbers<[1], [0], [0], [1], [0, 0, 1, 1], [], []>} : vector<2x16xf32>, vector<16x32xf32>, vector<2x32xf32> -> vector<2x32xf32>
    %c0_154 = arith.constant 0 : index
    %c0_155 = arith.constant 0 : index
    %475 = vector.load %arg10[%c0_154, %c0_155] : memref<1x32xf32, #tpu.memory_space<vmem>>, vector<1x32xf32>
    %476 = vector.broadcast %475 : vector<1x32xf32> to vector<2x32xf32>
    %477 = arith.addf %474, %476 : vector<2x32xf32>
    %478 = tpu.concatenate %477, %477, %477, %477, %477, %477, %477, %477 in 0 : vector<2x32xf32>, vector<2x32xf32>, vector<2x32xf32>, vector<2x32xf32>, vector<2x32xf32>, vector<2x32xf32>, vector<2x32xf32>, vector<2x32xf32> -> vector<16x32xf32>
    %479 = arith.addf %471, %478 : vector<16x32xf32>
    %c0_156 = arith.constant 0 : index
    %c0_157 = arith.constant 0 : index
    %480 = vector.load %arg11[%c0_156, %c0_157] : memref<32x128xf32, #tpu.memory_space<vmem>>, vector<32x128xf32>
    %c0_158 = arith.constant 0 : index
    %c0_159 = arith.constant 0 : index
    %481 = vector.load %arg12[%c0_158, %c0_159] : memref<32x128xf32, #tpu.memory_space<vmem>>, vector<32x128xf32>
    %c0_160 = arith.constant 0 : index
    %c0_161 = arith.constant 0 : index
    %482 = vector.load %arg13[%c0_160, %c0_161] : memref<1x128xf32, #tpu.memory_space<vmem>>, vector<1x128xf32>
    %cst_162 = arith.constant dense<0.000000e+00> : vector<16x128xf32>
    %483 = tpu.matmul %479, %480, %cst_162 {dimension_numbers = #tpu.dot_dimension_numbers<[1], [0], [0], [1], [0, 0, 1, 1], [], []>} : vector<16x32xf32>, vector<32x128xf32>, vector<16x128xf32> -> vector<16x128xf32>
    %484 = vector.broadcast %482 : vector<1x128xf32> to vector<16x128xf32>
    %485 = arith.addf %483, %484 : vector<16x128xf32>
    %c0_163 = arith.constant 0 : index
    %c0_164 = arith.constant 0 : index
    %486 = vector.load %arg24[%c0_163, %c0_164] : memref<16x128xf32, #tpu.memory_space<vmem>>, vector<16x128xf32>
    tpu.vector_store %arg24[%c0_163, %c0_164], %485 {strides = array<i32>} : memref<16x128xf32, #tpu.memory_space<vmem>>, vector<16x128xf32>,
    %c0_i32_165 = arith.constant 0 : i32
    %c2_i32_166 = arith.constant 2 : i32
    %487 = arith.muli %c0_i32_165, %c2_i32_166 : i32
    %488 = arith.index_cast %487 : i32 to index
    %c0_167 = arith.constant 0 : index
    %489 = vector.load %arg24[%488, %c0_167] : memref<16x128xf32, #tpu.memory_space<vmem>>, vector<2x128xf32>
    %cst_168 = arith.constant dense<0.000000e+00> : vector<2x128xf32>
    %490 = tpu.matmul %249, %481, %cst_168 {dimension_numbers = #tpu.dot_dimension_numbers<[1], [0], [0], [1], [0, 0, 1, 1], [], []>} : vector<2x32xf32>, vector<32x128xf32>, vector<2x128xf32> -> vector<2x128xf32>
    %491 = arith.addf %489, %490 : vector<2x128xf32>
    %492 = vector.extract_strided_slice %491 {offsets = [0, 0], sizes = [2, 96], strides = [1, 1]} : vector<2x128xf32> to vector<2x96xf32>
    %493 = arith.negf %492 : vector<2x96xf32>
    %494 = math.exp %493 : vector<2x96xf32>
    %cst_169 = arith.constant 1.000000e+00 : f32
    %495 = vector.broadcast %cst_169 : f32 to vector<2x96xf32>
    %496 = arith.addf %495, %494 : vector<2x96xf32>
    %497 = arith.divf %495, %496 : vector<2x96xf32>
    %498 = vector.extract_strided_slice %497 {offsets = [0, 0], sizes = [2, 32], strides = [1, 1]} : vector<2x96xf32> to vector<2x32xf32>
    %499 = vector.extract_strided_slice %497 {offsets = [0, 32], sizes = [2, 32], strides = [1, 1]} : vector<2x96xf32> to vector<2x32xf32>
    %500 = vector.extract_strided_slice %497 {offsets = [0, 64], sizes = [2, 32], strides = [1, 1]} : vector<2x96xf32> to vector<2x32xf32>
    %501 = vector.extract_strided_slice %491 {offsets = [0, 96], sizes = [2, 32], strides = [1, 1]} : vector<2x128xf32> to vector<2x32xf32>
    %502 = math.tanh %501 : vector<2x32xf32>
    %503 = arith.mulf %499, %247 : vector<2x32xf32>
    %504 = arith.mulf %498, %502 : vector<2x32xf32>
    %505 = arith.addf %503, %504 : vector<2x32xf32>
    %506 = math.tanh %505 : vector<2x32xf32>
    %507 = arith.mulf %500, %506 : vector<2x32xf32>
    %c2_i32_170 = arith.constant 2 : i32
    %508 = arith.muli %c0_i32_165, %c2_i32_170 : i32
    %509 = arith.index_cast %508 : i32 to index
    %c0_171 = arith.constant 0 : index
    %510 = vector.load %arg25[%509, %c0_171] : memref<16x32xf32, #tpu.memory_space<vmem>>, vector<2x32xf32>
    tpu.vector_store %arg25[%509, %c0_171], %507 {strides = array<i32>} : memref<16x32xf32, #tpu.memory_space<vmem>>, vector<2x32xf32>,
    %c1_i32_172 = arith.constant 1 : i32
    %c2_i32_173 = arith.constant 2 : i32
    %511 = arith.muli %c1_i32_172, %c2_i32_173 : i32
    %512 = arith.index_cast %511 : i32 to index
    %c0_174 = arith.constant 0 : index
    %513 = vector.load %arg24[%512, %c0_174] : memref<16x128xf32, #tpu.memory_space<vmem>>, vector<2x128xf32>
    %cst_175 = arith.constant dense<0.000000e+00> : vector<2x128xf32>
    %514 = tpu.matmul %507, %481, %cst_175 {dimension_numbers = #tpu.dot_dimension_numbers<[1], [0], [0], [1], [0, 0, 1, 1], [], []>} : vector<2x32xf32>, vector<32x128xf32>, vector<2x128xf32> -> vector<2x128xf32>
    %515 = arith.addf %513, %514 : vector<2x128xf32>
    %516 = vector.extract_strided_slice %515 {offsets = [0, 0], sizes = [2, 96], strides = [1, 1]} : vector<2x128xf32> to vector<2x96xf32>
    %517 = arith.negf %516 : vector<2x96xf32>
    %518 = math.exp %517 : vector<2x96xf32>
    %cst_176 = arith.constant 1.000000e+00 : f32
    %519 = vector.broadcast %cst_176 : f32 to vector<2x96xf32>
    %520 = arith.addf %519, %518 : vector<2x96xf32>
    %521 = arith.divf %519, %520 : vector<2x96xf32>
    %522 = vector.extract_strided_slice %521 {offsets = [0, 0], sizes = [2, 32], strides = [1, 1]} : vector<2x96xf32> to vector<2x32xf32>
    %523 = vector.extract_strided_slice %521 {offsets = [0, 32], sizes = [2, 32], strides = [1, 1]} : vector<2x96xf32> to vector<2x32xf32>
    %524 = vector.extract_strided_slice %521 {offsets = [0, 64], sizes = [2, 32], strides = [1, 1]} : vector<2x96xf32> to vector<2x32xf32>
    %525 = vector.extract_strided_slice %515 {offsets = [0, 96], sizes = [2, 32], strides = [1, 1]} : vector<2x128xf32> to vector<2x32xf32>
    %526 = math.tanh %525 : vector<2x32xf32>
    %527 = arith.mulf %523, %505 : vector<2x32xf32>
    %528 = arith.mulf %522, %526 : vector<2x32xf32>
    %529 = arith.addf %527, %528 : vector<2x32xf32>
    %530 = math.tanh %529 : vector<2x32xf32>
    %531 = arith.mulf %524, %530 : vector<2x32xf32>
    %c2_i32_177 = arith.constant 2 : i32
    %532 = arith.muli %c1_i32_172, %c2_i32_177 : i32
    %533 = arith.index_cast %532 : i32 to index
    %c0_178 = arith.constant 0 : index
    %534 = vector.load %arg25[%533, %c0_178] : memref<16x32xf32, #tpu.memory_space<vmem>>, vector<2x32xf32>
    tpu.vector_store %arg25[%533, %c0_178], %531 {strides = array<i32>} : memref<16x32xf32, #tpu.memory_space<vmem>>, vector<2x32xf32>,
    %c2_i32_179 = arith.constant 2 : i32
    %c2_i32_180 = arith.constant 2 : i32
    %535 = arith.muli %c2_i32_179, %c2_i32_180 : i32
    %536 = arith.index_cast %535 : i32 to index
    %c0_181 = arith.constant 0 : index
    %537 = vector.load %arg24[%536, %c0_181] : memref<16x128xf32, #tpu.memory_space<vmem>>, vector<2x128xf32>
    %cst_182 = arith.constant dense<0.000000e+00> : vector<2x128xf32>
    %538 = tpu.matmul %531, %481, %cst_182 {dimension_numbers = #tpu.dot_dimension_numbers<[1], [0], [0], [1], [0, 0, 1, 1], [], []>} : vector<2x32xf32>, vector<32x128xf32>, vector<2x128xf32> -> vector<2x128xf32>
    %539 = arith.addf %537, %538 : vector<2x128xf32>
    %540 = vector.extract_strided_slice %539 {offsets = [0, 0], sizes = [2, 96], strides = [1, 1]} : vector<2x128xf32> to vector<2x96xf32>
    %541 = arith.negf %540 : vector<2x96xf32>
    %542 = math.exp %541 : vector<2x96xf32>
    %cst_183 = arith.constant 1.000000e+00 : f32
    %543 = vector.broadcast %cst_183 : f32 to vector<2x96xf32>
    %544 = arith.addf %543, %542 : vector<2x96xf32>
    %545 = arith.divf %543, %544 : vector<2x96xf32>
    %546 = vector.extract_strided_slice %545 {offsets = [0, 0], sizes = [2, 32], strides = [1, 1]} : vector<2x96xf32> to vector<2x32xf32>
    %547 = vector.extract_strided_slice %545 {offsets = [0, 32], sizes = [2, 32], strides = [1, 1]} : vector<2x96xf32> to vector<2x32xf32>
    %548 = vector.extract_strided_slice %545 {offsets = [0, 64], sizes = [2, 32], strides = [1, 1]} : vector<2x96xf32> to vector<2x32xf32>
    %549 = vector.extract_strided_slice %539 {offsets = [0, 96], sizes = [2, 32], strides = [1, 1]} : vector<2x128xf32> to vector<2x32xf32>
    %550 = math.tanh %549 : vector<2x32xf32>
    %551 = arith.mulf %547, %529 : vector<2x32xf32>
    %552 = arith.mulf %546, %550 : vector<2x32xf32>
    %553 = arith.addf %551, %552 : vector<2x32xf32>
    %554 = math.tanh %553 : vector<2x32xf32>
    %555 = arith.mulf %548, %554 : vector<2x32xf32>
    %c2_i32_184 = arith.constant 2 : i32
    %556 = arith.muli %c2_i32_179, %c2_i32_184 : i32
    %557 = arith.index_cast %556 : i32 to index
    %c0_185 = arith.constant 0 : index
    %558 = vector.load %arg25[%557, %c0_185] : memref<16x32xf32, #tpu.memory_space<vmem>>, vector<2x32xf32>
    tpu.vector_store %arg25[%557, %c0_185], %555 {strides = array<i32>} : memref<16x32xf32, #tpu.memory_space<vmem>>, vector<2x32xf32>,
    %c3_i32_186 = arith.constant 3 : i32
    %c2_i32_187 = arith.constant 2 : i32
    %559 = arith.muli %c3_i32_186, %c2_i32_187 : i32
    %560 = arith.index_cast %559 : i32 to index
    %c0_188 = arith.constant 0 : index
    %561 = vector.load %arg24[%560, %c0_188] : memref<16x128xf32, #tpu.memory_space<vmem>>, vector<2x128xf32>
    %cst_189 = arith.constant dense<0.000000e+00> : vector<2x128xf32>
    %562 = tpu.matmul %555, %481, %cst_189 {dimension_numbers = #tpu.dot_dimension_numbers<[1], [0], [0], [1], [0, 0, 1, 1], [], []>} : vector<2x32xf32>, vector<32x128xf32>, vector<2x128xf32> -> vector<2x128xf32>
    %563 = arith.addf %561, %562 : vector<2x128xf32>
    %564 = vector.extract_strided_slice %563 {offsets = [0, 0], sizes = [2, 96], strides = [1, 1]} : vector<2x128xf32> to vector<2x96xf32>
    %565 = arith.negf %564 : vector<2x96xf32>
    %566 = math.exp %565 : vector<2x96xf32>
    %cst_190 = arith.constant 1.000000e+00 : f32
    %567 = vector.broadcast %cst_190 : f32 to vector<2x96xf32>
    %568 = arith.addf %567, %566 : vector<2x96xf32>
    %569 = arith.divf %567, %568 : vector<2x96xf32>
    %570 = vector.extract_strided_slice %569 {offsets = [0, 0], sizes = [2, 32], strides = [1, 1]} : vector<2x96xf32> to vector<2x32xf32>
    %571 = vector.extract_strided_slice %569 {offsets = [0, 32], sizes = [2, 32], strides = [1, 1]} : vector<2x96xf32> to vector<2x32xf32>
    %572 = vector.extract_strided_slice %569 {offsets = [0, 64], sizes = [2, 32], strides = [1, 1]} : vector<2x96xf32> to vector<2x32xf32>
    %573 = vector.extract_strided_slice %563 {offsets = [0, 96], sizes = [2, 32], strides = [1, 1]} : vector<2x128xf32> to vector<2x32xf32>
    %574 = math.tanh %573 : vector<2x32xf32>
    %575 = arith.mulf %571, %553 : vector<2x32xf32>
    %576 = arith.mulf %570, %574 : vector<2x32xf32>
    %577 = arith.addf %575, %576 : vector<2x32xf32>
    %578 = math.tanh %577 : vector<2x32xf32>
    %579 = arith.mulf %572, %578 : vector<2x32xf32>
    %c2_i32_191 = arith.constant 2 : i32
    %580 = arith.muli %c3_i32_186, %c2_i32_191 : i32
    %581 = arith.index_cast %580 : i32 to index
    %c0_192 = arith.constant 0 : index
    %582 = vector.load %arg25[%581, %c0_192] : memref<16x32xf32, #tpu.memory_space<vmem>>, vector<2x32xf32>
    tpu.vector_store %arg25[%581, %c0_192], %579 {strides = array<i32>} : memref<16x32xf32, #tpu.memory_space<vmem>>, vector<2x32xf32>,
    %c4_i32_193 = arith.constant 4 : i32
    %c2_i32_194 = arith.constant 2 : i32
    %583 = arith.muli %c4_i32_193, %c2_i32_194 : i32
    %584 = arith.index_cast %583 : i32 to index
    %c0_195 = arith.constant 0 : index
    %585 = vector.load %arg24[%584, %c0_195] : memref<16x128xf32, #tpu.memory_space<vmem>>, vector<2x128xf32>
    %cst_196 = arith.constant dense<0.000000e+00> : vector<2x128xf32>
    %586 = tpu.matmul %579, %481, %cst_196 {dimension_numbers = #tpu.dot_dimension_numbers<[1], [0], [0], [1], [0, 0, 1, 1], [], []>} : vector<2x32xf32>, vector<32x128xf32>, vector<2x128xf32> -> vector<2x128xf32>
    %587 = arith.addf %585, %586 : vector<2x128xf32>
    %588 = vector.extract_strided_slice %587 {offsets = [0, 0], sizes = [2, 96], strides = [1, 1]} : vector<2x128xf32> to vector<2x96xf32>
    %589 = arith.negf %588 : vector<2x96xf32>
    %590 = math.exp %589 : vector<2x96xf32>
    %cst_197 = arith.constant 1.000000e+00 : f32
    %591 = vector.broadcast %cst_197 : f32 to vector<2x96xf32>
    %592 = arith.addf %591, %590 : vector<2x96xf32>
    %593 = arith.divf %591, %592 : vector<2x96xf32>
    %594 = vector.extract_strided_slice %593 {offsets = [0, 0], sizes = [2, 32], strides = [1, 1]} : vector<2x96xf32> to vector<2x32xf32>
    %595 = vector.extract_strided_slice %593 {offsets = [0, 32], sizes = [2, 32], strides = [1, 1]} : vector<2x96xf32> to vector<2x32xf32>
    %596 = vector.extract_strided_slice %593 {offsets = [0, 64], sizes = [2, 32], strides = [1, 1]} : vector<2x96xf32> to vector<2x32xf32>
    %597 = vector.extract_strided_slice %587 {offsets = [0, 96], sizes = [2, 32], strides = [1, 1]} : vector<2x128xf32> to vector<2x32xf32>
    %598 = math.tanh %597 : vector<2x32xf32>
    %599 = arith.mulf %595, %577 : vector<2x32xf32>
    %600 = arith.mulf %594, %598 : vector<2x32xf32>
    %601 = arith.addf %599, %600 : vector<2x32xf32>
    %602 = math.tanh %601 : vector<2x32xf32>
    %603 = arith.mulf %596, %602 : vector<2x32xf32>
    %c2_i32_198 = arith.constant 2 : i32
    %604 = arith.muli %c4_i32_193, %c2_i32_198 : i32
    %605 = arith.index_cast %604 : i32 to index
    %c0_199 = arith.constant 0 : index
    %606 = vector.load %arg25[%605, %c0_199] : memref<16x32xf32, #tpu.memory_space<vmem>>, vector<2x32xf32>
    tpu.vector_store %arg25[%605, %c0_199], %603 {strides = array<i32>} : memref<16x32xf32, #tpu.memory_space<vmem>>, vector<2x32xf32>,
    %c5_i32_200 = arith.constant 5 : i32
    %c2_i32_201 = arith.constant 2 : i32
    %607 = arith.muli %c5_i32_200, %c2_i32_201 : i32
    %608 = arith.index_cast %607 : i32 to index
    %c0_202 = arith.constant 0 : index
    %609 = vector.load %arg24[%608, %c0_202] : memref<16x128xf32, #tpu.memory_space<vmem>>, vector<2x128xf32>
    %cst_203 = arith.constant dense<0.000000e+00> : vector<2x128xf32>
    %610 = tpu.matmul %603, %481, %cst_203 {dimension_numbers = #tpu.dot_dimension_numbers<[1], [0], [0], [1], [0, 0, 1, 1], [], []>} : vector<2x32xf32>, vector<32x128xf32>, vector<2x128xf32> -> vector<2x128xf32>
    %611 = arith.addf %609, %610 : vector<2x128xf32>
    %612 = vector.extract_strided_slice %611 {offsets = [0, 0], sizes = [2, 96], strides = [1, 1]} : vector<2x128xf32> to vector<2x96xf32>
    %613 = arith.negf %612 : vector<2x96xf32>
    %614 = math.exp %613 : vector<2x96xf32>
    %cst_204 = arith.constant 1.000000e+00 : f32
    %615 = vector.broadcast %cst_204 : f32 to vector<2x96xf32>
    %616 = arith.addf %615, %614 : vector<2x96xf32>
    %617 = arith.divf %615, %616 : vector<2x96xf32>
    %618 = vector.extract_strided_slice %617 {offsets = [0, 0], sizes = [2, 32], strides = [1, 1]} : vector<2x96xf32> to vector<2x32xf32>
    %619 = vector.extract_strided_slice %617 {offsets = [0, 32], sizes = [2, 32], strides = [1, 1]} : vector<2x96xf32> to vector<2x32xf32>
    %620 = vector.extract_strided_slice %617 {offsets = [0, 64], sizes = [2, 32], strides = [1, 1]} : vector<2x96xf32> to vector<2x32xf32>
    %621 = vector.extract_strided_slice %611 {offsets = [0, 96], sizes = [2, 32], strides = [1, 1]} : vector<2x128xf32> to vector<2x32xf32>
    %622 = math.tanh %621 : vector<2x32xf32>
    %623 = arith.mulf %619, %601 : vector<2x32xf32>
    %624 = arith.mulf %618, %622 : vector<2x32xf32>
    %625 = arith.addf %623, %624 : vector<2x32xf32>
    %626 = math.tanh %625 : vector<2x32xf32>
    %627 = arith.mulf %620, %626 : vector<2x32xf32>
    %c2_i32_205 = arith.constant 2 : i32
    %628 = arith.muli %c5_i32_200, %c2_i32_205 : i32
    %629 = arith.index_cast %628 : i32 to index
    %c0_206 = arith.constant 0 : index
    %630 = vector.load %arg25[%629, %c0_206] : memref<16x32xf32, #tpu.memory_space<vmem>>, vector<2x32xf32>
    tpu.vector_store %arg25[%629, %c0_206], %627 {strides = array<i32>} : memref<16x32xf32, #tpu.memory_space<vmem>>, vector<2x32xf32>,
    %c6_i32_207 = arith.constant 6 : i32
    %c2_i32_208 = arith.constant 2 : i32
    %631 = arith.muli %c6_i32_207, %c2_i32_208 : i32
    %632 = arith.index_cast %631 : i32 to index
    %c0_209 = arith.constant 0 : index
    %633 = vector.load %arg24[%632, %c0_209] : memref<16x128xf32, #tpu.memory_space<vmem>>, vector<2x128xf32>
    %cst_210 = arith.constant dense<0.000000e+00> : vector<2x128xf32>
    %634 = tpu.matmul %627, %481, %cst_210 {dimension_numbers = #tpu.dot_dimension_numbers<[1], [0], [0], [1], [0, 0, 1, 1], [], []>} : vector<2x32xf32>, vector<32x128xf32>, vector<2x128xf32> -> vector<2x128xf32>
    %635 = arith.addf %633, %634 : vector<2x128xf32>
    %636 = vector.extract_strided_slice %635 {offsets = [0, 0], sizes = [2, 96], strides = [1, 1]} : vector<2x128xf32> to vector<2x96xf32>
    %637 = arith.negf %636 : vector<2x96xf32>
    %638 = math.exp %637 : vector<2x96xf32>
    %cst_211 = arith.constant 1.000000e+00 : f32
    %639 = vector.broadcast %cst_211 : f32 to vector<2x96xf32>
    %640 = arith.addf %639, %638 : vector<2x96xf32>
    %641 = arith.divf %639, %640 : vector<2x96xf32>
    %642 = vector.extract_strided_slice %641 {offsets = [0, 0], sizes = [2, 32], strides = [1, 1]} : vector<2x96xf32> to vector<2x32xf32>
    %643 = vector.extract_strided_slice %641 {offsets = [0, 32], sizes = [2, 32], strides = [1, 1]} : vector<2x96xf32> to vector<2x32xf32>
    %644 = vector.extract_strided_slice %641 {offsets = [0, 64], sizes = [2, 32], strides = [1, 1]} : vector<2x96xf32> to vector<2x32xf32>
    %645 = vector.extract_strided_slice %635 {offsets = [0, 96], sizes = [2, 32], strides = [1, 1]} : vector<2x128xf32> to vector<2x32xf32>
    %646 = math.tanh %645 : vector<2x32xf32>
    %647 = arith.mulf %643, %625 : vector<2x32xf32>
    %648 = arith.mulf %642, %646 : vector<2x32xf32>
    %649 = arith.addf %647, %648 : vector<2x32xf32>
    %650 = math.tanh %649 : vector<2x32xf32>
    %651 = arith.mulf %644, %650 : vector<2x32xf32>
    %c2_i32_212 = arith.constant 2 : i32
    %652 = arith.muli %c6_i32_207, %c2_i32_212 : i32
    %653 = arith.index_cast %652 : i32 to index
    %c0_213 = arith.constant 0 : index
    %654 = vector.load %arg25[%653, %c0_213] : memref<16x32xf32, #tpu.memory_space<vmem>>, vector<2x32xf32>
    tpu.vector_store %arg25[%653, %c0_213], %651 {strides = array<i32>} : memref<16x32xf32, #tpu.memory_space<vmem>>, vector<2x32xf32>,
    %c7_i32_214 = arith.constant 7 : i32
    %c2_i32_215 = arith.constant 2 : i32
    %655 = arith.muli %c7_i32_214, %c2_i32_215 : i32
    %656 = arith.index_cast %655 : i32 to index
    %c0_216 = arith.constant 0 : index
    %657 = vector.load %arg24[%656, %c0_216] : memref<16x128xf32, #tpu.memory_space<vmem>>, vector<2x128xf32>
    %cst_217 = arith.constant dense<0.000000e+00> : vector<2x128xf32>
    %658 = tpu.matmul %651, %481, %cst_217 {dimension_numbers = #tpu.dot_dimension_numbers<[1], [0], [0], [1], [0, 0, 1, 1], [], []>} : vector<2x32xf32>, vector<32x128xf32>, vector<2x128xf32> -> vector<2x128xf32>
    %659 = arith.addf %657, %658 : vector<2x128xf32>
    %660 = vector.extract_strided_slice %659 {offsets = [0, 0], sizes = [2, 96], strides = [1, 1]} : vector<2x128xf32> to vector<2x96xf32>
    %661 = arith.negf %660 : vector<2x96xf32>
    %662 = math.exp %661 : vector<2x96xf32>
    %cst_218 = arith.constant 1.000000e+00 : f32
    %663 = vector.broadcast %cst_218 : f32 to vector<2x96xf32>
    %664 = arith.addf %663, %662 : vector<2x96xf32>
    %665 = arith.divf %663, %664 : vector<2x96xf32>
    %666 = vector.extract_strided_slice %665 {offsets = [0, 0], sizes = [2, 32], strides = [1, 1]} : vector<2x96xf32> to vector<2x32xf32>
    %667 = vector.extract_strided_slice %665 {offsets = [0, 32], sizes = [2, 32], strides = [1, 1]} : vector<2x96xf32> to vector<2x32xf32>
    %668 = vector.extract_strided_slice %665 {offsets = [0, 64], sizes = [2, 32], strides = [1, 1]} : vector<2x96xf32> to vector<2x32xf32>
    %669 = vector.extract_strided_slice %659 {offsets = [0, 96], sizes = [2, 32], strides = [1, 1]} : vector<2x128xf32> to vector<2x32xf32>
    %670 = math.tanh %669 : vector<2x32xf32>
    %671 = arith.mulf %667, %649 : vector<2x32xf32>
    %672 = arith.mulf %666, %670 : vector<2x32xf32>
    %673 = arith.addf %671, %672 : vector<2x32xf32>
    %674 = math.tanh %673 : vector<2x32xf32>
    %675 = arith.mulf %668, %674 : vector<2x32xf32>
    %c2_i32_219 = arith.constant 2 : i32
    %676 = arith.muli %c7_i32_214, %c2_i32_219 : i32
    %677 = arith.index_cast %676 : i32 to index
    %c0_220 = arith.constant 0 : index
    %678 = vector.load %arg25[%677, %c0_220] : memref<16x32xf32, #tpu.memory_space<vmem>>, vector<2x32xf32>
    tpu.vector_store %arg25[%677, %c0_220], %675 {strides = array<i32>} : memref<16x32xf32, #tpu.memory_space<vmem>>, vector<2x32xf32>,
    %c8_i32_221 = arith.constant 8 : i32
    %c0_222 = arith.constant 0 : index
    %c0_223 = arith.constant 0 : index
    %679 = vector.load %arg25[%c0_222, %c0_223] : memref<16x32xf32, #tpu.memory_space<vmem>>, vector<16x32xf32>
    %c0_224 = arith.constant 0 : index
    %c0_225 = arith.constant 0 : index
    %680 = vector.load %arg14[%c0_224, %c0_225] : memref<32x128xf32, #tpu.memory_space<vmem>>, vector<32x128xf32>
    %c0_226 = arith.constant 0 : index
    %c0_227 = arith.constant 0 : index
    %681 = vector.load %arg15[%c0_226, %c0_227] : memref<32x128xf32, #tpu.memory_space<vmem>>, vector<32x128xf32>
    %c0_228 = arith.constant 0 : index
    %c0_229 = arith.constant 0 : index
    %682 = vector.load %arg16[%c0_228, %c0_229] : memref<1x128xf32, #tpu.memory_space<vmem>>, vector<1x128xf32>
    %cst_230 = arith.constant dense<0.000000e+00> : vector<16x128xf32>
    %683 = tpu.matmul %679, %680, %cst_230 {dimension_numbers = #tpu.dot_dimension_numbers<[1], [0], [0], [1], [0, 0, 1, 1], [], []>} : vector<16x32xf32>, vector<32x128xf32>, vector<16x128xf32> -> vector<16x128xf32>
    %684 = vector.broadcast %682 : vector<1x128xf32> to vector<16x128xf32>
    %685 = arith.addf %683, %684 : vector<16x128xf32>
    %c0_231 = arith.constant 0 : index
    %c0_232 = arith.constant 0 : index
    %686 = vector.load %arg24[%c0_231, %c0_232] : memref<16x128xf32, #tpu.memory_space<vmem>>, vector<16x128xf32>
    tpu.vector_store %arg24[%c0_231, %c0_232], %685 {strides = array<i32>} : memref<16x128xf32, #tpu.memory_space<vmem>>, vector<16x128xf32>,
    %c0_i32_233 = arith.constant 0 : i32
    %c2_i32_234 = arith.constant 2 : i32
    %687 = arith.muli %c0_i32_233, %c2_i32_234 : i32
    %688 = arith.index_cast %687 : i32 to index
    %c0_235 = arith.constant 0 : index
    %689 = vector.load %arg24[%688, %c0_235] : memref<16x128xf32, #tpu.memory_space<vmem>>, vector<2x128xf32>
    %cst_236 = arith.constant dense<0.000000e+00> : vector<2x128xf32>
    %690 = tpu.matmul %428, %681, %cst_236 {dimension_numbers = #tpu.dot_dimension_numbers<[1], [0], [0], [1], [0, 0, 1, 1], [], []>} : vector<2x32xf32>, vector<32x128xf32>, vector<2x128xf32> -> vector<2x128xf32>
    %691 = arith.addf %689, %690 : vector<2x128xf32>
    %692 = vector.extract_strided_slice %691 {offsets = [0, 0], sizes = [2, 96], strides = [1, 1]} : vector<2x128xf32> to vector<2x96xf32>
    %693 = arith.negf %692 : vector<2x96xf32>
    %694 = math.exp %693 : vector<2x96xf32>
    %cst_237 = arith.constant 1.000000e+00 : f32
    %695 = vector.broadcast %cst_237 : f32 to vector<2x96xf32>
    %696 = arith.addf %695, %694 : vector<2x96xf32>
    %697 = arith.divf %695, %696 : vector<2x96xf32>
    %698 = vector.extract_strided_slice %697 {offsets = [0, 0], sizes = [2, 32], strides = [1, 1]} : vector<2x96xf32> to vector<2x32xf32>
    %699 = vector.extract_strided_slice %697 {offsets = [0, 32], sizes = [2, 32], strides = [1, 1]} : vector<2x96xf32> to vector<2x32xf32>
    %700 = vector.extract_strided_slice %697 {offsets = [0, 64], sizes = [2, 32], strides = [1, 1]} : vector<2x96xf32> to vector<2x32xf32>
    %701 = vector.extract_strided_slice %691 {offsets = [0, 96], sizes = [2, 32], strides = [1, 1]} : vector<2x128xf32> to vector<2x32xf32>
    %702 = math.tanh %701 : vector<2x32xf32>
    %703 = arith.mulf %699, %426 : vector<2x32xf32>
    %704 = arith.mulf %698, %702 : vector<2x32xf32>
    %705 = arith.addf %703, %704 : vector<2x32xf32>
    %706 = math.tanh %705 : vector<2x32xf32>
    %707 = arith.mulf %700, %706 : vector<2x32xf32>
    %c2_i32_238 = arith.constant 2 : i32
    %708 = arith.muli %c0_i32_233, %c2_i32_238 : i32
    %709 = arith.index_cast %708 : i32 to index
    %c0_239 = arith.constant 0 : index
    %710 = vector.load %arg25[%709, %c0_239] : memref<16x32xf32, #tpu.memory_space<vmem>>, vector<2x32xf32>
    tpu.vector_store %arg25[%709, %c0_239], %707 {strides = array<i32>} : memref<16x32xf32, #tpu.memory_space<vmem>>, vector<2x32xf32>,
    %c1_i32_240 = arith.constant 1 : i32
    %c2_i32_241 = arith.constant 2 : i32
    %711 = arith.muli %c1_i32_240, %c2_i32_241 : i32
    %712 = arith.index_cast %711 : i32 to index
    %c0_242 = arith.constant 0 : index
    %713 = vector.load %arg24[%712, %c0_242] : memref<16x128xf32, #tpu.memory_space<vmem>>, vector<2x128xf32>
    %cst_243 = arith.constant dense<0.000000e+00> : vector<2x128xf32>
    %714 = tpu.matmul %707, %681, %cst_243 {dimension_numbers = #tpu.dot_dimension_numbers<[1], [0], [0], [1], [0, 0, 1, 1], [], []>} : vector<2x32xf32>, vector<32x128xf32>, vector<2x128xf32> -> vector<2x128xf32>
    %715 = arith.addf %713, %714 : vector<2x128xf32>
    %716 = vector.extract_strided_slice %715 {offsets = [0, 0], sizes = [2, 96], strides = [1, 1]} : vector<2x128xf32> to vector<2x96xf32>
    %717 = arith.negf %716 : vector<2x96xf32>
    %718 = math.exp %717 : vector<2x96xf32>
    %cst_244 = arith.constant 1.000000e+00 : f32
    %719 = vector.broadcast %cst_244 : f32 to vector<2x96xf32>
    %720 = arith.addf %719, %718 : vector<2x96xf32>
    %721 = arith.divf %719, %720 : vector<2x96xf32>
    %722 = vector.extract_strided_slice %721 {offsets = [0, 0], sizes = [2, 32], strides = [1, 1]} : vector<2x96xf32> to vector<2x32xf32>
    %723 = vector.extract_strided_slice %721 {offsets = [0, 32], sizes = [2, 32], strides = [1, 1]} : vector<2x96xf32> to vector<2x32xf32>
    %724 = vector.extract_strided_slice %721 {offsets = [0, 64], sizes = [2, 32], strides = [1, 1]} : vector<2x96xf32> to vector<2x32xf32>
    %725 = vector.extract_strided_slice %715 {offsets = [0, 96], sizes = [2, 32], strides = [1, 1]} : vector<2x128xf32> to vector<2x32xf32>
    %726 = math.tanh %725 : vector<2x32xf32>
    %727 = arith.mulf %723, %705 : vector<2x32xf32>
    %728 = arith.mulf %722, %726 : vector<2x32xf32>
    %729 = arith.addf %727, %728 : vector<2x32xf32>
    %730 = math.tanh %729 : vector<2x32xf32>
    %731 = arith.mulf %724, %730 : vector<2x32xf32>
    %c2_i32_245 = arith.constant 2 : i32
    %732 = arith.muli %c1_i32_240, %c2_i32_245 : i32
    %733 = arith.index_cast %732 : i32 to index
    %c0_246 = arith.constant 0 : index
    %734 = vector.load %arg25[%733, %c0_246] : memref<16x32xf32, #tpu.memory_space<vmem>>, vector<2x32xf32>
    tpu.vector_store %arg25[%733, %c0_246], %731 {strides = array<i32>} : memref<16x32xf32, #tpu.memory_space<vmem>>, vector<2x32xf32>,
    %c2_i32_247 = arith.constant 2 : i32
    %c2_i32_248 = arith.constant 2 : i32
    %735 = arith.muli %c2_i32_247, %c2_i32_248 : i32
    %736 = arith.index_cast %735 : i32 to index
    %c0_249 = arith.constant 0 : index
    %737 = vector.load %arg24[%736, %c0_249] : memref<16x128xf32, #tpu.memory_space<vmem>>, vector<2x128xf32>
    %cst_250 = arith.constant dense<0.000000e+00> : vector<2x128xf32>
    %738 = tpu.matmul %731, %681, %cst_250 {dimension_numbers = #tpu.dot_dimension_numbers<[1], [0], [0], [1], [0, 0, 1, 1], [], []>} : vector<2x32xf32>, vector<32x128xf32>, vector<2x128xf32> -> vector<2x128xf32>
    %739 = arith.addf %737, %738 : vector<2x128xf32>
    %740 = vector.extract_strided_slice %739 {offsets = [0, 0], sizes = [2, 96], strides = [1, 1]} : vector<2x128xf32> to vector<2x96xf32>
    %741 = arith.negf %740 : vector<2x96xf32>
    %742 = math.exp %741 : vector<2x96xf32>
    %cst_251 = arith.constant 1.000000e+00 : f32
    %743 = vector.broadcast %cst_251 : f32 to vector<2x96xf32>
    %744 = arith.addf %743, %742 : vector<2x96xf32>
    %745 = arith.divf %743, %744 : vector<2x96xf32>
    %746 = vector.extract_strided_slice %745 {offsets = [0, 0], sizes = [2, 32], strides = [1, 1]} : vector<2x96xf32> to vector<2x32xf32>
    %747 = vector.extract_strided_slice %745 {offsets = [0, 32], sizes = [2, 32], strides = [1, 1]} : vector<2x96xf32> to vector<2x32xf32>
    %748 = vector.extract_strided_slice %745 {offsets = [0, 64], sizes = [2, 32], strides = [1, 1]} : vector<2x96xf32> to vector<2x32xf32>
    %749 = vector.extract_strided_slice %739 {offsets = [0, 96], sizes = [2, 32], strides = [1, 1]} : vector<2x128xf32> to vector<2x32xf32>
    %750 = math.tanh %749 : vector<2x32xf32>
    %751 = arith.mulf %747, %729 : vector<2x32xf32>
    %752 = arith.mulf %746, %750 : vector<2x32xf32>
    %753 = arith.addf %751, %752 : vector<2x32xf32>
    %754 = math.tanh %753 : vector<2x32xf32>
    %755 = arith.mulf %748, %754 : vector<2x32xf32>
    %c2_i32_252 = arith.constant 2 : i32
    %756 = arith.muli %c2_i32_247, %c2_i32_252 : i32
    %757 = arith.index_cast %756 : i32 to index
    %c0_253 = arith.constant 0 : index
    %758 = vector.load %arg25[%757, %c0_253] : memref<16x32xf32, #tpu.memory_space<vmem>>, vector<2x32xf32>
    tpu.vector_store %arg25[%757, %c0_253], %755 {strides = array<i32>} : memref<16x32xf32, #tpu.memory_space<vmem>>, vector<2x32xf32>,
    %c3_i32_254 = arith.constant 3 : i32
    %c2_i32_255 = arith.constant 2 : i32
    %759 = arith.muli %c3_i32_254, %c2_i32_255 : i32
    %760 = arith.index_cast %759 : i32 to index
    %c0_256 = arith.constant 0 : index
    %761 = vector.load %arg24[%760, %c0_256] : memref<16x128xf32, #tpu.memory_space<vmem>>, vector<2x128xf32>
    %cst_257 = arith.constant dense<0.000000e+00> : vector<2x128xf32>
    %762 = tpu.matmul %755, %681, %cst_257 {dimension_numbers = #tpu.dot_dimension_numbers<[1], [0], [0], [1], [0, 0, 1, 1], [], []>} : vector<2x32xf32>, vector<32x128xf32>, vector<2x128xf32> -> vector<2x128xf32>
    %763 = arith.addf %761, %762 : vector<2x128xf32>
    %764 = vector.extract_strided_slice %763 {offsets = [0, 0], sizes = [2, 96], strides = [1, 1]} : vector<2x128xf32> to vector<2x96xf32>
    %765 = arith.negf %764 : vector<2x96xf32>
    %766 = math.exp %765 : vector<2x96xf32>
    %cst_258 = arith.constant 1.000000e+00 : f32
    %767 = vector.broadcast %cst_258 : f32 to vector<2x96xf32>
    %768 = arith.addf %767, %766 : vector<2x96xf32>
    %769 = arith.divf %767, %768 : vector<2x96xf32>
    %770 = vector.extract_strided_slice %769 {offsets = [0, 0], sizes = [2, 32], strides = [1, 1]} : vector<2x96xf32> to vector<2x32xf32>
    %771 = vector.extract_strided_slice %769 {offsets = [0, 32], sizes = [2, 32], strides = [1, 1]} : vector<2x96xf32> to vector<2x32xf32>
    %772 = vector.extract_strided_slice %769 {offsets = [0, 64], sizes = [2, 32], strides = [1, 1]} : vector<2x96xf32> to vector<2x32xf32>
    %773 = vector.extract_strided_slice %763 {offsets = [0, 96], sizes = [2, 32], strides = [1, 1]} : vector<2x128xf32> to vector<2x32xf32>
    %774 = math.tanh %773 : vector<2x32xf32>
    %775 = arith.mulf %771, %753 : vector<2x32xf32>
    %776 = arith.mulf %770, %774 : vector<2x32xf32>
    %777 = arith.addf %775, %776 : vector<2x32xf32>
    %778 = math.tanh %777 : vector<2x32xf32>
    %779 = arith.mulf %772, %778 : vector<2x32xf32>
    %c2_i32_259 = arith.constant 2 : i32
    %780 = arith.muli %c3_i32_254, %c2_i32_259 : i32
    %781 = arith.index_cast %780 : i32 to index
    %c0_260 = arith.constant 0 : index
    %782 = vector.load %arg25[%781, %c0_260] : memref<16x32xf32, #tpu.memory_space<vmem>>, vector<2x32xf32>
    tpu.vector_store %arg25[%781, %c0_260], %779 {strides = array<i32>} : memref<16x32xf32, #tpu.memory_space<vmem>>, vector<2x32xf32>,
    %c4_i32_261 = arith.constant 4 : i32
    %c2_i32_262 = arith.constant 2 : i32
    %783 = arith.muli %c4_i32_261, %c2_i32_262 : i32
    %784 = arith.index_cast %783 : i32 to index
    %c0_263 = arith.constant 0 : index
    %785 = vector.load %arg24[%784, %c0_263] : memref<16x128xf32, #tpu.memory_space<vmem>>, vector<2x128xf32>
    %cst_264 = arith.constant dense<0.000000e+00> : vector<2x128xf32>
    %786 = tpu.matmul %779, %681, %cst_264 {dimension_numbers = #tpu.dot_dimension_numbers<[1], [0], [0], [1], [0, 0, 1, 1], [], []>} : vector<2x32xf32>, vector<32x128xf32>, vector<2x128xf32> -> vector<2x128xf32>
    %787 = arith.addf %785, %786 : vector<2x128xf32>
    %788 = vector.extract_strided_slice %787 {offsets = [0, 0], sizes = [2, 96], strides = [1, 1]} : vector<2x128xf32> to vector<2x96xf32>
    %789 = arith.negf %788 : vector<2x96xf32>
    %790 = math.exp %789 : vector<2x96xf32>
    %cst_265 = arith.constant 1.000000e+00 : f32
    %791 = vector.broadcast %cst_265 : f32 to vector<2x96xf32>
    %792 = arith.addf %791, %790 : vector<2x96xf32>
    %793 = arith.divf %791, %792 : vector<2x96xf32>
    %794 = vector.extract_strided_slice %793 {offsets = [0, 0], sizes = [2, 32], strides = [1, 1]} : vector<2x96xf32> to vector<2x32xf32>
    %795 = vector.extract_strided_slice %793 {offsets = [0, 32], sizes = [2, 32], strides = [1, 1]} : vector<2x96xf32> to vector<2x32xf32>
    %796 = vector.extract_strided_slice %793 {offsets = [0, 64], sizes = [2, 32], strides = [1, 1]} : vector<2x96xf32> to vector<2x32xf32>
    %797 = vector.extract_strided_slice %787 {offsets = [0, 96], sizes = [2, 32], strides = [1, 1]} : vector<2x128xf32> to vector<2x32xf32>
    %798 = math.tanh %797 : vector<2x32xf32>
    %799 = arith.mulf %795, %777 : vector<2x32xf32>
    %800 = arith.mulf %794, %798 : vector<2x32xf32>
    %801 = arith.addf %799, %800 : vector<2x32xf32>
    %802 = math.tanh %801 : vector<2x32xf32>
    %803 = arith.mulf %796, %802 : vector<2x32xf32>
    %c2_i32_266 = arith.constant 2 : i32
    %804 = arith.muli %c4_i32_261, %c2_i32_266 : i32
    %805 = arith.index_cast %804 : i32 to index
    %c0_267 = arith.constant 0 : index
    %806 = vector.load %arg25[%805, %c0_267] : memref<16x32xf32, #tpu.memory_space<vmem>>, vector<2x32xf32>
    tpu.vector_store %arg25[%805, %c0_267], %803 {strides = array<i32>} : memref<16x32xf32, #tpu.memory_space<vmem>>, vector<2x32xf32>,
    %c5_i32_268 = arith.constant 5 : i32
    %c2_i32_269 = arith.constant 2 : i32
    %807 = arith.muli %c5_i32_268, %c2_i32_269 : i32
    %808 = arith.index_cast %807 : i32 to index
    %c0_270 = arith.constant 0 : index
    %809 = vector.load %arg24[%808, %c0_270] : memref<16x128xf32, #tpu.memory_space<vmem>>, vector<2x128xf32>
    %cst_271 = arith.constant dense<0.000000e+00> : vector<2x128xf32>
    %810 = tpu.matmul %803, %681, %cst_271 {dimension_numbers = #tpu.dot_dimension_numbers<[1], [0], [0], [1], [0, 0, 1, 1], [], []>} : vector<2x32xf32>, vector<32x128xf32>, vector<2x128xf32> -> vector<2x128xf32>
    %811 = arith.addf %809, %810 : vector<2x128xf32>
    %812 = vector.extract_strided_slice %811 {offsets = [0, 0], sizes = [2, 96], strides = [1, 1]} : vector<2x128xf32> to vector<2x96xf32>
    %813 = arith.negf %812 : vector<2x96xf32>
    %814 = math.exp %813 : vector<2x96xf32>
    %cst_272 = arith.constant 1.000000e+00 : f32
    %815 = vector.broadcast %cst_272 : f32 to vector<2x96xf32>
    %816 = arith.addf %815, %814 : vector<2x96xf32>
    %817 = arith.divf %815, %816 : vector<2x96xf32>
    %818 = vector.extract_strided_slice %817 {offsets = [0, 0], sizes = [2, 32], strides = [1, 1]} : vector<2x96xf32> to vector<2x32xf32>
    %819 = vector.extract_strided_slice %817 {offsets = [0, 32], sizes = [2, 32], strides = [1, 1]} : vector<2x96xf32> to vector<2x32xf32>
    %820 = vector.extract_strided_slice %817 {offsets = [0, 64], sizes = [2, 32], strides = [1, 1]} : vector<2x96xf32> to vector<2x32xf32>
    %821 = vector.extract_strided_slice %811 {offsets = [0, 96], sizes = [2, 32], strides = [1, 1]} : vector<2x128xf32> to vector<2x32xf32>
    %822 = math.tanh %821 : vector<2x32xf32>
    %823 = arith.mulf %819, %801 : vector<2x32xf32>
    %824 = arith.mulf %818, %822 : vector<2x32xf32>
    %825 = arith.addf %823, %824 : vector<2x32xf32>
    %826 = math.tanh %825 : vector<2x32xf32>
    %827 = arith.mulf %820, %826 : vector<2x32xf32>
    %c2_i32_273 = arith.constant 2 : i32
    %828 = arith.muli %c5_i32_268, %c2_i32_273 : i32
    %829 = arith.index_cast %828 : i32 to index
    %c0_274 = arith.constant 0 : index
    %830 = vector.load %arg25[%829, %c0_274] : memref<16x32xf32, #tpu.memory_space<vmem>>, vector<2x32xf32>
    tpu.vector_store %arg25[%829, %c0_274], %827 {strides = array<i32>} : memref<16x32xf32, #tpu.memory_space<vmem>>, vector<2x32xf32>,
    %c6_i32_275 = arith.constant 6 : i32
    %c2_i32_276 = arith.constant 2 : i32
    %831 = arith.muli %c6_i32_275, %c2_i32_276 : i32
    %832 = arith.index_cast %831 : i32 to index
    %c0_277 = arith.constant 0 : index
    %833 = vector.load %arg24[%832, %c0_277] : memref<16x128xf32, #tpu.memory_space<vmem>>, vector<2x128xf32>
    %cst_278 = arith.constant dense<0.000000e+00> : vector<2x128xf32>
    %834 = tpu.matmul %827, %681, %cst_278 {dimension_numbers = #tpu.dot_dimension_numbers<[1], [0], [0], [1], [0, 0, 1, 1], [], []>} : vector<2x32xf32>, vector<32x128xf32>, vector<2x128xf32> -> vector<2x128xf32>
    %835 = arith.addf %833, %834 : vector<2x128xf32>
    %836 = vector.extract_strided_slice %835 {offsets = [0, 0], sizes = [2, 96], strides = [1, 1]} : vector<2x128xf32> to vector<2x96xf32>
    %837 = arith.negf %836 : vector<2x96xf32>
    %838 = math.exp %837 : vector<2x96xf32>
    %cst_279 = arith.constant 1.000000e+00 : f32
    %839 = vector.broadcast %cst_279 : f32 to vector<2x96xf32>
    %840 = arith.addf %839, %838 : vector<2x96xf32>
    %841 = arith.divf %839, %840 : vector<2x96xf32>
    %842 = vector.extract_strided_slice %841 {offsets = [0, 0], sizes = [2, 32], strides = [1, 1]} : vector<2x96xf32> to vector<2x32xf32>
    %843 = vector.extract_strided_slice %841 {offsets = [0, 32], sizes = [2, 32], strides = [1, 1]} : vector<2x96xf32> to vector<2x32xf32>
    %844 = vector.extract_strided_slice %841 {offsets = [0, 64], sizes = [2, 32], strides = [1, 1]} : vector<2x96xf32> to vector<2x32xf32>
    %845 = vector.extract_strided_slice %835 {offsets = [0, 96], sizes = [2, 32], strides = [1, 1]} : vector<2x128xf32> to vector<2x32xf32>
    %846 = math.tanh %845 : vector<2x32xf32>
    %847 = arith.mulf %843, %825 : vector<2x32xf32>
    %848 = arith.mulf %842, %846 : vector<2x32xf32>
    %849 = arith.addf %847, %848 : vector<2x32xf32>
    %850 = math.tanh %849 : vector<2x32xf32>
    %851 = arith.mulf %844, %850 : vector<2x32xf32>
    %c2_i32_280 = arith.constant 2 : i32
    %852 = arith.muli %c6_i32_275, %c2_i32_280 : i32
    %853 = arith.index_cast %852 : i32 to index
    %c0_281 = arith.constant 0 : index
    %854 = vector.load %arg25[%853, %c0_281] : memref<16x32xf32, #tpu.memory_space<vmem>>, vector<2x32xf32>
    tpu.vector_store %arg25[%853, %c0_281], %851 {strides = array<i32>} : memref<16x32xf32, #tpu.memory_space<vmem>>, vector<2x32xf32>,
    %c7_i32_282 = arith.constant 7 : i32
    %c2_i32_283 = arith.constant 2 : i32
    %855 = arith.muli %c7_i32_282, %c2_i32_283 : i32
    %856 = arith.index_cast %855 : i32 to index
    %c0_284 = arith.constant 0 : index
    %857 = vector.load %arg24[%856, %c0_284] : memref<16x128xf32, #tpu.memory_space<vmem>>, vector<2x128xf32>
    %cst_285 = arith.constant dense<0.000000e+00> : vector<2x128xf32>
    %858 = tpu.matmul %851, %681, %cst_285 {dimension_numbers = #tpu.dot_dimension_numbers<[1], [0], [0], [1], [0, 0, 1, 1], [], []>} : vector<2x32xf32>, vector<32x128xf32>, vector<2x128xf32> -> vector<2x128xf32>
    %859 = arith.addf %857, %858 : vector<2x128xf32>
    %860 = vector.extract_strided_slice %859 {offsets = [0, 0], sizes = [2, 96], strides = [1, 1]} : vector<2x128xf32> to vector<2x96xf32>
    %861 = arith.negf %860 : vector<2x96xf32>
    %862 = math.exp %861 : vector<2x96xf32>
    %cst_286 = arith.constant 1.000000e+00 : f32
    %863 = vector.broadcast %cst_286 : f32 to vector<2x96xf32>
    %864 = arith.addf %863, %862 : vector<2x96xf32>
    %865 = arith.divf %863, %864 : vector<2x96xf32>
    %866 = vector.extract_strided_slice %865 {offsets = [0, 0], sizes = [2, 32], strides = [1, 1]} : vector<2x96xf32> to vector<2x32xf32>
    %867 = vector.extract_strided_slice %865 {offsets = [0, 32], sizes = [2, 32], strides = [1, 1]} : vector<2x96xf32> to vector<2x32xf32>
    %868 = vector.extract_strided_slice %865 {offsets = [0, 64], sizes = [2, 32], strides = [1, 1]} : vector<2x96xf32> to vector<2x32xf32>
    %869 = vector.extract_strided_slice %859 {offsets = [0, 96], sizes = [2, 32], strides = [1, 1]} : vector<2x128xf32> to vector<2x32xf32>
    %870 = math.tanh %869 : vector<2x32xf32>
    %871 = arith.mulf %867, %849 : vector<2x32xf32>
    %872 = arith.mulf %866, %870 : vector<2x32xf32>
    %873 = arith.addf %871, %872 : vector<2x32xf32>
    %874 = math.tanh %873 : vector<2x32xf32>
    %875 = arith.mulf %868, %874 : vector<2x32xf32>
    %c2_i32_287 = arith.constant 2 : i32
    %876 = arith.muli %c7_i32_282, %c2_i32_287 : i32
    %877 = arith.index_cast %876 : i32 to index
    %c0_288 = arith.constant 0 : index
    %878 = vector.load %arg25[%877, %c0_288] : memref<16x32xf32, #tpu.memory_space<vmem>>, vector<2x32xf32>
    tpu.vector_store %arg25[%877, %c0_288], %875 {strides = array<i32>} : memref<16x32xf32, #tpu.memory_space<vmem>>, vector<2x32xf32>,
    %c8_i32_289 = arith.constant 8 : i32
    %c0_290 = arith.constant 0 : index
    %c0_291 = arith.constant 0 : index
    %879 = vector.load %arg25[%c0_290, %c0_291] : memref<16x32xf32, #tpu.memory_space<vmem>>, vector<16x32xf32>
    %c0_292 = arith.constant 0 : index
    %c0_293 = arith.constant 0 : index
    %880 = vector.load %arg17[%c0_292, %c0_293] : memref<32x32xf32, #tpu.memory_space<vmem>>, vector<32x32xf32>
    %cst_294 = arith.constant dense<0.000000e+00> : vector<16x32xf32>
    %881 = tpu.matmul %879, %880, %cst_294 {dimension_numbers = #tpu.dot_dimension_numbers<[1], [0], [0], [1], [0, 0, 1, 1], [], []>} : vector<16x32xf32>, vector<32x32xf32>, vector<16x32xf32> -> vector<16x32xf32>
    %c0_295 = arith.constant 0 : index
    %c0_296 = arith.constant 0 : index
    %882 = vector.load %arg18[%c0_295, %c0_296] : memref<1x32xf32, #tpu.memory_space<vmem>>, vector<1x32xf32>
    %883 = vector.broadcast %882 : vector<1x32xf32> to vector<16x32xf32>
    %884 = arith.addf %881, %883 : vector<16x32xf32>
    %cst_297 = arith.constant dense<0.000000e+00> : vector<32xf32>
    %885 = vector.multi_reduction <add>, %884, %cst_297 [0] : vector<16x32xf32> to vector<32xf32>
    %886 = vector.shape_cast %885 : vector<32xf32> to vector<1x32xf32>
    %cst_298 = arith.constant 1.600000e+01 : f32
    %887 = vector.broadcast %cst_298 : f32 to vector<1x32xf32>
    %888 = arith.divf %886, %887 : vector<1x32xf32>
    %889 = vector.broadcast %888 : vector<1x32xf32> to vector<16x32xf32>
    %890 = arith.subf %884, %889 : vector<16x32xf32>
    %891 = arith.mulf %890, %890 : vector<16x32xf32>
    %cst_299 = arith.constant dense<0.000000e+00> : vector<32xf32>
    %892 = vector.multi_reduction <add>, %891, %cst_299 [0] : vector<16x32xf32> to vector<32xf32>
    %893 = vector.shape_cast %892 : vector<32xf32> to vector<1x32xf32>
    %cst_300 = arith.constant 1.600000e+01 : f32
    %894 = vector.broadcast %cst_300 : f32 to vector<1x32xf32>
    %895 = arith.divf %893, %894 : vector<1x32xf32>
    %896 = vector.broadcast %888 : vector<1x32xf32> to vector<16x32xf32>
    %897 = arith.subf %884, %896 : vector<16x32xf32>
    %cst_301 = arith.constant 9.99999974E-6 : f32
    %898 = vector.broadcast %cst_301 : f32 to vector<1x32xf32>
    %899 = arith.addf %895, %898 : vector<1x32xf32>
    %900 = math.rsqrt %899 : vector<1x32xf32>
    %901 = vector.broadcast %900 : vector<1x32xf32> to vector<16x32xf32>
    %902 = arith.mulf %897, %901 : vector<16x32xf32>
    %c0_302 = arith.constant 0 : index
    %c0_303 = arith.constant 0 : index
    %903 = vector.load %arg19[%c0_302, %c0_303] : memref<1x32xf32, #tpu.memory_space<vmem>>, vector<1x32xf32>
    %904 = vector.broadcast %903 : vector<1x32xf32> to vector<16x32xf32>
    %905 = arith.mulf %902, %904 : vector<16x32xf32>
    %c0_304 = arith.constant 0 : index
    %c0_305 = arith.constant 0 : index
    %906 = vector.load %arg20[%c0_304, %c0_305] : memref<1x32xf32, #tpu.memory_space<vmem>>, vector<1x32xf32>
    %907 = vector.broadcast %906 : vector<1x32xf32> to vector<16x32xf32>
    %908 = arith.addf %905, %907 : vector<16x32xf32>
    %cst_306 = arith.constant 0.000000e+00 : f32
    %909 = vector.broadcast %cst_306 : f32 to vector<16x32xf32>
    %910 = arith.maximumf %908, %909 : vector<16x32xf32>
    %c0_307 = arith.constant 0 : index
    %c0_308 = arith.constant 0 : index
    %911 = vector.load %arg21[%c0_307, %c0_308] : memref<32x8xf32, #tpu.memory_space<vmem>>, vector<32x8xf32>
    %cst_309 = arith.constant dense<0.000000e+00> : vector<16x8xf32>
    %912 = tpu.matmul %910, %911, %cst_309 {dimension_numbers = #tpu.dot_dimension_numbers<[1], [0], [0], [1], [0, 0, 1, 1], [], []>} : vector<16x32xf32>, vector<32x8xf32>, vector<16x8xf32> -> vector<16x8xf32>
    %c0_310 = arith.constant 0 : index
    %c0_311 = arith.constant 0 : index
    %913 = vector.load %arg22[%c0_310, %c0_311] : memref<1x8xf32, #tpu.memory_space<vmem>>, vector<1x8xf32>
    %914 = vector.broadcast %913 : vector<1x8xf32> to vector<16x8xf32>
    %915 = arith.addf %912, %914 : vector<16x8xf32>
    %916 = vector.extract_strided_slice %915 {offsets = [0, 0], sizes = [1, 8], strides = [1, 1]} : vector<16x8xf32> to vector<1x8xf32>
    %917 = vector.extract_strided_slice %915 {offsets = [2, 0], sizes = [1, 8], strides = [1, 1]} : vector<16x8xf32> to vector<1x8xf32>
    %918 = vector.extract_strided_slice %915 {offsets = [4, 0], sizes = [1, 8], strides = [1, 1]} : vector<16x8xf32> to vector<1x8xf32>
    %919 = vector.extract_strided_slice %915 {offsets = [6, 0], sizes = [1, 8], strides = [1, 1]} : vector<16x8xf32> to vector<1x8xf32>
    %920 = vector.extract_strided_slice %915 {offsets = [8, 0], sizes = [1, 8], strides = [1, 1]} : vector<16x8xf32> to vector<1x8xf32>
    %921 = vector.extract_strided_slice %915 {offsets = [10, 0], sizes = [1, 8], strides = [1, 1]} : vector<16x8xf32> to vector<1x8xf32>
    %922 = vector.extract_strided_slice %915 {offsets = [12, 0], sizes = [1, 8], strides = [1, 1]} : vector<16x8xf32> to vector<1x8xf32>
    %923 = vector.extract_strided_slice %915 {offsets = [14, 0], sizes = [1, 8], strides = [1, 1]} : vector<16x8xf32> to vector<1x8xf32>
    %924 = tpu.concatenate %916, %917, %918, %919, %920, %921, %922, %923 in 0 : vector<1x8xf32>, vector<1x8xf32>, vector<1x8xf32>, vector<1x8xf32>, vector<1x8xf32>, vector<1x8xf32>, vector<1x8xf32>, vector<1x8xf32> -> vector<8x8xf32>
    %c0_312 = arith.constant 0 : index
    %c0_313 = arith.constant 0 : index
    %c0_314 = arith.constant 0 : index
    %925 = vector.load %arg23[%c0_312, %c0_313, %c0_314] : memref<2x8x8xf32, #tpu.memory_space<vmem>>, vector<1x8x8xf32>
    %926 = vector.shape_cast %925 : vector<1x8x8xf32> to vector<8x8xf32>
    %927 = vector.shape_cast %924 : vector<8x8xf32> to vector<1x8x8xf32>
    tpu.vector_store %arg23[%c0_312, %c0_313, %c0_314], %927 {strides = array<i32>} : memref<2x8x8xf32, #tpu.memory_space<vmem>>, vector<1x8x8xf32>,
    %928 = vector.extract_strided_slice %915 {offsets = [1, 0], sizes = [1, 8], strides = [1, 1]} : vector<16x8xf32> to vector<1x8xf32>
    %929 = vector.extract_strided_slice %915 {offsets = [3, 0], sizes = [1, 8], strides = [1, 1]} : vector<16x8xf32> to vector<1x8xf32>
    %930 = vector.extract_strided_slice %915 {offsets = [5, 0], sizes = [1, 8], strides = [1, 1]} : vector<16x8xf32> to vector<1x8xf32>
    %931 = vector.extract_strided_slice %915 {offsets = [7, 0], sizes = [1, 8], strides = [1, 1]} : vector<16x8xf32> to vector<1x8xf32>
    %932 = vector.extract_strided_slice %915 {offsets = [9, 0], sizes = [1, 8], strides = [1, 1]} : vector<16x8xf32> to vector<1x8xf32>
    %933 = vector.extract_strided_slice %915 {offsets = [11, 0], sizes = [1, 8], strides = [1, 1]} : vector<16x8xf32> to vector<1x8xf32>
    %934 = vector.extract_strided_slice %915 {offsets = [13, 0], sizes = [1, 8], strides = [1, 1]} : vector<16x8xf32> to vector<1x8xf32>
    %935 = vector.extract_strided_slice %915 {offsets = [15, 0], sizes = [1, 8], strides = [1, 1]} : vector<16x8xf32> to vector<1x8xf32>
    %936 = tpu.concatenate %928, %929, %930, %931, %932, %933, %934, %935 in 0 : vector<1x8xf32>, vector<1x8xf32>, vector<1x8xf32>, vector<1x8xf32>, vector<1x8xf32>, vector<1x8xf32>, vector<1x8xf32>, vector<1x8xf32> -> vector<8x8xf32>
    %c1 = arith.constant 1 : index
    %c0_315 = arith.constant 0 : index
    %c0_316 = arith.constant 0 : index
    %937 = vector.load %arg23[%c1, %c0_315, %c0_316] : memref<2x8x8xf32, #tpu.memory_space<vmem>>, vector<1x8x8xf32>
    %938 = vector.shape_cast %937 : vector<1x8x8xf32> to vector<8x8xf32>
    %939 = vector.shape_cast %936 : vector<8x8xf32> to vector<1x8x8xf32>
    tpu.vector_store %arg23[%c1, %c0_315, %c0_316], %939 {strides = array<i32>} : memref<2x8x8xf32, #tpu.memory_space<vmem>>, vector<1x8x8xf32>,
    return
  }
}

</mosaic_0001>

<bundles_post_ra>
// kernel: lstm_model_forward.1
= control target key start
LH: loop header
LB: loop body
LE: loop exit
PB: predicated region body
PF: predicated region fallthrough
CT: control target
= control target key end

     0   :  { %s5135_s0 = inlined_call_operand.vmem [shape: f32[2,16], index: 0, kind: input, shape index: {}]   ;;  %s5136_s1 = inlined_call_operand.vmem [shape: f32[16,1], index: 1, kind: input, shape index: {}]   ;;  %s5137_s2 = inlined_call_operand.vmem [shape: f32[16,2], index: 2, kind: input, shape index: {}]   ;;  %s5138_s3 = inlined_call_operand.vmem [shape: f32[16,1], index: 3, kind: input, shape index: {}]   ;;  %s5139_s4 = inlined_call_operand.vmem [shape: f32[16,2], index: 4, kind: input, shape index: {}]   ;;  %s5140_s5 = inlined_call_operand.vmem [shape: f32[1,32], index: 5, kind: input, shape index: {}]   ;;  %s5141_s6 = inlined_call_operand.vmem [shape: f32[1,32], index: 6, kind: input, shape index: {}]   ;;  %s5142_s7 = inlined_call_operand.vmem [shape: f32[1,32], index: 7, kind: input, shape index: {}]   ;;  %s5143_s8 = inlined_call_operand.hbm [shape: f32[64,32], index: 8, kind: input, shape index: {}]   ;;  %s5144_s9 = inlined_call_operand.vmem [shape: f32[16,32], index: 9, kind: input, shape index: {}]   ;;  %s5145_s10 = inlined_call_operand.vmem [shape: f32[1,32], index: 10, kind: input, shape index: {}]   ;;  %s5146_s11 = inlined_call_operand.hbm [shape: f32[32,128], index: 11, kind: input, shape index: {}]   ;;  %s5147_s12 = inlined_call_operand.hbm [shape: f32[32,128], index: 12, kind: input, shape index: {}]   ;;  %s5148_s13 = inlined_call_operand.vmem [shape: f32[1,128], index: 13, kind: input, shape index: {}]   ;;  %s5149_s14 = inlined_call_operand.hbm [shape: f32[32,128], index: 14, kind: input, shape index: {}]   ;;  %s5150_s15 = inlined_call_operand.hbm [shape: f32[32,128], index: 15, kind: input, shape index: {}]   ;;  %s5151_s16 = inlined_call_operand.vmem [shape: f32[1,128], index: 16, kind: input, shape index: {}]   ;;  %s5152_s17 = inlined_call_operand.vmem [shape: f32[32,32], index: 17, kind: input, shape index: {}]   ;;  %s5153_s18 = inlined_call_operand.vmem [shape: f32[1,32], index: 18, kind: input, shape index: {}]   ;;  %s5154_s19 = inlined_call_operand.vmem [shape: f32[1,32], index: 19, kind: input, shape index: {}]   ;;  %s5155_s20 = inlined_call_operand.vmem [shape: f32[1,32], index: 20, kind: input, shape index: {}]   ;;  %s5156_s21 = inlined_call_operand.vmem [shape: f32[32,8], index: 21, kind: input, shape index: {}]   ;;  %s5157_s22 = inlined_call_operand.vmem [shape: f32[1,8], index: 22, kind: input, shape index: {}]   ;;  %s5158_s23 = inlined_call_operand.hbm [shape: f32[2,8,8], index: 23, kind: output, shape index: {}]  }
   0x1   :  { %5167 = sst [smem:[#allocation18_spill]] %s5135_s0 }
   0x2   :  { %5168 = sst [smem:[#allocation19_spill]] %s5136_s1 }
   0x3   :  { %5169 = sst [smem:[#allocation20_spill]] %s5137_s2 }
   0x4   :  { %5170 = sst [smem:[#allocation21_spill]] %s5138_s3 }
   0x5   :  { %5171 = sst [smem:[#allocation22_spill]] %s5139_s4 }
   0x6   :  { %5172 = sst [smem:[#allocation23_spill]] %s5140_s5 }
   0x7   :  { %5173 = sst [smem:[#allocation24_spill]] %s5141_s6 }
   0x8   :  { %5174 = sst [smem:[#allocation25_spill]] %s5142_s7 }
   0x9   :  { %28 = vsyncpa [#allocation5], 0 }
   0xa   :  { %29 = vsyncpa [#allocation8], 0 }
   0xb   :  { %30 = vsyncpa [#allocation11], 0 }
   0xc   :  { %31 = vsyncpa [#allocation6], 0  ;;  %s69_s24 = sshll.u32 %s5146_s11, 4  ;;  %s4092_s25 = smov [#allocation7]   ;;  %s70_s24 = int_to_ptr.hbm [resolvable:$true] %s69_s24 }
   0xd   :  { %s71_s5 = sshll.u32 %s4092_s25, 4  ;;  %s97_s2 = sshll.u32 %s5149_s14, 4  ;;  %s72_s5 = int_to_ptr.vmem [resolvable:$true] %s71_s5  ;;  %s98_s2 = int_to_ptr.hbm [resolvable:$true] %s97_s2 }
   0xe   :  { %s4093_s6 = smov 128   ;;  %s4094_s27 = smov 8  }
   0xf   :  { %77 = dma.hbm_to_vmem [thread:$0]  %s70_s24, 512, %s72_s5, [#allocation8], %s4093_s6, %s4093_s6, %s4094_s27  }
  0x10   :  { %s4095_s7 = smov [#allocation10]   ;;  %s52_s11 = sshll.u32 %s5143_s8, 4  ;;  %s53_s11 = int_to_ptr.hbm [resolvable:$true] %s52_s11 }
  0x11   :  { %s99_s28 = sshll.u32 %s4095_s7, 4  ;;  %s82_s4 = sshll.u32 %s5147_s12, 4  ;;  %s100_s28 = int_to_ptr.vmem [resolvable:$true] %s99_s28  ;;  %s83_s4 = int_to_ptr.hbm [resolvable:$true] %s82_s4 }
  0x12   :  { %105 = dma.hbm_to_vmem [thread:$0]  %s98_s2, 512, %s100_s28, [#allocation11], %s4093_s6, %s4093_s6, %s4094_s27  }
  0x13   :  { %s4096_s30 = smov [#allocation4]   ;;  %s4097_s24 = smov [#allocation9]  }
  0x14   :  { %s54_s25 = sshll.u32 %s4096_s30, 4  ;;  %s84_s8 = sshll.u32 %s4097_s24, 4  ;;  %s55_s25 = int_to_ptr.vmem [resolvable:$true] %s54_s25  ;;  %s85_s8 = int_to_ptr.vmem [resolvable:$true] %s84_s8 }
  0x15   :  { %60 = dma.hbm_to_vmem [thread:$0]  %s53_s11, 1024, %s55_s25, [#allocation5], %s4093_s6, %s4093_s6, %s4094_s27  }
  0x16   :  { %s110_s26 = sshll.u32 %s5150_s15, 4  ;;  %s4098_s12 = smov [#allocation12]   ;;  %s111_s26 = int_to_ptr.hbm [resolvable:$true] %s110_s26 }
  0x17   :  { %90 = dma.hbm_to_vmem [thread:$0]  %s83_s4, 512, %s85_s8, [#allocation8], %s4093_s6, %s4093_s6, %s4094_s27  }
  0x18   :  { %s112_s2 = sshll.u32 %s4098_s12, 4  ;;  %s113_s2 = int_to_ptr.vmem [resolvable:$true] %s112_s2 }
  0x19   :  { %118 = dma.hbm_to_vmem [thread:$0]  %s111_s26, 512, %s113_s2, [#allocation11], %s4093_s6, %s4093_s6, %s4094_s27  }
  0x1a   :  { %4084 = dma.done.wait [#allocation5], 1024  }
  0x1b   :  { %4085 = vsyncadd [#allocation5], 4294966272 }
  0x1c   :  { %4086 = dma.done.wait [#allocation8], 1024  }
  0x1d   :  { %4087 = vsyncadd [#allocation8], 4294966272 }
  0x1e   :  { %4088 = dma.done.wait [#allocation11], 1024  }
  0x1f   :  { %4089 = vsyncadd [#allocation11], 4294966272  ;;  %v4099_v0 = vmov 1   ;;  %v4100_v1 = vmov 0   ;;  %s5175_s28 = sld [smem:[#allocation20_spill]]  ;;  %s4101_s30 = smov 32  }
  0x20   :  { %3655 = vset.pattern.permute.xlu0 %v4099_v0  ;;  %3657 = vset.pattern.permute.xlu1 %v4100_v1  ;;  %s5176_s11 = sld [smem:[#allocation23_spill]]  ;;  %vm197_vm0 = vcmask 261120   ;;  %v4102_v24 = vmov 683565275   ;;  %v4103_v26 = vmov 2475754826  }
  0x21   :  { %3658 = vset.pattern.permute.xlu2 %v4099_v0  ;;  %s5177_s4 = sld [smem:[#allocation24_spill]]  ;;  %v4104_v29 = vmov 2131351028   ;;  %v4105_v32 = vmov 2102212464   ;;  %vm590_vm11 = vcmask 130048  }
  0x22   :  { %v4106_v35 = vmov 920167782   ;;  %v4107_v38 = vmov 1326507024   ;;  %s5178_s12 = sld [smem:[#allocation18_spill]]  ;;  %s4109_s5 = smov 64  }
  0x23   :  { %s5179_s7 = sld [smem:[#allocation19_spill]] }
  0x24   :  { %s5184_s25 = sld [smem:[#allocation25_spill]] }
  0x25   :  { %v155_v2 = vld [vmem:[%s5175_s28] sm:$0xff]  ;;  %s5185_s14 = sld [smem:[#allocation22_spill]] }
  0x26   :  { %178 = vperm.xlu0 %3655, %v155_v2   ;;  %v4272_v3 = vld [vmem:[%s5176_s11] ss:$0 sm:$0xff] }
  0x27   :  { %v4277_v4 = vld [vmem:[%s5177_s4] ss:$0 sm:$0xff] }
  0x2e   :  { %3656 = vset.pattern.permute.xlu0 %v4100_v1 }
  0x2f   :  { %159 = vperm.xlu0 %3656, %v155_v2  }
  0x98   :  { %v179_v5 = vpop.permute.xlu0 %178 }
  0x99   :  { %v185_v6 = vmul.f32 %v4272_v3, %v179_v5 }
  0x9b   :  { %v187_v7 = vadd.f32 %v4277_v4, %v185_v6 }
  0x9d   :  { %191 = vrot.lane.b32.xlu1 %v187_v7, %s4101_s30 }
  0xa1   :  { %v160_v8 = vpop.permute.xlu0 %159 }
  0xa2   :  { %v170_v9 = vmul.f32 %v4272_v3, %v160_v8 }
  0xa4   :  { %v175_v10 = vadd.f32 %v4277_v4, %v170_v9 }
 0x10f   :  { %v192_v11 = vpop.permute.xlu1 %191 }
 0x110   :  { %v4285_v12 = vsel %vm197_vm0, %v175_v10, %v192_v11 }
 0x111   :  { %v218_v13 = vand.u32 2139095040, %v4285_v12  ;;  %v215_v16 = vand.u32 2147483647, %v4285_v12  ;;  %vm217_vm14 = vcmp.lt.s32.totalorder %v4285_v12, 0 }
 0x113   :  { %v219_v14 = vshrl.u32 %v218_v13, 23  ;;  %v222_v18 = vand.u32 8388607, %v215_v16  ;;  %vm4365_vm15 = vcmp.le.f32.partialorder %v215_v16, 0.7853982 }
 0x115   :  { %v3543_v15 = vadd.s32 4294967169, %v219_v14  ;;  %v223_v22 = vor.u32 8388608, %v222_v18 }
 0x117   :  { %v225_v17 = vadd.s32 1, %v3543_v15  ;;  %v4311_v45 = vshll.u32 %v223_v22, 8 }
 0x119   :  { %vm226_vm1 = vcmp.gt.s32.totalorder %v225_v17, 0  ;;  %v264_v54 = vand.u32 65535, %v4311_v45  ;;  %v265_v55 = vshrl.u32 %v4311_v45, 16 }
 0x11a   :  { %v227_v19 = vsel %vm226_vm1, %v225_v17, 0 }
 0x11b   :  { %v229_v20 = vand.u32 31, %v227_v19  ;;  %v4293_v23 = vshrl.u32 %v227_v19, 5 }
 0x11d   :  { %v4291_v21 = vsub.s32 32, %v229_v20  ;;  %v232_v25 = vshll.u32 %v4102_v24, %v229_v20  ;;  %v235_v27 = vshll.u32 %v4103_v26, %v229_v20  ;;  %v238_v31 = vshll.u32 %v4104_v29, %v229_v20 }
 0x11e   :  { %v241_v34 = vshll.u32 %v4105_v32, %v229_v20  ;;  %v244_v37 = vshll.u32 %v4106_v35, %v229_v20  ;;  %vm247_vm2 = vcmp.lt.s32.totalorder %v4293_v23, 1  ;;  %vm250_vm3 = vcmp.lt.s32.totalorder %v4293_v23, 4 }
 0x11f   :  { %v233_v28 = vshrl.u32 %v4103_v26, %v4291_v21  ;;  %v236_v30 = vshrl.u32 %v4104_v29, %v4291_v21  ;;  %v239_v33 = vshrl.u32 %v4105_v32, %v4291_v21  ;;  %v242_v36 = vshrl.u32 %v4106_v35, %v4291_v21 }
 0x120   :  { %v245_v39 = vshrl.u32 %v4107_v38, %v4291_v21  ;;  %vm249_vm4 = vcmp.lt.s32.totalorder %v4293_v23, 3  ;;  %vm248_vm5 = vcmp.lt.s32.totalorder %v4293_v23, 2  ;;  %v533_v23 = vld [vmem:[#allocation4 + $0x30] sm:$0xff] }
 0x121   :  { %v234_v40 = vor.u32 %v233_v28, %v232_v25  ;;  %v237_v41 = vor.u32 %v236_v30, %v235_v27  ;;  %v240_v42 = vor.u32 %v239_v33, %v238_v31  ;;  %v243_v43 = vor.u32 %v242_v36, %v241_v34 }
 0x122   :  { %v246_v44 = vor.u32 %v245_v39, %v244_v37  ;;  %v231_v25 = vshrl.u32 %v4102_v24, %v4291_v21 }
 0x123   :  { %v255_v46 = vsel %vm247_vm2, %v234_v40, %v237_v41  ;;  %v259_v47 = vsel %vm247_vm2, %v237_v41, %v240_v42  ;;  %v256_v48 = vsel %vm250_vm3, %v243_v43, 920167782  ;;  %v252_v19 = vsel %vm250_vm3, %v240_v42, 2102212464 }
 0x124   :  { %v260_v49 = vsel %vm250_vm3, %v246_v44, 1326507024  ;;  %v257_v50 = vsel %vm249_vm4, %v240_v42, %v256_v48  ;;  %v251_v34 = vsel %vm247_vm2, %v231_v25, %v234_v40  ;;  %v253_v36 = vsel %vm249_vm4, %v237_v41, %v252_v19  ;;  %v585_v41 = vld [vmem:[%s5144_s9 + $0x8] sm:$0xff]  ;;  %v535_v19 = vld [vmem:[%s5179_s7] sm:$0xff] }
 0x125   :  { %v261_v51 = vsel %vm249_vm4, %v243_v43, %v260_v49  ;;  %v258_v52 = vsel %vm248_vm5, %v255_v46, %v257_v50  ;;  %v254_v21 = vsel %vm248_vm5, %v251_v34, %v253_v36  ;;  %608 = vmatpush.msra.mxu3 %v585_v41  ;;  %540 = vperm.xlu1 %3657, %v535_v19  }
 0x126   :  { %v262_v53 = vsel %vm248_vm5, %v259_v47, %v261_v51  ;;  %v288_v58 = vand.u32 65535, %v258_v52  ;;  %v289_v59 = vshrl.u32 %v258_v52, 16  ;;  %v308_v49 = vmul.u32 %v4311_v45, %v254_v21  ;;  %v534_v52 = vld [vmem:[#allocation4 + $0x38] sm:$0xff]  ;;  %v583_v45 = vld [vmem:[%s5178_s12] sm:$0x3] }
 0x127   :  { %v266_v56 = vand.u32 65535, %v262_v53  ;;  %v267_v57 = vshrl.u32 %v262_v53, 16  ;;  %v584_v53 = vld [vmem:[%s5144_s9] sm:$0xff]  ;;  %568 = vmatpush.msra.mxu0 %v534_v52  ;;  %vm358_vm5 = vweird.f32 %v4285_v12 }
 0x128   :  { %v291_v62 = vmul.u32 %v289_v59, %v264_v54  ;;  %v292_v63 = vmul.u32 %v288_v58, %v265_v55  ;;  %v290_v7 = vmul.u32 %v288_v58, %v264_v54  ;;  %v293_v11 = vmul.u32 %v289_v59, %v265_v55  ;;  %609 = vmatpush.msra.mxu3 %v584_v53  ;;  %v530_v59 = vld [vmem:[#allocation4 + $0x18] sm:$0xff] }
 0x129   :  { %v269_v60 = vmul.u32 %v267_v57, %v264_v54  ;;  %v270_v61 = vmul.u32 %v266_v56, %v265_v55  ;;  %v268_v2 = vmul.u32 %v266_v56, %v264_v54  ;;  %v271_v6 = vmul.u32 %v267_v57, %v265_v55  ;;  %v532_v55 = vld [vmem:[#allocation4 + $0x28] sm:$0xff]  ;;  %569 = vmatpush.msra.mxu0 %v533_v23  ;;  %v531_v57 = vld [vmem:[#allocation4 + $0x20] sm:$0xff] }
 0x12a   :  { %v294_v8 = vshll.u32 %v291_v62, 16  ;;  %v296_v14 = vshll.u32 %v292_v63, 16  ;;  %v295_v31 = vshrl.u32 %v291_v62, 16  ;;  %v297_v42 = vshrl.u32 %v292_v63, 16  ;;  %3551 = vmatmul.msk.f32.vlgmr.msra.gmra.mxu3 %vm590_vm11, %v583_v45 }
 0x12b   :  { %v272_v5 = vshll.u32 %v269_v60, 16  ;;  %v274_v9 = vshll.u32 %v270_v61, 16  ;;  %v273_v27 = vshrl.u32 %v269_v60, 16  ;;  %v275_v37 = vshrl.u32 %v270_v61, 16  ;;  %570 = vmatpush.msra.mxu0 %v532_v55  ;;  %v529_v61 = vld [vmem:[#allocation4 + $0x10] sm:$0xff] }
 0x12c   :  { %vm298_vm7 = vc.u32 %v290_v7, %v294_v8  ;;  %v300_v15 = vadd.s32 %v294_v8, %v290_v7 }
 0x12d   :  { %vm276_vm6 = vc.u32 %v268_v2, %v272_v5  ;;  %v278_v10 = vadd.s32 %v272_v5, %v268_v2  ;;  %v299_v18 = vsel %vm298_vm7, 1, %v4100_v1  ;;  %571 = vmatpush.msra.mxu0 %v531_v57  ;;  %v528_v2 = vld [vmem:[#allocation4 + $0x8] sm:$0xff]  ;;  %3662 = vset.pattern.permute.xlu1 %v4099_v0  ;;  %vm621_vm7 = vcmask 1041408  }
 0x12e   :  { %v277_v13 = vsel %vm276_vm6, 1, %v4100_v1  ;;  %v301_v22 = vadd.s32 %v299_v18, %v293_v11  ;;  %vm302_vm9 = vc.u32 %v300_v15, %v296_v14  ;;  %v304_v46 = vadd.s32 %v300_v15, %v296_v14 }
 0x12f   :  { %v279_v17 = vadd.s32 %v277_v13, %v271_v6  ;;  %vm280_vm8 = vc.u32 %v278_v10, %v274_v9  ;;  %v303_v30 = vsel %vm302_vm9, 1, %v4100_v1  ;;  %572 = vmatpush.msra.mxu0 %v530_v59  ;;  %v527_v6 = vld [vmem:[#allocation4] sm:$0xff]  ;;  %vm553_vm6 = vcmask 523264  }
 0x130   :  { %v281_v20 = vsel %vm280_vm8, 1, %v4100_v1  ;;  %v305_v33 = vadd.s32 %v303_v30, %v301_v22  ;;  %vm623_vm8 = vcmask 1043456   ;;  %vm625_vm9 = vcmask 1045504  }
 0x131   :  { %v283_v28 = vadd.s32 %v281_v20, %v279_v17  ;;  %573 = vmatpush.msra.mxu0 %v529_v61 }
 0x132   :  { %v306_v43 = vadd.s32 %v305_v33, %v295_v31 }
 0x133   :  { %v284_v39 = vadd.s32 %v283_v28, %v273_v27  ;;  %574 = vmatpush.msra.mxu0 %v528_v2  ;;  %v630_v2 = vld [vmem:[#allocation7 + $0x8] sm:$0xff] }
 0x134   :  { %v307_v47 = vadd.s32 %v306_v43, %v297_v42 }
 0x135   :  { %v285_v44 = vadd.s32 %v284_v39, %v275_v37  ;;  %575 = vmatpush.msra.mxu0 %v527_v6  ;;  %v4384_v6 = vld [vmem:[#allocation9 + $0x18] sm:$0xff] }
 0x136   :  { %v311_v48 = vadd.s32 1, %v307_v47  ;;  %688 = vmatpush.msrb.mxu3 %v4384_v6  ;;  %755 = vmatpush.msra.mxu1 %v4384_v6 }
 0x137   :  { %vm310_vm10 = vc.u32 %v285_v44, %v304_v46  ;;  %v309_v8 = vadd.s32 %v304_v46, %v285_v44  ;;  %v200_v44 = vlaneseq }
 0x138   :  { %v312_v50 = vsel %vm310_vm10, %v311_v48, %v307_v47 }
 0x139   :  { %v313_v51 = vadd.s32 %v312_v50, %v308_v49  ;;  %v201_v50 = vand.u32 127, %v200_v44 }
 0x13b   :  { %v314_v40 = vadd.s32 536870912, %v313_v51  ;;  %v206_v23 = vand.u32 31, %v201_v50 }
 0x13d   :  { %v315_v54 = vshrl.u32 %v314_v40, 30  ;;  %vm4375_vm3 = vcmp.lt.s32.totalorder %v206_v23, 31 }
 0x13f   :  { %v316_v56 = vshll.u32 %v315_v54, 30  ;;  %v339_v31 = vsub.s32 4, %v315_v54 }
 0x141   :  { %v317_v58 = vsub.s32 %v313_v51, %v316_v56  ;;  %v340_v39 = vsel %vm217_vm14, %v339_v31, %v315_v54 }
 0x142   :  { %v342_v16 = vsel %vm4365_vm15, 0, %v340_v39 }
 0x143   :  { %vm318_vm12 = vcmp.lt.s32.totalorder %v317_v58, 0  ;;  %v319_v60 = vsub.s32 0, %v317_v58  ;;  %v359_v49 = vadd.s32 3, %v342_v16 }
 0x145   :  { %v320_v62 = vsel %vm318_vm12, %v319_v60, %v317_v58  ;;  %v360_v53 = vand.u32 3, %v359_v49 }
 0x146   :  { %v321_v63 = vclz %v320_v62  ;;  %v632_v62 = vld [vmem:[#allocation7 + $0x18] sm:$0xff] }
 0x147   :  { %vm362_vm1 = vcmp.eq.s32.totalorder %v360_v53, 0  ;;  %vm365_vm2 = vcmp.eq.s32.totalorder %v360_v53, 2  ;;  %vm361_vm4 = vcmp.lt.s32.totalorder %v360_v53, 2  ;;  %659 = vmatpush.msra.mxu2 %v632_v62 }
 0x148   :  { %v3544_v5 = vadd.s32 4294967294, %v321_v63  ;;  %v631_v63 = vld [vmem:[#allocation7 + $0x10] sm:$0xff] }
 0x149   :  { %660 = vmatpush.msra.mxu2 %v631_v63 }
 0x14a   :  { %vm3545_vm13 = vcmp.lt.s32.totalorder %v3544_v5, 0 }
 0x14b   :  { %v324_v7 = vsel %vm3545_vm13, 0, %v3544_v5  ;;  %661 = vmatpush.msra.mxu2 %v630_v2  ;;  %v629_v5 = vld [vmem:[#allocation7] sm:$0xff] }
 0x14c   :  { %v325_v9 = vsub.s32 32, %v324_v7  ;;  %v329_v10 = vsub.s32 4294967266, %v324_v7  ;;  %v326_v11 = vshll.u32 %v317_v58, %v324_v7  ;;  %v4386_v7 = vld [vmem:[#allocation9 + $0x10] sm:$0xff] }
 0x14d   :  { %662 = vmatpush.msra.mxu2 %v629_v5  ;;  %689 = vmatpush.msrb.mxu3 %v4386_v7 }
 0x14e   :  { %v327_v13 = vshrl.u32 %v309_v8, %v325_v9  ;;  %v330_v14 = vadd.s32 127, %v329_v10  ;;  %v4390_v8 = vld [vmem:[#allocation9 + $0x8] sm:$0xff]  ;;  %756 = vmatpush.msra.mxu1 %v4386_v7  ;;  %v4108_v9 = vmov 0.0   ;;  %v3666_v10 = vld [vmem:[%s5145_s10] ss:$0 sm:$0xff] }
 0x14f   :  { %953 = vmatpush.msrb.mxu2 %v4384_v6  ;;  %690 = vmatpush.msrb.mxu3 %v4390_v8 }
 0x150   :  { %v328_v15 = vor.u32 %v327_v13, %v326_v11  ;;  %v331_v17 = vshll.u32 %v330_v14, 23  ;;  %757 = vmatpush.msra.mxu1 %v4390_v8 }
 0x151   :  { %954 = vmatpush.msrb.mxu2 %v4386_v7 }
 0x152   :  { %v332_v18 = vor.u32 4788187, %v331_v17  ;;  %v335_v22 = vcvt.s32.f32 %v328_v15  ;;  %v4421_v15 = vld [vmem:[%s5184_s25] ss:$0 sm:$0xff] }
 0x153   :  { %955 = vmatpush.msrb.mxu2 %v4390_v8 }
 0x154   :  { %v333_v20 = vand.u32 2147483647, %v332_v18 }
 0x156   :  { %v336_v25 = vmul.f32 %v335_v22, %v333_v20 }
 0x158   :  { %v337_v27 = vxor.u32 2147483648, %v336_v25 }
 0x15a   :  { %v338_v30 = vsel %vm217_vm14, %v337_v27, %v336_v25 }
 0x15b   :  { %v341_v33 = vsel %vm4365_vm15, %v4285_v12, %v338_v30  ;;  %vm738_vm15 = vcmask 254976  }
 0x15c   :  { %v343_v34 = vmul.f32 %v341_v33, %v341_v33 }
 0x15e   :  { %v344_v36 = vmul.f32 -0.001358992, %v343_v34  ;;  %v351_v37 = vmul.f32 -0.00019511016, %v343_v34 }
 0x160   :  { %v345_v42 = vadd.f32 0.041655596, %v344_v36  ;;  %v352_v43 = vadd.f32 0.008332121, %v351_v37 }
 0x162   :  { %v346_v46 = vmul.f32 %v345_v42, %v343_v34  ;;  %v353_v21 = vmul.f32 %v352_v43, %v343_v34 }
 0x164   :  { %v347_v47 = vadd.f32 -0.4999988, %v346_v46  ;;  %v354_v48 = vadd.f32 -0.16666654, %v353_v21 }
 0x166   :  { %v348_v51 = vmul.f32 %v347_v47, %v343_v34  ;;  %v355_v40 = vmul.f32 %v354_v48, %v343_v34 }
 0x168   :  { %v349_v41 = vadd.f32 1.0, %v348_v51  ;;  %v356_v52 = vadd.f32 1.0, %v355_v40 }
 0x16a   :  { %v357_v45 = vmul.f32 %v356_v52, %v341_v33  ;;  %v366_v54 = vxor.u32 2147483648, %v349_v41  ;;  %v4440_v33 = vld [vmem:[%s5148_s13] ss:$0 sm:$0xff] }
 0x16c   :  { %v363_v55 = vxor.u32 2147483648, %v357_v45  ;;  %v367_v58 = vsel %vm365_vm2, %v366_v54, %v357_v45 }
 0x16e   :  { %v364_v57 = vsel %vm362_vm1, %v349_v41, %v363_v55 }
 0x16f   :  { %v368_v59 = vsel %vm361_vm4, %v364_v57, %v367_v58 }
 0x170   :  { %v369_v60 = vsel %vm358_vm5, nan, %v368_v59 }
 0x171   :  { %v525_v61 = vsel %vm4375_vm3, %v369_v60, %v4285_v12  ;;  %v4395_v12 = vld [vmem:[#allocation9] sm:$0xff] }
 0x172   :  { %3549 = vmatmul.msk.f32.vlgmr.msra.gmra.mxu0 %vm553_vm6, %v525_v61  ;;  %691 = vmatpush.msrb.mxu3 %v4395_v12 }
 0x173   :  { %758 = vmatpush.msra.mxu1 %v4395_v12  ;;  %692 = vmatmul.f32.vlgmr.msrb.gmra.mxu3 %v4108_v9 }
 0x174   :  { %821 = vmatpush.msra.mxu3 %v4384_v6  ;;  %956 = vmatpush.msrb.mxu2 %v4395_v12 }
 0x175   :  { %887 = vmatpush.msrb.mxu1 %v4384_v6 }
 0x176   :  { %822 = vmatpush.msra.mxu3 %v4386_v7 }
 0x177   :  { %888 = vmatpush.msrb.mxu1 %v4386_v7 }
 0x178   :  { %823 = vmatpush.msra.mxu3 %v4390_v8 }
 0x179   :  { %889 = vmatpush.msrb.mxu1 %v4390_v8 }
 0x17a   :  { %824 = vmatpush.msra.mxu3 %v4395_v12 }
 0x17b   :  { %890 = vmatpush.msrb.mxu1 %v4395_v12 }
 0x17c   :  { %1019 = vmatpush.msrb.mxu3 %v4384_v6 }
 0x17e   :  { %1020 = vmatpush.msrb.mxu3 %v4386_v7 }
 0x180   :  { %1021 = vmatpush.msrb.mxu3 %v4390_v8 }
 0x182   :  { %1022 = vmatpush.msrb.mxu3 %v4395_v12 }
 0x197   :  { %v541_v17 = vpop.permute.xlu1 %540 }
 0x198   :  { %v551_v20 = vmul.f32 %v4421_v15, %v541_v17 }
 0x1ad   :  { %v611_v11 = vpop.f32.mrf.mxu3 }
 0x1ae   :  { %v612_v13 = vadd.f32 %v3666_v10, %v611_v11 }
 0x1b0   :  { %v615_v14 = vrot.slane %v612_v13, 6  ;;  %v617_v18 = vrot.slane %v612_v13, 4  ;;  %v619_v22 = vrot.slane %v612_v13, 2 }
 0x1b2   :  { %v622_v19 = vsel %vm621_vm7, %v612_v13, %v615_v14 }
 0x1b3   :  { %v624_v25 = vsel %vm623_vm8, %v622_v19, %v617_v18 }
 0x1b4   :  { %v4429_v30 = vsel %vm625_vm9, %v624_v25, %v619_v22 }
 0x1ef   :  { %v577_v27 = vpop.f32.mrf.mxu0 }
 0x1f0   :  { %v578_v28 = vadd.f32 %v577_v27, %v551_v20 }
 0x1f2   :  { %v627_v31 = vadd.f32 %v4429_v30, %v578_v28 }
 0x1f4   :  { %3552 = vmatmul.msk.f32.vlgmr.msra.gmra.mxu2 %vm197_vm0, %v627_v31 }
 0x1f5   :  { %1151 = vmatpush.msra.mxu2 %v4384_v6 }
 0x1f6   :  { %v693_v37 = vpop.f32.mrf.mxu3 }
 0x1f7   :  { %1152 = vmatpush.msra.mxu2 %v4386_v7 }
 0x1f9   :  { %1153 = vmatpush.msra.mxu2 %v4390_v8 }
 0x1fb   :  { %1154 = vmatpush.msra.mxu2 %v4395_v12 }
 0x277   :  { %v664_v34 = vpop.f32.mrf.mxu2 }
 0x278   :  { %v665_v36 = vadd.f32 %v4440_v33, %v664_v34 }
 0x27a   :  { %670 = vst [vmem:[#allocation2] sm:$0xff] %v665_v36 }
 0x281   :  { %v672_v39 = vld [vmem:[#allocation2] sm:$0x3]  ;;  %v740_v62 = vld [vmem:[#allocation2 + $0x2] sm:$0x3] }
 0x282   :  { %v696_v42 = vadd.f32 %v693_v37, %v672_v39 }
 0x284   :  { %3678 = vtanh.f32 %v696_v42  ;;  %v3554_v44 = vmul.f32 -1.442695, %v696_v42 }
 0x286   :  { %3680 = vpow2.f32 %v3554_v44 }
 0x28a   :  { %v3679_v43 = vpop.eup %3678 }
 0x28b   :  { %719 = vrot.lane.b32.xlu2 %v3679_v43, %s4101_s30  ;;  %v806_v43 = vld [vmem:[#allocation2 + $0x4] sm:$0x3] }
 0x28c   :  { %v3681_v16 = vpop.eup %3680 }
 0x28d   :  { %v700_v46 = vadd.f32 1.0, %v3681_v16 }
 0x28f   :  { %3682 = vrcp.f32 %v700_v46  ;;  %v712_v51 = vand.u32 2147483648, %v700_v46  ;;  %vm706_vm12 = vweird.f32 %v700_v46  ;;  %v710_v40 = vand.u32 2147483647, %v700_v46 }
 0x291   :  { %v713_v52 = vor.u32 1.1754944e-38, %v712_v51  ;;  %vm711_vm14 = vcmp.eq.f32.partialorder %v710_v40, 8.507059e+37 }
 0x295   :  { %v3683_v21 = vpop.eup %3682 }
 0x296   :  { %v702_v47 = vmul.f32 %v3683_v21, %v700_v46  ;;  %vm707_vm10 = vweird.f32 %v3683_v21 }
 0x297   :  { %vm708_vm13 = vmor %vm706_vm12, %vm707_vm10 }
 0x298   :  { %v703_v48 = vsub.f32 1.0, %v702_v47 }
 0x29a   :  { %v704_v49 = vmul.f32 %v3683_v21, %v703_v48 }
 0x29c   :  { %v705_v50 = vadd.f32 %v3683_v21, %v704_v49 }
 0x29e   :  { %v709_v41 = vsel %vm708_vm13, %v3683_v21, %v705_v50 }
 0x29f   :  { %v714_v23 = vsel %vm711_vm14, %v713_v52, %v709_v41 }
 0x2a0   :  { %v717_v54 = vmul.f32 0.0, %v714_v23 }
 0x2e5   :  { %v720_v53 = vpop.permute.xlu2 %719 }
 0x2e6   :  { %v722_v45 = vmul.f32 %v720_v53, %v714_v23 }
 0x2e8   :  { %724 = vrot.lane.b32.xlu2 %v722_v45, %s4101_s30 }
 0x342   :  { %v725_v55 = vpop.permute.xlu2 %724 }
 0x343   :  { %v727_v57 = vadd.f32 %v725_v55, %v717_v54 }
 0x345   :  { %3684 = vtanh.f32 %v727_v57 }
 0x34b   :  { %v3685_v58 = vpop.eup %3684 }
 0x34c   :  { %730 = vrot.lane.b32.xlu1 %v3685_v58, %s4101_s30  ;;  %v156_v58 = vld [vmem:[%s5175_s28 + $0x8] sm:$0xff] }
 0x3be   :  { %v731_v59 = vpop.permute.xlu1 %730 }
 0x3bf   :  { %v733_v60 = vmul.f32 %v731_v59, %v714_v23 }
 0x3c1   :  { %735 = vrot.lane.b32.xlu2 %v733_v60, %s4109_s5 }
 0x41b   :  { %v736_v61 = vpop.permute.xlu2 %735 }
 0x41c   :  { %739 = vst.msk [vmem:[#allocation3] sm:$0x3] %vm738_vm15, %v736_v61  ;;  %3555 = vmatmul.msk.f32.vlgmr.msra.gmra.mxu1 %vm197_vm0, %v736_v61 }
 0x41d   :  { %1085 = vmatpush.msra.mxu1 %v4384_v6 }
 0x41f   :  { %1086 = vmatpush.msra.mxu1 %v4386_v7 }
 0x421   :  { %1087 = vmatpush.msra.mxu1 %v4390_v8 }
 0x423   :  { %1088 = vmatpush.msra.mxu1 %v4395_v12 }
 0x499   :  { %v760_v63 = vpop.f32.mrf.mxu1 }
 0x49a   :  { %v763_v2 = vadd.f32 %v760_v63, %v740_v62 }
 0x49c   :  { %3686 = vtanh.f32 %v763_v2  ;;  %v3556_v10 = vmul.f32 -1.442695, %v763_v2 }
 0x49e   :  { %3688 = vpow2.f32 %v3556_v10 }
 0x4a2   :  { %v3687_v5 = vpop.eup %3686 }
 0x4a3   :  { %786 = vrot.lane.b32.xlu0 %v3687_v5, %s4101_s30 }
 0x4a4   :  { %v3689_v11 = vpop.eup %3688 }
 0x4a5   :  { %v767_v13 = vadd.f32 1.0, %v3689_v11 }
 0x4a7   :  { %3690 = vrcp.f32 %v767_v13  ;;  %v779_v8 = vand.u32 2147483648, %v767_v13  ;;  %vm773_vm2 = vweird.f32 %v767_v13  ;;  %v777_v12 = vand.u32 2147483647, %v767_v13 }
 0x4a9   :  { %v780_v20 = vor.u32 1.1754944e-38, %v779_v8  ;;  %vm778_vm5 = vcmp.eq.f32.partialorder %v777_v12, 8.507059e+37 }
 0x4ad   :  { %v3691_v14 = vpop.eup %3690 }
 0x4ae   :  { %v769_v6 = vmul.f32 %v3691_v14, %v767_v13  ;;  %vm774_vm1 = vweird.f32 %v3691_v14 }
 0x4af   :  { %vm775_vm4 = vmor %vm773_vm2, %vm774_vm1 }
 0x4b0   :  { %v770_v17 = vsub.f32 1.0, %v769_v6 }
 0x4b2   :  { %v771_v7 = vmul.f32 %v3691_v14, %v770_v17 }
 0x4b4   :  { %v772_v18 = vadd.f32 %v3691_v14, %v771_v7 }
 0x4b6   :  { %v776_v19 = vsel %vm775_vm4, %v3691_v14, %v772_v18 }
 0x4b7   :  { %v781_v25 = vsel %vm778_vm5, %v780_v20, %v776_v19 }
 0x4b8   :  { %v784_v28 = vmul.f32 %v781_v25, %v727_v57 }
 0x515   :  { %v787_v22 = vpop.permute.xlu0 %786 }
 0x516   :  { %v789_v27 = vmul.f32 %v787_v22, %v781_v25 }
 0x518   :  { %791 = vrot.lane.b32.xlu1 %v789_v27, %s4101_s30 }
 0x58a   :  { %v792_v31 = vpop.permute.xlu1 %791 }
 0x58b   :  { %v794_v34 = vadd.f32 %v792_v31, %v784_v28 }
 0x58d   :  { %3692 = vtanh.f32 %v794_v34 }
 0x593   :  { %v3693_v36 = vpop.eup %3692 }
 0x594   :  { %797 = vrot.lane.b32.xlu2 %v3693_v36, %s4101_s30 }
 0x5ee   :  { %v798_v37 = vpop.permute.xlu2 %797 }
 0x5ef   :  { %v800_v39 = vmul.f32 %v798_v37, %v781_v25 }
 0x5f1   :  { %802 = vrot.lane.b32.xlu0 %v800_v39, %s4109_s5 }
 0x663   :  { %v803_v42 = vpop.permute.xlu0 %802 }
 0x664   :  { %805 = vst.msk [vmem:[#allocation3 + $0x2] sm:$0x3] %vm738_vm15, %v803_v42  ;;  %3557 = vmatmul.msk.f32.vlgmr.msra.gmra.mxu3 %vm197_vm0, %v803_v42 }
 0x6e7   :  { %v826_v44 = vpop.f32.mrf.mxu3 }
 0x6e8   :  { %v829_v16 = vadd.f32 %v826_v44, %v806_v43 }
 0x6ea   :  { %3694 = vtanh.f32 %v829_v16  ;;  %v3558_v21 = vmul.f32 -1.442695, %v829_v16 }
 0x6ec   :  { %3696 = vpow2.f32 %v3558_v21 }
 0x6f0   :  { %v3695_v46 = vpop.eup %3694 }
 0x6f1   :  { %852 = vrot.lane.b32.xlu1 %v3695_v46, %s4101_s30 }
 0x6f2   :  { %v3697_v47 = vpop.eup %3696 }
 0x6f3   :  { %v833_v48 = vadd.f32 1.0, %v3697_v47 }
 0x6f5   :  { %3698 = vrcp.f32 %v833_v48  ;;  %v845_v52 = vand.u32 2147483648, %v833_v48  ;;  %vm839_vm12 = vweird.f32 %v833_v48  ;;  %v843_v53 = vand.u32 2147483647, %v833_v48 }
 0x6f7   :  { %v846_v45 = vor.u32 1.1754944e-38, %v845_v52  ;;  %vm844_vm14 = vcmp.eq.f32.partialorder %v843_v53, 8.507059e+37 }
 0x6fb   :  { %v3699_v49 = vpop.eup %3698 }
 0x6fc   :  { %v835_v50 = vmul.f32 %v3699_v49, %v833_v48  ;;  %vm840_vm10 = vweird.f32 %v3699_v49 }
 0x6fd   :  { %vm841_vm13 = vmor %vm839_vm12, %vm840_vm10 }
 0x6fe   :  { %v836_v51 = vsub.f32 1.0, %v835_v50 }
 0x700   :  { %v837_v40 = vmul.f32 %v3699_v49, %v836_v51 }
 0x702   :  { %v838_v41 = vadd.f32 %v3699_v49, %v837_v40 }
 0x704   :  { %v842_v23 = vsel %vm841_vm13, %v3699_v49, %v838_v41 }
 0x705   :  { %v847_v55 = vsel %vm844_vm14, %v846_v45, %v842_v23 }
 0x706   :  { %v850_v59 = vmul.f32 %v847_v55, %v794_v34 }
 0x763   :  { %v853_v54 = vpop.permute.xlu1 %852 }
 0x764   :  { %v855_v57 = vmul.f32 %v853_v54, %v847_v55 }
 0x766   :  { %857 = vrot.lane.b32.xlu2 %v855_v57, %s4101_s30 }
 0x76e   :  { %182 = vperm.xlu2 %3658, %v156_v58  }
 0x776   :  { %3659 = vset.pattern.permute.xlu2 %v4100_v1 }
 0x7c0   :  { %v858_v60 = vpop.permute.xlu2 %857 }
 0x7c1   :  { %v4465_v61 = vadd.f32 %v858_v60, %v850_v59 }
 0x7c3   :  { %3700 = vtanh.f32 %v4465_v61 }
 0x7c8   :  { %v183_v2 = vpop.permute.xlu2 %182 }
 0x7c9   :  { %v3701_v62 = vpop.eup %3700  ;;  %v186_v10 = vmul.f32 %v4272_v3, %v183_v2 }
 0x7ca   :  { %863 = vrot.lane.b32.xlu0 %v3701_v62, %s4101_s30 }
 0x7cb   :  { %v188_v11 = vadd.f32 %v4277_v4, %v186_v10 }
 0x7d2   :  { %164 = vperm.xlu0 %3656, %v156_v58  }
 0x83c   :  { %v864_v63 = vpop.permute.xlu0 %863 }
 0x83d   :  { %v866_v5 = vmul.f32 %v864_v63, %v847_v55 }
 0x83f   :  { %868 = vrot.lane.b32.xlu1 %v866_v5, %s4109_s5 }
 0x844   :  { %v165_v13 = vpop.permute.xlu0 %164 }
 0x845   :  { %v171_v6 = vmul.f32 %v4272_v3, %v165_v13 }
 0x847   :  { %193 = vrot.lane.b32.xlu1 %v188_v11, %s4101_s30  ;;  %v176_v17 = vadd.f32 %v4277_v4, %v171_v6 }
 0x8b1   :  { %v869_v14 = vpop.permute.xlu1 %868 }
 0x8b2   :  { %871 = vst.msk [vmem:[#allocation3 + $0x4] sm:$0x3] %vm738_vm15, %v869_v14  ;;  %3559 = vmatmul.msk.f32.vlgmr.msrb.gmra.mxu1 %vm197_vm0, %v869_v14 }
 0x8b9   :  { %v194_v7 = vpop.permute.xlu1 %193 }
 0x8ba   :  { %v4478_v18 = vsel %vm197_vm0, %v176_v17, %v194_v7 }
 0x8bb   :  { %v373_v8 = vand.u32 2139095040, %v4478_v18  ;;  %v370_v20 = vand.u32 2147483647, %v4478_v18 }
 0x8bd   :  { %v374_v12 = vshrl.u32 %v373_v8, 23  ;;  %v377_v25 = vand.u32 8388607, %v370_v20 }
 0x8bf   :  { %v3546_v19 = vadd.s32 4294967169, %v374_v12  ;;  %v378_v31 = vor.u32 8388608, %v377_v25 }
 0x8c1   :  { %v380_v22 = vadd.s32 1, %v3546_v19  ;;  %v4497_v40 = vshll.u32 %v378_v31, 8 }
 0x8c3   :  { %vm381_vm1 = vcmp.gt.s32.totalorder %v380_v22, 0  ;;  %v419_v58 = vand.u32 65535, %v4497_v40  ;;  %v420_v59 = vshrl.u32 %v4497_v40, 16 }
 0x8c4   :  { %v382_v27 = vsel %vm381_vm1, %v380_v22, 0 }
 0x8c5   :  { %v384_v28 = vand.u32 31, %v382_v27  ;;  %v4484_v4 = vshrl.u32 %v382_v27, 5 }
 0x8c7   :  { %v385_v3 = vsub.s32 32, %v384_v28  ;;  %v387_v34 = vshll.u32 %v4102_v24, %v384_v28  ;;  %v390_v36 = vshll.u32 %v4103_v26, %v384_v28  ;;  %v393_v42 = vshll.u32 %v4104_v29, %v384_v28 }
 0x8c8   :  { %v396_v44 = vshll.u32 %v4105_v32, %v384_v28  ;;  %v399_v46 = vshll.u32 %v4106_v35, %v384_v28  ;;  %vm402_vm2 = vcmp.lt.s32.totalorder %v4484_v4, 1  ;;  %vm405_vm4 = vcmp.lt.s32.totalorder %v4484_v4, 4 }
 0x8c9   :  { %v388_v37 = vshrl.u32 %v4103_v26, %v385_v3  ;;  %v391_v39 = vshrl.u32 %v4104_v29, %v385_v3  ;;  %v394_v43 = vshrl.u32 %v4105_v32, %v385_v3  ;;  %v397_v16 = vshrl.u32 %v4106_v35, %v385_v3 }
 0x8ca   :  { %v400_v21 = vshrl.u32 %v4107_v38, %v385_v3  ;;  %vm404_vm5 = vcmp.lt.s32.totalorder %v4484_v4, 3  ;;  %vm403_vm10 = vcmp.lt.s32.totalorder %v4484_v4, 2 }
 0x8cb   :  { %v389_v47 = vor.u32 %v388_v37, %v387_v34  ;;  %v392_v48 = vor.u32 %v391_v39, %v390_v36  ;;  %v395_v49 = vor.u32 %v394_v43, %v393_v42  ;;  %v398_v50 = vor.u32 %v397_v16, %v396_v44 }
 0x8cc   :  { %v401_v51 = vor.u32 %v400_v21, %v399_v46  ;;  %v386_v42 = vshrl.u32 %v4102_v24, %v385_v3 }
 0x8cd   :  { %v410_v41 = vsel %vm402_vm2, %v389_v47, %v392_v48  ;;  %v414_v52 = vsel %vm402_vm2, %v392_v48, %v395_v49  ;;  %v411_v53 = vsel %vm405_vm4, %v398_v50, 920167782  ;;  %v407_v36 = vsel %vm405_vm4, %v395_v49, 2102212464 }
 0x8ce   :  { %v415_v23 = vsel %vm405_vm4, %v401_v51, 1326507024  ;;  %v412_v45 = vsel %vm404_vm5, %v395_v49, %v411_v53  ;;  %v408_v51 = vsel %vm404_vm5, %v392_v48, %v407_v36 }
 0x8cf   :  { %v416_v54 = vsel %vm404_vm5, %v398_v50, %v415_v23  ;;  %v413_v55 = vsel %vm403_vm10, %v410_v41, %v412_v45  ;;  %v406_v50 = vsel %vm402_vm2, %v386_v42, %v389_v47 }
 0x8d0   :  { %v417_v57 = vsel %vm403_vm10, %v414_v52, %v416_v54  ;;  %v443_v63 = vand.u32 65535, %v413_v55  ;;  %v444_v2 = vshrl.u32 %v413_v55, 16  ;;  %v409_v3 = vsel %vm403_vm10, %v406_v50, %v408_v51 }
 0x8d1   :  { %v421_v60 = vand.u32 65535, %v417_v57  ;;  %v422_v62 = vshrl.u32 %v417_v57, 16  ;;  %v463_v57 = vmul.u32 %v4497_v40, %v409_v3  ;;  %vm372_vm10 = vcmp.lt.s32.totalorder %v4478_v18, 0 }
 0x8d2   :  { %v446_v11 = vmul.u32 %v444_v2, %v419_v58  ;;  %v447_v13 = vmul.u32 %v443_v63, %v420_v59  ;;  %v445_v7 = vmul.u32 %v443_v63, %v419_v58  ;;  %v448_v22 = vmul.u32 %v444_v2, %v420_v59 }
 0x8d3   :  { %v424_v5 = vmul.u32 %v422_v62, %v419_v58  ;;  %v425_v10 = vmul.u32 %v421_v60, %v420_v59  ;;  %v423_v14 = vmul.u32 %v421_v60, %v419_v58  ;;  %v426_v17 = vmul.u32 %v422_v62, %v420_v59 }
 0x8d4   :  { %v449_v8 = vshll.u32 %v446_v11, 16  ;;  %v451_v27 = vshll.u32 %v447_v13, 16  ;;  %v450_v46 = vshrl.u32 %v446_v11, 16  ;;  %v452_v52 = vshrl.u32 %v447_v13, 16 }
 0x8d5   :  { %v427_v6 = vshll.u32 %v424_v5, 16  ;;  %v429_v12 = vshll.u32 %v425_v10, 16  ;;  %v428_v43 = vshrl.u32 %v424_v5, 16  ;;  %v430_v41 = vshrl.u32 %v425_v10, 16 }
 0x8d6   :  { %vm453_vm13 = vc.u32 %v445_v7, %v449_v8  ;;  %v455_v28 = vadd.s32 %v449_v8, %v445_v7 }
 0x8d7   :  { %vm431_vm12 = vc.u32 %v423_v14, %v427_v6  ;;  %v433_v19 = vadd.s32 %v427_v6, %v423_v14  ;;  %v454_v34 = vsel %vm453_vm13, 1, %v4100_v1 }
 0x8d8   :  { %v432_v25 = vsel %vm431_vm12, 1, %v4100_v1  ;;  %v456_v39 = vadd.s32 %v454_v34, %v448_v22  ;;  %vm457_vm1 = vc.u32 %v455_v28, %v451_v27  ;;  %v459_v45 = vadd.s32 %v455_v28, %v451_v27 }
 0x8d9   :  { %v434_v31 = vadd.s32 %v432_v25, %v426_v17  ;;  %vm435_vm14 = vc.u32 %v433_v19, %v429_v12  ;;  %v458_v16 = vsel %vm457_vm1, 1, %v4100_v1  ;;  %vm371_vm12 = vcmp.le.f32.partialorder %v370_v20, 0.7853982 }
 0x8da   :  { %v436_v37 = vsel %vm435_vm14, 1, %v4100_v1  ;;  %v460_v21 = vadd.s32 %v458_v16, %v456_v39 }
 0x8db   :  { %v438_v44 = vadd.s32 %v436_v37, %v434_v31 }
 0x8dc   :  { %v461_v53 = vadd.s32 %v460_v21, %v450_v46 }
 0x8dd   :  { %v439_v49 = vadd.s32 %v438_v44, %v428_v43 }
 0x8de   :  { %v462_v54 = vadd.s32 %v461_v53, %v452_v52 }
 0x8df   :  { %v440_v23 = vadd.s32 %v439_v49, %v430_v41 }
 0x8e0   :  { %v466_v55 = vadd.s32 1, %v462_v54 }
 0x8e1   :  { %vm465_vm4 = vc.u32 %v440_v23, %v459_v45  ;;  %v464_v4 = vadd.s32 %v459_v45, %v440_v23 }
 0x8e2   :  { %v467_v58 = vsel %vm465_vm4, %v466_v55, %v462_v54  ;;  %vm513_vm4 = vweird.f32 %v4478_v18 }
 0x8e3   :  { %v468_v59 = vadd.s32 %v467_v58, %v463_v57 }
 0x8e5   :  { %v469_v47 = vadd.s32 536870912, %v468_v59 }
 0x8e7   :  { %v470_v60 = vshrl.u32 %v469_v47, 30 }
 0x8e9   :  { %v471_v62 = vshll.u32 %v470_v60, 30  ;;  %v494_v31 = vsub.s32 4, %v470_v60 }
 0x8eb   :  { %v472_v48 = vsub.s32 %v468_v59, %v471_v62  ;;  %v495_v42 = vsel %vm372_vm10, %v494_v31, %v470_v60  ;;  %v872_v60 = vld [vmem:[#allocation2 + $0x6] sm:$0x3] }
 0x8ec   :  { %v497_v16 = vsel %vm371_vm12, 0, %v495_v42 }
 0x8ed   :  { %vm473_vm2 = vcmp.lt.s32.totalorder %v472_v48, 0  ;;  %v474_v63 = vsub.s32 0, %v472_v48  ;;  %v514_v41 = vadd.s32 3, %v497_v16 }
 0x8ef   :  { %v475_v2 = vsel %vm473_vm2, %v474_v63, %v472_v48  ;;  %v515_v23 = vand.u32 3, %v514_v41 }
 0x8f0   :  { %v476_v5 = vclz %v475_v2  ;;  %v536_v2 = vld [vmem:[%s5179_s7 + $0x8] sm:$0xff]  ;;  %s5186_s7 = sld [smem:[#allocation21_spill]] }
 0x8f1   :  { %vm517_vm13 = vcmp.eq.s32.totalorder %v515_v23, 0  ;;  %vm520_vm14 = vcmp.eq.s32.totalorder %v515_v23, 2  ;;  %vm516_vm1 = vcmp.lt.s32.totalorder %v515_v23, 2 }
 0x8f2   :  { %v3547_v10 = vadd.s32 4294967294, %v476_v5 }
 0x8f4   :  { %vm3548_vm5 = vcmp.lt.s32.totalorder %v3547_v10, 0 }
 0x8f5   :  { %v479_v11 = vsel %vm3548_vm5, 0, %v3547_v10 }
 0x8f6   :  { %v480_v13 = vsub.s32 32, %v479_v11  ;;  %v484_v14 = vsub.s32 4294967266, %v479_v11  ;;  %v481_v6 = vshll.u32 %v472_v48, %v479_v11 }
 0x8f8   :  { %v482_v17 = vshrl.u32 %v464_v4, %v480_v13  ;;  %v485_v7 = vadd.s32 127, %v484_v14 }
 0x8fa   :  { %v483_v40 = vor.u32 %v482_v17, %v481_v6  ;;  %v486_v8 = vshll.u32 %v485_v7, 23 }
 0x8fc   :  { %v487_v12 = vor.u32 4788187, %v486_v8  ;;  %v490_v22 = vcvt.s32.f32 %v483_v40 }
 0x8fe   :  { %v488_v19 = vand.u32 2147483647, %v487_v12 }
 0x900   :  { %v491_v25 = vmul.f32 %v490_v22, %v488_v19 }
 0x902   :  { %v492_v27 = vxor.u32 2147483648, %v491_v25 }
 0x904   :  { %v493_v28 = vsel %vm372_vm10, %v492_v27, %v491_v25 }
 0x905   :  { %v496_v34 = vsel %vm371_vm12, %v4478_v18, %v493_v28 }
 0x906   :  { %v498_v36 = vmul.f32 %v496_v34, %v496_v34 }
 0x908   :  { %v499_v37 = vmul.f32 -0.001358992, %v498_v36  ;;  %v506_v39 = vmul.f32 -0.00019511016, %v498_v36 }
 0x90a   :  { %v500_v43 = vadd.f32 0.041655596, %v499_v37  ;;  %v507_v44 = vadd.f32 0.008332121, %v506_v39 }
 0x90c   :  { %v501_v46 = vmul.f32 %v500_v43, %v498_v36  ;;  %v508_v21 = vmul.f32 %v507_v44, %v498_v36 }
 0x90e   :  { %v502_v50 = vadd.f32 -0.4999988, %v501_v46  ;;  %v509_v51 = vadd.f32 -0.16666654, %v508_v21 }
 0x910   :  { %v503_v49 = vmul.f32 %v502_v50, %v498_v36  ;;  %v510_v52 = vmul.f32 %v509_v51, %v498_v36 }
 0x912   :  { %v504_v53 = vadd.f32 1.0, %v503_v49  ;;  %v511_v20 = vadd.f32 1.0, %v510_v52 }
 0x914   :  { %v512_v45 = vmul.f32 %v511_v20, %v496_v34  ;;  %v521_v3 = vxor.u32 2147483648, %v504_v53 }
 0x916   :  { %v518_v54 = vxor.u32 2147483648, %v512_v45  ;;  %v522_v57 = vsel %vm520_vm14, %v521_v3, %v512_v45 }
 0x918   :  { %v519_v55 = vsel %vm517_vm13, %v504_v53, %v518_v54 }
 0x919   :  { %v523_v58 = vsel %vm516_vm1, %v519_v55, %v522_v57 }
 0x91a   :  { %v524_v59 = vsel %vm513_vm4, nan, %v523_v58 }
 0x91b   :  { %v526_v47 = vsel %vm4375_vm3, %v524_v59, %v4478_v18 }
 0x91c   :  { %3550 = vmatmul.msk.f32.gmra.mxu0 %vm553_vm6, %v526_v47 }
 0x92f   :  { %v892_v62 = vpop.f32.mrf.mxu1 }
 0x930   :  { %v895_v48 = vadd.f32 %v892_v62, %v872_v60 }
 0x932   :  { %3702 = vtanh.f32 %v895_v48  ;;  %v3560_v5 = vmul.f32 -1.442695, %v895_v48 }
 0x934   :  { %3704 = vpow2.f32 %v3560_v5 }
 0x938   :  { %v3703_v63 = vpop.eup %3702 }
 0x939   :  { %918 = vrot.lane.b32.xlu2 %v3703_v63, %s4101_s30 }
 0x93a   :  { %v3705_v10 = vpop.eup %3704 }
 0x93b   :  { %v899_v18 = vadd.f32 1.0, %v3705_v10 }
 0x93d   :  { %3706 = vrcp.f32 %v899_v18  ;;  %v911_v17 = vand.u32 2147483648, %v899_v18  ;;  %vm905_vm5 = vweird.f32 %v899_v18  ;;  %v909_v7 = vand.u32 2147483647, %v899_v18 }
 0x93f   :  { %v912_v8 = vor.u32 1.1754944e-38, %v911_v17  ;;  %vm910_vm12 = vcmp.eq.f32.partialorder %v909_v7, 8.507059e+37 }
 0x941   :  { %545 = vperm.xlu2 %3659, %v536_v2  }
 0x943   :  { %v3707_v11 = vpop.eup %3706 }
 0x944   :  { %v901_v4 = vmul.f32 %v3707_v11, %v899_v18  ;;  %vm906_vm2 = vweird.f32 %v3707_v11 }
 0x945   :  { %vm907_vm10 = vmor %vm905_vm5, %vm906_vm2 }
 0x946   :  { %v902_v13 = vsub.f32 1.0, %v901_v4 }
 0x948   :  { %v903_v14 = vmul.f32 %v3707_v11, %v902_v13 }
 0x949   :  { %3660 = vset.pattern.permute.xlu2 %v4099_v0 }
 0x94a   :  { %v904_v6 = vadd.f32 %v3707_v11, %v903_v14 }
 0x94c   :  { %v908_v40 = vsel %vm907_vm10, %v3707_v11, %v904_v6 }
 0x94d   :  { %v913_v0 = vsel %vm910_vm12, %v912_v8, %v908_v40 }
 0x94e   :  { %v916_v34 = vmul.f32 %v913_v0, %v4465_v61 }
 0x993   :  { %v919_v12 = vpop.permute.xlu2 %918 }
 0x994   :  { %v921_v19 = vmul.f32 %v919_v12, %v913_v0 }
 0x996   :  { %923 = vrot.lane.b32.xlu0 %v921_v19, %s4101_s30 }
 0x999   :  { %v580_v27 = vpop.f32.mrf.mxu0 }
 0x99b   :  { %v546_v22 = vpop.permute.xlu2 %545 }
 0x99c   :  { %v552_v25 = vmul.f32 %v4421_v15, %v546_v22 }
 0x99e   :  { %v581_v28 = vadd.f32 %v580_v27, %v552_v25 }
 0x9a0   :  { %v628_v31 = vadd.f32 %v4429_v30, %v581_v28 }
 0x9a2   :  { %3553 = vmatmul.msk.f32.gmra.mxu2 %vm197_vm0, %v628_v31 }
 0xa08   :  { %v924_v36 = vpop.permute.xlu0 %923 }
 0xa09   :  { %v926_v37 = vadd.f32 %v924_v36, %v916_v34 }
 0xa0b   :  { %3708 = vtanh.f32 %v926_v37 }
 0xa11   :  { %v3709_v39 = vpop.eup %3708 }
 0xa12   :  { %929 = vrot.lane.b32.xlu1 %v3709_v39, %s4101_s30 }
 0xa25   :  { %v667_v42 = vpop.f32.mrf.mxu2 }
 0xa26   :  { %v668_v43 = vadd.f32 %v4440_v33, %v667_v42 }
 0xa28   :  { %671 = vst [vmem:[#allocation2 + $0x8] sm:$0xff] %v668_v43 }
 0xa2f   :  { %v938_v30 = vld [vmem:[#allocation2 + $0x8] sm:$0x3]  ;;  %v1004_v5 = vld [vmem:[#allocation2 + $0xa] sm:$0x3] }
 0xa84   :  { %v930_v44 = vpop.permute.xlu1 %929 }
 0xa85   :  { %v932_v15 = vmul.f32 %v930_v44, %v913_v0  ;;  %v1070_v44 = vld [vmem:[#allocation2 + $0xc] sm:$0x3] }
 0xa87   :  { %934 = vrot.lane.b32.xlu0 %v932_v15, %s4109_s5 }
 0xaf9   :  { %v935_v16 = vpop.permute.xlu0 %934 }
 0xafa   :  { %937 = vst.msk [vmem:[#allocation3 + $0x6] sm:$0x3] %vm738_vm15, %v935_v16  ;;  %3561 = vmatmul.msk.f32.vlgmr.msrb.gmra.mxu2 %vm197_vm0, %v935_v16 }
 0xb7d   :  { %v958_v61 = vpop.f32.mrf.mxu2 }
 0xb7e   :  { %v961_v46 = vadd.f32 %v958_v61, %v938_v30 }
 0xb80   :  { %3710 = vtanh.f32 %v961_v46  ;;  %v3562_v50 = vmul.f32 -1.442695, %v961_v46 }
 0xb82   :  { %3712 = vpow2.f32 %v3562_v50 }
 0xb86   :  { %v3711_v21 = vpop.eup %3710 }
 0xb87   :  { %984 = vrot.lane.b32.xlu1 %v3711_v21, %s4101_s30 }
 0xb88   :  { %v3713_v33 = vpop.eup %3712 }
 0xb89   :  { %v965_v51 = vadd.f32 1.0, %v3713_v33 }
 0xb8b   :  { %3714 = vrcp.f32 %v965_v51  ;;  %v977_v23 = vand.u32 2147483648, %v965_v51  ;;  %vm971_vm14 = vweird.f32 %v965_v51  ;;  %v975_v45 = vand.u32 2147483647, %v965_v51 }
 0xb8d   :  { %v978_v54 = vor.u32 1.1754944e-38, %v977_v23  ;;  %vm976_vm4 = vcmp.eq.f32.partialorder %v975_v45, 8.507059e+37 }
 0xb91   :  { %v3715_v41 = vpop.eup %3714 }
 0xb92   :  { %v967_v49 = vmul.f32 %v3715_v41, %v965_v51  ;;  %vm972_vm13 = vweird.f32 %v3715_v41 }
 0xb93   :  { %vm973_vm1 = vmor %vm971_vm14, %vm972_vm13 }
 0xb94   :  { %v968_v52 = vsub.f32 1.0, %v967_v49 }
 0xb96   :  { %v969_v53 = vmul.f32 %v3715_v41, %v968_v52 }
 0xb98   :  { %v970_v20 = vadd.f32 %v3715_v41, %v969_v53 }
 0xb9a   :  { %v974_v3 = vsel %vm973_vm1, %v3715_v41, %v970_v20 }
 0xb9b   :  { %v979_v57 = vsel %vm976_vm4, %v978_v54, %v974_v3 }
 0xb9c   :  { %v982_v59 = vmul.f32 %v979_v57, %v926_v37 }
 0xbf9   :  { %v985_v55 = vpop.permute.xlu1 %984 }
 0xbfa   :  { %v987_v58 = vmul.f32 %v985_v55, %v979_v57 }
 0xbfc   :  { %989 = vrot.lane.b32.xlu2 %v987_v58, %s4101_s30 }
 0xc56   :  { %v990_v47 = vpop.permute.xlu2 %989 }
 0xc57   :  { %v992_v60 = vadd.f32 %v990_v47, %v982_v59 }
 0xc59   :  { %3716 = vtanh.f32 %v992_v60 }
 0xc5f   :  { %v3717_v62 = vpop.eup %3716 }
 0xc60   :  { %995 = vrot.lane.b32.xlu0 %v3717_v62, %s4101_s30  ;;  %v1207_v62 = vld [vmem:[#allocation10 + $0x18] sm:$0xff] }
 0xc61   :  { %1234 = vmatpush.msrb.mxu2 %v1207_v62 }
 0xcd2   :  { %v996_v48 = vpop.permute.xlu0 %995 }
 0xcd3   :  { %v998_v63 = vmul.f32 %v996_v48, %v979_v57  ;;  %v1206_v48 = vld [vmem:[#allocation10 + $0x10] sm:$0xff] }
 0xcd4   :  { %1235 = vmatpush.msrb.mxu2 %v1206_v48 }
 0xcd5   :  { %1000 = vrot.lane.b32.xlu1 %v998_v63, %s4109_s5  ;;  %v1205_v63 = vld [vmem:[#allocation10 + $0x8] sm:$0xff] }
 0xcd6   :  { %1236 = vmatpush.msrb.mxu2 %v1205_v63 }
 0xd47   :  { %v1001_v2 = vpop.permute.xlu1 %1000 }
 0xd48   :  { %1003 = vst.msk [vmem:[#allocation3 + $0x8] sm:$0x3] %vm738_vm15, %v1001_v2  ;;  %3563 = vmatmul.msk.f32.vlgmr.msrb.gmra.mxu3 %vm197_vm0, %v1001_v2  ;;  %v1204_v2 = vld [vmem:[#allocation10] sm:$0xff] }
 0xd49   :  { %1237 = vmatpush.msrb.mxu2 %v1204_v2 }
 0xdcb   :  { %v1024_v10 = vpop.f32.mrf.mxu3 }
 0xdcc   :  { %v1027_v18 = vadd.f32 %v1024_v10, %v1004_v5  ;;  %v1211_v5 = vld [vmem:[#allocation12 + $0x18] sm:$0xff]  ;;  %v1210_v10 = vld [vmem:[#allocation12 + $0x10] sm:$0xff] }
 0xdcd   :  { %1260 = vmatpush.msra.mxu3 %v1211_v5  ;;  %1324 = vmatpush.msrb.mxu1 %v1211_v5 }
 0xdce   :  { %3718 = vtanh.f32 %v1027_v18  ;;  %v3564_v4 = vmul.f32 -1.442695, %v1027_v18  ;;  %v1209_v18 = vld [vmem:[#allocation12 + $0x8] sm:$0xff]  ;;  %1388 = vmatpush.msrb.mxu0 %v1211_v5 }
 0xdcf   :  { %1261 = vmatpush.msra.mxu3 %v1210_v10  ;;  %1325 = vmatpush.msrb.mxu1 %v1210_v10 }
 0xdd0   :  { %3720 = vpow2.f32 %v3564_v4  ;;  %1389 = vmatpush.msrb.mxu0 %v1210_v10 }
 0xdd1   :  { %1262 = vmatpush.msra.mxu3 %v1209_v18  ;;  %1326 = vmatpush.msrb.mxu1 %v1209_v18 }
 0xdd2   :  { %1390 = vmatpush.msrb.mxu0 %v1209_v18 }
 0xdd4   :  { %v3719_v11 = vpop.eup %3718 }
 0xdd5   :  { %1050 = vrot.lane.b32.xlu2 %v3719_v11, %s4101_s30  ;;  %v1208_v11 = vld [vmem:[#allocation12] sm:$0xff] }
 0xdd6   :  { %v3721_v13 = vpop.eup %3720  ;;  %1263 = vmatpush.msra.mxu3 %v1208_v11  ;;  %1327 = vmatpush.msrb.mxu1 %v1208_v11 }
 0xdd7   :  { %v1031_v14 = vadd.f32 1.0, %v3721_v13  ;;  %1264 = vmatmul.f32.vlgmr.msra.gmra.mxu3 %v4108_v9  ;;  %1391 = vmatpush.msrb.mxu0 %v1208_v11  ;;  %v1202_v9 = vld [vmem:[#allocation3] sm:$0xff] }
 0xdd8   :  { %1452 = vmatpush.msrb.mxu3 %v1211_v5 }
 0xdd9   :  { %3722 = vrcp.f32 %v1031_v14  ;;  %v1043_v12 = vand.u32 2147483648, %v1031_v14  ;;  %vm1037_vm5 = vweird.f32 %v1031_v14  ;;  %v1041_v0 = vand.u32 2147483647, %v1031_v14  ;;  %1580 = vmatpush.msra.mxu0 %v1211_v5 }
 0xdda   :  { %1453 = vmatpush.msrb.mxu3 %v1210_v10 }
 0xddb   :  { %v1044_v22 = vor.u32 1.1754944e-38, %v1043_v12  ;;  %vm1042_vm12 = vcmp.eq.f32.partialorder %v1041_v0, 8.507059e+37  ;;  %1581 = vmatpush.msra.mxu0 %v1210_v10 }
 0xddc   :  { %1454 = vmatpush.msrb.mxu3 %v1209_v18 }
 0xddd   :  { %1582 = vmatpush.msra.mxu0 %v1209_v18 }
 0xdde   :  { %1455 = vmatpush.msrb.mxu3 %v1208_v11 }
 0xddf   :  { %v3723_v6 = vpop.eup %3722  ;;  %1583 = vmatpush.msra.mxu0 %v1208_v11 }
 0xde0   :  { %v1033_v17 = vmul.f32 %v3723_v6, %v1031_v14  ;;  %vm1038_vm2 = vweird.f32 %v3723_v6  ;;  %1708 = vmatpush.msra.mxu3 %v1211_v5  ;;  %v4586_v14 = vld [vmem:[%s5151_s16] ss:$0 sm:$0xff] }
 0xde1   :  { %vm1039_vm10 = vmor %vm1037_vm5, %vm1038_vm2 }
 0xde2   :  { %v1034_v7 = vsub.f32 1.0, %v1033_v17  ;;  %1709 = vmatpush.msra.mxu3 %v1210_v10 }
 0xde4   :  { %v1035_v40 = vmul.f32 %v3723_v6, %v1034_v7  ;;  %1710 = vmatpush.msra.mxu3 %v1209_v18 }
 0xde6   :  { %v1036_v8 = vadd.f32 %v3723_v6, %v1035_v40  ;;  %1711 = vmatpush.msra.mxu3 %v1208_v11 }
 0xde8   :  { %v1040_v19 = vsel %vm1039_vm10, %v3723_v6, %v1036_v8 }
 0xde9   :  { %v1045_v27 = vsel %vm1042_vm12, %v1044_v22, %v1040_v19 }
 0xdea   :  { %v1048_v31 = vmul.f32 %v1045_v27, %v992_v60 }
 0xe2f   :  { %v1051_v25 = vpop.permute.xlu2 %1050 }
 0xe30   :  { %v1053_v28 = vmul.f32 %v1051_v25, %v1045_v27 }
 0xe32   :  { %1055 = vrot.lane.b32.xlu0 %v1053_v28, %s4101_s30 }
 0xe5a   :  { %v1265_v7 = vpop.f32.mrf.mxu3 }
 0xea4   :  { %v1056_v34 = vpop.permute.xlu0 %1055 }
 0xea5   :  { %v1058_v36 = vadd.f32 %v1056_v34, %v1048_v31 }
 0xea7   :  { %3724 = vtanh.f32 %v1058_v36 }
 0xead   :  { %v3725_v37 = vpop.eup %3724 }
 0xeae   :  { %1061 = vrot.lane.b32.xlu1 %v3725_v37, %s4101_s30 }
 0xf20   :  { %v1062_v39 = vpop.permute.xlu1 %1061 }
 0xf21   :  { %v1064_v42 = vmul.f32 %v1062_v39, %v1045_v27 }
 0xf23   :  { %1066 = vrot.lane.b32.xlu2 %v1064_v42, %s4109_s5 }
 0xf7d   :  { %v1067_v43 = vpop.permute.xlu2 %1066 }
 0xf7e   :  { %1069 = vst.msk [vmem:[#allocation3 + $0xa] sm:$0x3] %vm738_vm15, %v1067_v43  ;;  %3565 = vmatmul.msk.f32.vlgmr.msra.gmra.mxu1 %vm197_vm0, %v1067_v43 }
 0xf7f   :  { %1516 = vmatpush.msra.mxu1 %v1211_v5 }
 0xf81   :  { %1517 = vmatpush.msra.mxu1 %v1210_v10 }
 0xf83   :  { %1518 = vmatpush.msra.mxu1 %v1209_v18 }
 0xf85   :  { %1519 = vmatpush.msra.mxu1 %v1208_v11 }
 0xffb   :  { %v1090_v15 = vpop.f32.mrf.mxu1 }
 0xffc   :  { %v1093_v16 = vadd.f32 %v1090_v15, %v1070_v44 }
 0xffe   :  { %3726 = vtanh.f32 %v1093_v16  ;;  %v3566_v61 = vmul.f32 -1.442695, %v1093_v16 }
0x1000   :  { %3728 = vpow2.f32 %v3566_v61 }
0x1004   :  { %v3727_v30 = vpop.eup %3726 }
0x1005   :  { %1116 = vrot.lane.b32.xlu0 %v3727_v30, %s4101_s30 }
0x1006   :  { %v3729_v46 = vpop.eup %3728 }
0x1007   :  { %v1097_v21 = vadd.f32 1.0, %v3729_v46 }
0x1009   :  { %3730 = vrcp.f32 %v1097_v21  ;;  %v1109_v52 = vand.u32 2147483648, %v1097_v21  ;;  %vm1103_vm14 = vweird.f32 %v1097_v21  ;;  %v1107_v53 = vand.u32 2147483647, %v1097_v21 }
0x100b   :  { %v1110_v23 = vor.u32 1.1754944e-38, %v1109_v52  ;;  %vm1108_vm4 = vcmp.eq.f32.partialorder %v1107_v53, 8.507059e+37 }
0x100f   :  { %v3731_v50 = vpop.eup %3730 }
0x1010   :  { %v1099_v33 = vmul.f32 %v3731_v50, %v1097_v21  ;;  %vm1104_vm13 = vweird.f32 %v3731_v50 }
0x1011   :  { %vm1105_vm1 = vmor %vm1103_vm14, %vm1104_vm13 }
0x1012   :  { %v1100_v51 = vsub.f32 1.0, %v1099_v33 }
0x1014   :  { %v1101_v41 = vmul.f32 %v3731_v50, %v1100_v51 }
0x1016   :  { %v1102_v49 = vadd.f32 %v3731_v50, %v1101_v41 }
0x1018   :  { %v1106_v20 = vsel %vm1105_vm1, %v3731_v50, %v1102_v49 }
0x1019   :  { %v1111_v3 = vsel %vm1108_vm4, %v1110_v23, %v1106_v20 }
0x101a   :  { %v1114_v55 = vmul.f32 %v1111_v3, %v1058_v36 }
0x1077   :  { %v1117_v45 = vpop.permute.xlu0 %1116 }
0x1078   :  { %v1119_v54 = vmul.f32 %v1117_v45, %v1111_v3 }
0x107a   :  { %1121 = vrot.lane.b32.xlu1 %v1119_v54, %s4101_s30 }
0x10ec   :  { %v1122_v57 = vpop.permute.xlu1 %1121 }
0x10ed   :  { %v4572_v58 = vadd.f32 %v1122_v57, %v1114_v55 }
0x10ef   :  { %3732 = vtanh.f32 %v4572_v58 }
0x10f5   :  { %v3733_v59 = vpop.eup %3732 }
0x10f6   :  { %1127 = vrot.lane.b32.xlu2 %v3733_v59, %s4101_s30 }
0x1150   :  { %v1128_v47 = vpop.permute.xlu2 %1127 }
0x1151   :  { %v1130_v60 = vmul.f32 %v1128_v47, %v1111_v3 }
0x1153   :  { %1132 = vrot.lane.b32.xlu0 %v1130_v60, %s4109_s5 }
0x11c5   :  { %v1133_v4 = vpop.permute.xlu0 %1132 }
0x11c6   :  { %1135 = vst.msk [vmem:[#allocation3 + $0xc] sm:$0x3] %vm738_vm15, %v1133_v4  ;;  %3567 = vmatmul.msk.f32.vlgmr.msra.gmra.mxu2 %vm197_vm0, %v1133_v4 }
0x11c7   :  { %1644 = vmatpush.msra.mxu2 %v1211_v5 }
0x11c9   :  { %1645 = vmatpush.msra.mxu2 %v1210_v10 }
0x11cb   :  { %1646 = vmatpush.msra.mxu2 %v1209_v18 }
0x11cd   :  { %1647 = vmatpush.msra.mxu2 %v1208_v11 }
0x11ce   :  { %3569 = vmatmul.msk.f32.vlgmr.msrb.gmra.mxu2 %vm197_vm0, %v1202_v9 }
0x1249   :  { %v4581_v13 = vpop.f32.mrf.mxu2 }
0x1251   :  { %v1239_v6 = vpop.f32.mrf.mxu2 }
0x1252   :  { %v1240_v17 = vadd.f32 %v4586_v14, %v1239_v6 }
0x1254   :  { %1245 = vst [vmem:[#allocation2] sm:$0xff] %v1240_v17 }
0x125b   :  { %v1247_v40 = vld [vmem:[#allocation2] sm:$0x3]  ;;  %v1306_v51 = vld [vmem:[#allocation2 + $0x2] sm:$0x3]  ;;  %v1370_v17 = vld [vmem:[#allocation2 + $0x4] sm:$0x3] }
0x125c   :  { %v1268_v8 = vadd.f32 %v1265_v7, %v1247_v40 }
0x125e   :  { %3734 = vtanh.f32 %v1268_v8  ;;  %v3571_v0 = vmul.f32 -1.442695, %v1268_v8 }
0x1260   :  { %3736 = vpow2.f32 %v3571_v0 }
0x1264   :  { %v3735_v12 = vpop.eup %3734 }
0x1265   :  { %1291 = vrot.lane.b32.xlu1 %v3735_v12, %s4101_s30 }
0x1266   :  { %v3737_v19 = vpop.eup %3736 }
0x1267   :  { %v1272_v22 = vadd.f32 1.0, %v3737_v19 }
0x1269   :  { %3738 = vrcp.f32 %v1272_v22  ;;  %v1284_v36 = vand.u32 2147483648, %v1272_v22  ;;  %vm1278_vm5 = vweird.f32 %v1272_v22  ;;  %v1282_v37 = vand.u32 2147483647, %v1272_v22 }
0x126b   :  { %v1285_v42 = vor.u32 1.1754944e-38, %v1284_v36  ;;  %vm1283_vm12 = vcmp.eq.f32.partialorder %v1282_v37, 8.507059e+37 }
0x126f   :  { %v3739_v25 = vpop.eup %3738 }
0x1270   :  { %v1274_v27 = vmul.f32 %v3739_v25, %v1272_v22  ;;  %vm1279_vm2 = vweird.f32 %v3739_v25 }
0x1271   :  { %vm1280_vm10 = vmor %vm1278_vm5, %vm1279_vm2 }
0x1272   :  { %v1275_v28 = vsub.f32 1.0, %v1274_v27 }
0x1274   :  { %v1276_v31 = vmul.f32 %v3739_v25, %v1275_v28 }
0x1276   :  { %v1277_v34 = vadd.f32 %v3739_v25, %v1276_v31 }
0x1278   :  { %v1281_v39 = vsel %vm1280_vm10, %v3739_v25, %v1277_v34 }
0x1279   :  { %v1286_v44 = vsel %vm1283_vm12, %v1285_v42, %v1281_v39  ;;  %v1136_v42 = vld [vmem:[#allocation2 + $0xe] sm:$0x3] }
0x127a   :  { %v1289_v16 = vmul.f32 0.0, %v1286_v44 }
0x12d7   :  { %v1292_v43 = vpop.permute.xlu1 %1291 }
0x12d8   :  { %v1294_v15 = vmul.f32 %v1292_v43, %v1286_v44  ;;  %v1159_v43 = vadd.f32 %v4581_v13, %v1136_v42 }
0x12da   :  { %1296 = vrot.lane.b32.xlu2 %v1294_v15, %s4101_s30 }
0x1334   :  { %v1297_v30 = vpop.permute.xlu2 %1296 }
0x1335   :  { %v1299_v61 = vadd.f32 %v1297_v30, %v1289_v16 }
0x1337   :  { %3740 = vtanh.f32 %v1299_v61 }
0x133d   :  { %v3741_v46 = vpop.eup %3740 }
0x133e   :  { %1302 = vrot.lane.b32.xlu0 %v3741_v46, %s4101_s30 }
0x13b0   :  { %v1303_v21 = vpop.permute.xlu0 %1302 }
0x13b1   :  { %v1305_v50 = vmul.f32 %v1303_v21, %v1286_v44 }
0x13b3   :  { %1308 = vrot.lane.b32.xlu1 %v1305_v50, %s4109_s5 }
0x1425   :  { %v1309_v33 = vpop.permute.xlu1 %1308 }
0x1426   :  { %3572 = vmatmul.msk.f32.vlgmr.msrb.gmra.mxu1 %vm197_vm0, %v1309_v33  ;;  %v3568_v33 = vmul.f32 -1.442695, %v1159_v43 }
0x14a3   :  { %v1329_v41 = vpop.f32.mrf.mxu1 }
0x14a4   :  { %v1332_v49 = vadd.f32 %v1329_v41, %v1306_v51 }
0x14a6   :  { %3742 = vtanh.f32 %v1332_v49  ;;  %v3573_v53 = vmul.f32 -1.442695, %v1332_v49 }
0x14a8   :  { %3744 = vpow2.f32 %v3573_v53 }
0x14ac   :  { %v3743_v52 = vpop.eup %3742 }
0x14ad   :  { %1355 = vrot.lane.b32.xlu2 %v3743_v52, %s4101_s30 }
0x14ae   :  { %v3745_v20 = vpop.eup %3744 }
0x14af   :  { %v1336_v23 = vadd.f32 1.0, %v3745_v20 }
0x14b1   :  { %3746 = vrcp.f32 %v1336_v23  ;;  %v1348_v59 = vand.u32 2147483648, %v1336_v23  ;;  %vm1342_vm14 = vweird.f32 %v1336_v23  ;;  %v1346_v47 = vand.u32 2147483647, %v1336_v23 }
0x14b3   :  { %v1349_v62 = vor.u32 1.1754944e-38, %v1348_v59  ;;  %vm1347_vm4 = vcmp.eq.f32.partialorder %v1346_v47, 8.507059e+37 }
0x14b7   :  { %v3747_v45 = vpop.eup %3746 }
0x14b8   :  { %v1338_v3 = vmul.f32 %v3747_v45, %v1336_v23  ;;  %vm1343_vm13 = vweird.f32 %v3747_v45 }
0x14b9   :  { %vm1344_vm1 = vmor %vm1342_vm14, %vm1343_vm13 }
0x14ba   :  { %v1339_v54 = vsub.f32 1.0, %v1338_v3 }
0x14bc   :  { %v1340_v55 = vmul.f32 %v3747_v45, %v1339_v54 }
0x14be   :  { %v1341_v57 = vadd.f32 %v3747_v45, %v1340_v55 }
0x14c0   :  { %v1345_v60 = vsel %vm1344_vm1, %v3747_v45, %v1341_v57 }
0x14c1   :  { %v1350_v63 = vsel %vm1347_vm4, %v1349_v62, %v1345_v60 }
0x14c2   :  { %v1353_v5 = vmul.f32 %v1350_v63, %v1299_v61 }
0x1507   :  { %v1356_v48 = vpop.permute.xlu2 %1355 }
0x1508   :  { %v1358_v2 = vmul.f32 %v1356_v48, %v1350_v63  ;;  %v1434_v48 = vld [vmem:[#allocation2 + $0x6] sm:$0x3] }
0x150a   :  { %1360 = vrot.lane.b32.xlu0 %v1358_v2, %s4101_s30 }
0x157c   :  { %v1361_v10 = vpop.permute.xlu0 %1360 }
0x157d   :  { %v1363_v18 = vadd.f32 %v1361_v10, %v1353_v5 }
0x157f   :  { %3748 = vtanh.f32 %v1363_v18 }
0x1585   :  { %v3749_v11 = vpop.eup %3748 }
0x1586   :  { %1366 = vrot.lane.b32.xlu1 %v3749_v11, %s4101_s30 }
0x15f8   :  { %v1367_v4 = vpop.permute.xlu1 %1366 }
0x15f9   :  { %v1369_v9 = vmul.f32 %v1367_v4, %v1350_v63 }
0x15fb   :  { %1372 = vrot.lane.b32.xlu2 %v1369_v9, %s4109_s5 }
0x1655   :  { %v1373_v6 = vpop.permute.xlu2 %1372 }
0x1656   :  { %3574 = vmatmul.msk.f32.vlgmr.msrb.gmra.mxu0 %vm197_vm0, %v1373_v6 }
0x16d3   :  { %v1393_v7 = vpop.f32.mrf.mxu0 }
0x16d4   :  { %v1396_v40 = vadd.f32 %v1393_v7, %v1370_v17 }
0x16d6   :  { %3750 = vtanh.f32 %v1396_v40  ;;  %v3575_v12 = vmul.f32 -1.442695, %v1396_v40 }
0x16d8   :  { %3752 = vpow2.f32 %v3575_v12 }
0x16dc   :  { %v3751_v8 = vpop.eup %3750 }
0x16dd   :  { %1419 = vrot.lane.b32.xlu0 %v3751_v8, %s4101_s30 }
0x16de   :  { %v3753_v0 = vpop.eup %3752 }
0x16df   :  { %v1400_v19 = vadd.f32 1.0, %v3753_v0 }
0x16e1   :  { %3754 = vrcp.f32 %v1400_v19  ;;  %v1412_v34 = vand.u32 2147483648, %v1400_v19  ;;  %vm1406_vm5 = vweird.f32 %v1400_v19  ;;  %v1410_v36 = vand.u32 2147483647, %v1400_v19 }
0x16e2   :  { %3756 = vtanh.f32 %v1159_v43 }
0x16e3   :  { %v1413_v39 = vor.u32 1.1754944e-38, %v1412_v34  ;;  %vm1411_vm12 = vcmp.eq.f32.partialorder %v1410_v36, 8.507059e+37 }
0x16e7   :  { %v3755_v22 = vpop.eup %3754 }
0x16e8   :  { %v1402_v25 = vmul.f32 %v3755_v22, %v1400_v19  ;;  %vm1407_vm2 = vweird.f32 %v3755_v22  ;;  %v3757_v30 = vpop.eup %3756 }
0x16e9   :  { %vm1408_vm10 = vmor %vm1406_vm5, %vm1407_vm2 }
0x16ea   :  { %v1403_v27 = vsub.f32 1.0, %v1402_v25 }
0x16ec   :  { %v1404_v28 = vmul.f32 %v3755_v22, %v1403_v27 }
0x16ee   :  { %v1405_v31 = vadd.f32 %v3755_v22, %v1404_v28 }
0x16f0   :  { %v1409_v37 = vsel %vm1408_vm10, %v3755_v22, %v1405_v31 }
0x16f1   :  { %v1414_v15 = vsel %vm1411_vm12, %v1413_v39, %v1409_v37 }
0x16f2   :  { %v1417_v61 = vmul.f32 %v1414_v15, %v1363_v18 }
0x174f   :  { %v1420_v44 = vpop.permute.xlu0 %1419 }
0x1750   :  { %v1422_v16 = vmul.f32 %v1420_v44, %v1414_v15 }
0x1752   :  { %1424 = vrot.lane.b32.xlu1 %v1422_v16, %s4101_s30 }
0x175a   :  { %1182 = vrot.lane.b32.xlu1 %v3757_v30, %s4101_s30 }
0x17c4   :  { %v1425_v46 = vpop.permute.xlu1 %1424 }
0x17c5   :  { %v4603_v21 = vadd.f32 %v1425_v46, %v1417_v61 }
0x17c7   :  { %3758 = vtanh.f32 %v4603_v21 }
0x17c8   :  { %3760 = vpow2.f32 %v3568_v33 }
0x17cc   :  { %v1183_v59 = vpop.permute.xlu1 %1182 }
0x17cd   :  { %v3759_v50 = vpop.eup %3758 }
0x17ce   :  { %1430 = vrot.lane.b32.xlu2 %v3759_v50, %s4101_s30  ;;  %v3761_v13 = vpop.eup %3760 }
0x17cf   :  { %v1163_v51 = vadd.f32 1.0, %v3761_v13 }
0x17d1   :  { %3762 = vrcp.f32 %v1163_v51  ;;  %v1175_v3 = vand.u32 2147483648, %v1163_v51  ;;  %vm1169_vm14 = vweird.f32 %v1163_v51  ;;  %v1173_v54 = vand.u32 2147483647, %v1163_v51 }
0x17d3   :  { %v1176_v57 = vor.u32 1.1754944e-38, %v1175_v3  ;;  %vm1174_vm4 = vcmp.eq.f32.partialorder %v1173_v54, 8.507059e+37 }
0x17d7   :  { %v3763_v41 = vpop.eup %3762 }
0x17d8   :  { %v1165_v49 = vmul.f32 %v3763_v41, %v1163_v51  ;;  %vm1170_vm13 = vweird.f32 %v3763_v41 }
0x17d9   :  { %vm1171_vm1 = vmor %vm1169_vm14, %vm1170_vm13 }
0x17da   :  { %v1166_v52 = vsub.f32 1.0, %v1165_v49 }
0x17dc   :  { %v1167_v53 = vmul.f32 %v3763_v41, %v1166_v52 }
0x17de   :  { %v1168_v23 = vadd.f32 %v3763_v41, %v1167_v53 }
0x17e0   :  { %v1172_v55 = vsel %vm1171_vm1, %v3763_v41, %v1168_v23 }
0x17e1   :  { %v1177_v47 = vsel %vm1174_vm4, %v1176_v57, %v1172_v55 }
0x17e2   :  { %v1185_v60 = vmul.f32 %v1183_v59, %v1177_v47  ;;  %v1180_v10 = vmul.f32 %v1177_v47, %v4572_v58 }
0x1828   :  { %v1431_v20 = vpop.permute.xlu2 %1430 }
0x1829   :  { %v1433_v45 = vmul.f32 %v1431_v20, %v1414_v15 }
0x182b   :  { %1436 = vrot.lane.b32.xlu0 %v1433_v45, %s4109_s5 }
0x1833   :  { %1187 = vrot.lane.b32.xlu0 %v1185_v60, %s4101_s30 }
0x189d   :  { %v1437_v62 = vpop.permute.xlu0 %1436 }
0x189e   :  { %3576 = vmatmul.msk.f32.vlgmr.msrb.gmra.mxu3 %vm197_vm0, %v1437_v62 }
0x18a5   :  { %v1188_v5 = vpop.permute.xlu0 %1187 }
0x18a6   :  { %v4611_v18 = vadd.f32 %v1188_v5, %v1180_v10 }
0x1921   :  { %v1457_v63 = vpop.f32.mrf.mxu3 }
0x1922   :  { %v1460_v2 = vadd.f32 %v1457_v63, %v1434_v48 }
0x1924   :  { %3764 = vtanh.f32 %v1460_v2  ;;  %v3577_v9 = vmul.f32 -1.442695, %v1460_v2 }
0x1925   :  { %3766 = vtanh.f32 %v4611_v18 }
0x1926   :  { %3768 = vpow2.f32 %v3577_v9 }
0x192a   :  { %v3765_v11 = vpop.eup %3764 }
0x192b   :  { %1483 = vrot.lane.b32.xlu2 %v3765_v11, %s4101_s30  ;;  %v3767_v4 = vpop.eup %3766 }
0x192c   :  { %v3769_v6 = vpop.eup %3768 }
0x192d   :  { %v1464_v17 = vadd.f32 1.0, %v3769_v6 }
0x192f   :  { %3770 = vrcp.f32 %v1464_v17  ;;  %v1476_v0 = vand.u32 2147483648, %v1464_v17  ;;  %vm1470_vm5 = vweird.f32 %v1464_v17  ;;  %v1474_v19 = vand.u32 2147483647, %v1464_v17 }
0x1931   :  { %v1477_v25 = vor.u32 1.1754944e-38, %v1476_v0  ;;  %vm1475_vm12 = vcmp.eq.f32.partialorder %v1474_v19, 8.507059e+37 }
0x1933   :  { %1193 = vrot.lane.b32.xlu2 %v3767_v4, %s4101_s30 }
0x1935   :  { %v3771_v7 = vpop.eup %3770 }
0x1936   :  { %v1466_v40 = vmul.f32 %v3771_v7, %v1464_v17  ;;  %vm1471_vm2 = vweird.f32 %v3771_v7 }
0x1937   :  { %vm1472_vm10 = vmor %vm1470_vm5, %vm1471_vm2 }
0x1938   :  { %v1467_v8 = vsub.f32 1.0, %v1466_v40 }
0x193a   :  { %v1468_v12 = vmul.f32 %v3771_v7, %v1467_v8 }
0x193c   :  { %v1469_v58 = vadd.f32 %v3771_v7, %v1468_v12 }
0x193e   :  { %v1473_v22 = vsel %vm1472_vm10, %v3771_v7, %v1469_v58 }
0x193f   :  { %v1478_v28 = vsel %vm1475_vm12, %v1477_v25, %v1473_v22 }
0x1940   :  { %v1481_v37 = vmul.f32 %v1478_v28, %v4603_v21 }
0x1985   :  { %v1484_v27 = vpop.permute.xlu2 %1483 }
0x1986   :  { %v1486_v31 = vmul.f32 %v1484_v27, %v1478_v28 }
0x1988   :  { %1488 = vrot.lane.b32.xlu1 %v1486_v31, %s4101_s30 }
0x198d   :  { %v1194_v34 = vpop.permute.xlu2 %1193 }
0x198e   :  { %v1196_v36 = vmul.f32 %v1194_v34, %v1177_v47 }
0x1990   :  { %1198 = vrot.lane.b32.xlu1 %v1196_v36, %s4109_s5 }
0x19fa   :  { %v1489_v39 = vpop.permute.xlu1 %1488 }
0x19fb   :  { %v1491_v42 = vadd.f32 %v1489_v39, %v1481_v37  ;;  %v1754_v39 = vld [vmem:[%s5185_s14] sm:$0xff] }
0x19fd   :  { %3772 = vtanh.f32 %v1491_v42 }
0x1a02   :  { %v4619_v43 = vpop.permute.xlu1 %1198 }
0x1a03   :  { %v3773_v44 = vpop.eup %3772  ;;  %1201 = vst.msk [vmem:[#allocation3 + $0xe] sm:$0x3] %vm738_vm15, %v4619_v43 }
0x1a04   :  { %1494 = vrot.lane.b32.xlu0 %v3773_v44, %s4101_s30 }
0x1a0a   :  { %v1203_v15 = vld [vmem:[#allocation3 + $0x8] sm:$0xff] }
0x1a0b   :  { %3570 = vmatmul.msk.f32.gmra.mxu2 %vm197_vm0, %v1203_v15 }
0x1a76   :  { %v1495_v16 = vpop.permute.xlu0 %1494 }
0x1a77   :  { %v1497_v30 = vmul.f32 %v1495_v16, %v1478_v28 }
0x1a79   :  { %1500 = vrot.lane.b32.xlu2 %v1497_v30, %s4109_s5 }
0x1a8e   :  { %v1242_v61 = vpop.f32.mrf.mxu2 }
0x1a8f   :  { %v1243_v46 = vadd.f32 %v4586_v14, %v1242_v61 }
0x1a91   :  { %1246 = vst [vmem:[#allocation2 + $0x8] sm:$0xff] %v1243_v46 }
0x1a98   :  { %v1498_v50 = vld [vmem:[#allocation2 + $0x8] sm:$0x3]  ;;  %v1562_v4 = vld [vmem:[#allocation2 + $0xa] sm:$0x3] }
0x1ad3   :  { %v1501_v21 = vpop.permute.xlu2 %1500 }
0x1ad4   :  { %3578 = vmatmul.msk.f32.vlgmr.msra.gmra.mxu1 %vm197_vm0, %v1501_v21  ;;  %v4647_v21 = vld [vmem:[%s5176_s11] ss:$0 sm:$0xff] }
0x1b51   :  { %v1521_v33 = vpop.f32.mrf.mxu1 }
0x1b52   :  { %v1524_v13 = vadd.f32 %v1521_v33, %v1498_v50  ;;  %v4653_v33 = vld [vmem:[%s5177_s4] ss:$0 sm:$0xff] }
0x1b54   :  { %3774 = vtanh.f32 %v1524_v13  ;;  %v3579_v41 = vmul.f32 -1.442695, %v1524_v13 }
0x1b56   :  { %3776 = vpow2.f32 %v3579_v41 }
0x1b5a   :  { %v3775_v51 = vpop.eup %3774 }
0x1b5b   :  { %1547 = vrot.lane.b32.xlu0 %v3775_v51, %s4101_s30 }
0x1b5c   :  { %v3777_v49 = vpop.eup %3776 }
0x1b5d   :  { %v1528_v52 = vadd.f32 1.0, %v3777_v49 }
0x1b5f   :  { %3778 = vrcp.f32 %v1528_v52  ;;  %v1540_v3 = vand.u32 2147483648, %v1528_v52  ;;  %vm1534_vm14 = vweird.f32 %v1528_v52  ;;  %v1538_v54 = vand.u32 2147483647, %v1528_v52 }
0x1b61   :  { %v1541_v57 = vor.u32 1.1754944e-38, %v1540_v3  ;;  %vm1539_vm4 = vcmp.eq.f32.partialorder %v1538_v54, 8.507059e+37 }
0x1b65   :  { %v3779_v53 = vpop.eup %3778 }
0x1b66   :  { %v1530_v20 = vmul.f32 %v3779_v53, %v1528_v52  ;;  %vm1535_vm13 = vweird.f32 %v3779_v53 }
0x1b67   :  { %vm1536_vm1 = vmor %vm1534_vm14, %vm1535_vm13 }
0x1b68   :  { %v1531_v23 = vsub.f32 1.0, %v1530_v20 }
0x1b6a   :  { %v1532_v14 = vmul.f32 %v3779_v53, %v1531_v23 }
0x1b6c   :  { %v1533_v45 = vadd.f32 %v3779_v53, %v1532_v14 }
0x1b6e   :  { %v1537_v55 = vsel %vm1536_vm1, %v3779_v53, %v1533_v45 }
0x1b6f   :  { %v1542_v47 = vsel %vm1539_vm4, %v1541_v57, %v1537_v55 }
0x1b70   :  { %v1545_v62 = vmul.f32 %v1542_v47, %v1491_v42 }
0x1bcd   :  { %v1548_v59 = vpop.permute.xlu0 %1547 }
0x1bce   :  { %v1550_v60 = vmul.f32 %v1548_v59, %v1542_v47 }
0x1bd0   :  { %1552 = vrot.lane.b32.xlu1 %v1550_v60, %s4101_s30 }
0x1c42   :  { %v1553_v48 = vpop.permute.xlu1 %1552 }
0x1c43   :  { %v1555_v63 = vadd.f32 %v1553_v48, %v1545_v62 }
0x1c45   :  { %3780 = vtanh.f32 %v1555_v63 }
0x1c4b   :  { %v3781_v2 = vpop.eup %3780 }
0x1c4c   :  { %1558 = vrot.lane.b32.xlu2 %v3781_v2, %s4101_s30 }
0x1ca6   :  { %v1559_v5 = vpop.permute.xlu2 %1558 }
0x1ca7   :  { %v1561_v10 = vmul.f32 %v1559_v5, %v1542_v47 }
0x1ca9   :  { %1564 = vrot.lane.b32.xlu0 %v1561_v10, %s4109_s5 }
0x1d1b   :  { %v1565_v11 = vpop.permute.xlu0 %1564 }
0x1d1c   :  { %3580 = vmatmul.msk.f32.vlgmr.msra.gmra.mxu0 %vm197_vm0, %v1565_v11 }
0x1d99   :  { %v1585_v9 = vpop.f32.mrf.mxu0 }
0x1d9a   :  { %v1588_v6 = vadd.f32 %v1585_v9, %v1562_v4 }
0x1d9c   :  { %3782 = vtanh.f32 %v1588_v6  ;;  %v3581_v7 = vmul.f32 -1.442695, %v1588_v6 }
0x1d9e   :  { %3784 = vpow2.f32 %v3581_v7 }
0x1da2   :  { %v3783_v17 = vpop.eup %3782 }
0x1da3   :  { %1611 = vrot.lane.b32.xlu1 %v3783_v17, %s4101_s30 }
0x1da4   :  { %v3785_v40 = vpop.eup %3784 }
0x1da5   :  { %v1592_v8 = vadd.f32 1.0, %v3785_v40 }
0x1da7   :  { %3786 = vrcp.f32 %v1592_v8  ;;  %v1604_v25 = vand.u32 2147483648, %v1592_v8  ;;  %vm1598_vm5 = vweird.f32 %v1592_v8  ;;  %v1602_v27 = vand.u32 2147483647, %v1592_v8 }
0x1da9   :  { %v1605_v31 = vor.u32 1.1754944e-38, %v1604_v25  ;;  %vm1603_vm12 = vcmp.eq.f32.partialorder %v1602_v27, 8.507059e+37 }
0x1dad   :  { %v3787_v12 = vpop.eup %3786 }
0x1dae   :  { %v1594_v58 = vmul.f32 %v3787_v12, %v1592_v8  ;;  %vm1599_vm2 = vweird.f32 %v3787_v12 }
0x1daf   :  { %vm1600_vm10 = vmor %vm1598_vm5, %vm1599_vm2 }
0x1db0   :  { %v1595_v0 = vsub.f32 1.0, %v1594_v58 }
0x1db2   :  { %v1596_v19 = vmul.f32 %v3787_v12, %v1595_v0 }
0x1db4   :  { %v1597_v22 = vadd.f32 %v3787_v12, %v1596_v19 }
0x1db6   :  { %v1601_v28 = vsel %vm1600_vm10, %v3787_v12, %v1597_v22 }
0x1db7   :  { %v1606_v36 = vsel %vm1603_vm12, %v1605_v31, %v1601_v28 }
0x1db8   :  { %v1609_v42 = vmul.f32 %v1606_v36, %v1555_v63 }
0x1e15   :  { %v1612_v34 = vpop.permute.xlu1 %1611 }
0x1e16   :  { %v1614_v37 = vmul.f32 %v1612_v34, %v1606_v36 }
0x1e18   :  { %1616 = vrot.lane.b32.xlu2 %v1614_v37, %s4101_s30 }
0x1e20   :  { %1771 = vperm.xlu2 %3660, %v1754_v39  }
0x1e28   :  { %3661 = vset.pattern.permute.xlu2 %v4100_v1 }
0x1e72   :  { %v1617_v44 = vpop.permute.xlu2 %1616 }
0x1e73   :  { %v4639_v15 = vadd.f32 %v1617_v44, %v1609_v42 }
0x1e75   :  { %3788 = vtanh.f32 %v4639_v15 }
0x1e7a   :  { %v1772_v61 = vpop.permute.xlu2 %1771 }
0x1e7b   :  { %v3789_v16 = vpop.eup %3788  ;;  %v1778_v50 = vmul.f32 %v4647_v21, %v1772_v61 }
0x1e7c   :  { %1622 = vrot.lane.b32.xlu0 %v3789_v16, %s4101_s30 }
0x1e7d   :  { %v1780_v13 = vadd.f32 %v4653_v33, %v1778_v50 }
0x1e84   :  { %1758 = vperm.xlu0 %3656, %v1754_v39  }
0x1eee   :  { %v1623_v30 = vpop.permute.xlu0 %1622 }
0x1eef   :  { %v1625_v46 = vmul.f32 %v1623_v30, %v1606_v36 }
0x1ef1   :  { %1628 = vrot.lane.b32.xlu1 %v1625_v46, %s4109_s5 }
0x1ef6   :  { %v1759_v51 = vpop.permute.xlu0 %1758 }
0x1ef7   :  { %v1766_v49 = vmul.f32 %v4647_v21, %v1759_v51 }
0x1ef9   :  { %1784 = vrot.lane.b32.xlu1 %v1780_v13, %s4101_s30  ;;  %v1768_v52 = vadd.f32 %v4653_v33, %v1766_v49 }
0x1f63   :  { %v1629_v41 = vpop.permute.xlu1 %1628 }
0x1f64   :  { %3582 = vmatmul.msk.f32.vlgmr.msra.gmra.mxu2 %vm197_vm0, %v1629_v41 }
0x1f6b   :  { %v1785_v53 = vpop.permute.xlu1 %1784 }
0x1f6c   :  { %v4661_v20 = vsel %vm197_vm0, %v1768_v52, %v1785_v53 }
0x1f6d   :  { %v1795_v23 = vand.u32 2139095040, %v4661_v20  ;;  %v1792_v3 = vand.u32 2147483647, %v4661_v20 }
0x1f6f   :  { %v1796_v14 = vshrl.u32 %v1795_v23, 23  ;;  %v1799_v55 = vand.u32 8388607, %v1792_v3 }
0x1f71   :  { %v3586_v45 = vadd.s32 4294967169, %v1796_v14  ;;  %v1800_v60 = vor.u32 8388608, %v1799_v55 }
0x1f73   :  { %v1802_v54 = vadd.s32 1, %v3586_v45  ;;  %v4680_v0 = vshll.u32 %v1800_v60, 8 }
0x1f75   :  { %vm1803_vm13 = vcmp.gt.s32.totalorder %v1802_v54, 0  ;;  %v1841_v37 = vand.u32 65535, %v4680_v0  ;;  %v1842_v39 = vshrl.u32 %v4680_v0, 16 }
0x1f76   :  { %v1804_v57 = vsel %vm1803_vm13, %v1802_v54, 0 }
0x1f77   :  { %v1806_v59 = vand.u32 31, %v1804_v57  ;;  %v4667_v62 = vshrl.u32 %v1804_v57, 5 }
0x1f79   :  { %v1807_v47 = vsub.s32 32, %v1806_v59  ;;  %v1809_v48 = vshll.u32 %v4102_v24, %v1806_v59  ;;  %v1812_v63 = vshll.u32 %v4103_v26, %v1806_v59  ;;  %v1815_v10 = vshll.u32 %v4104_v29, %v1806_v59 }
0x1f7a   :  { %v1818_v4 = vshll.u32 %v4105_v32, %v1806_v59  ;;  %v1821_v6 = vshll.u32 %v4106_v35, %v1806_v59  ;;  %vm1824_vm14 = vcmp.lt.s32.totalorder %v4667_v62, 1  ;;  %vm1827_vm1 = vcmp.lt.s32.totalorder %v4667_v62, 4 }
0x1f7b   :  { %v1810_v2 = vshrl.u32 %v4103_v26, %v1807_v47  ;;  %v1813_v5 = vshrl.u32 %v4104_v29, %v1807_v47  ;;  %v1816_v11 = vshrl.u32 %v4105_v32, %v1807_v47  ;;  %v1819_v9 = vshrl.u32 %v4106_v35, %v1807_v47 }
0x1f7c   :  { %v1822_v17 = vshrl.u32 %v4107_v38, %v1807_v47  ;;  %vm1826_vm4 = vcmp.lt.s32.totalorder %v4667_v62, 3  ;;  %vm1825_vm2 = vcmp.lt.s32.totalorder %v4667_v62, 2  ;;  %v2109_v62 = vld [vmem:[#allocation4 + $0x28] sm:$0xff] }
0x1f7d   :  { %v1811_v7 = vor.u32 %v1810_v2, %v1809_v48  ;;  %v1814_v40 = vor.u32 %v1813_v5, %v1812_v63  ;;  %v1817_v8 = vor.u32 %v1816_v11, %v1815_v10  ;;  %v1820_v12 = vor.u32 %v1819_v9, %v1818_v4 }
0x1f7e   :  { %v1823_v58 = vor.u32 %v1822_v17, %v1821_v6  ;;  %v1808_v5 = vshrl.u32 %v4102_v24, %v1807_v47 }
0x1f7f   :  { %v1832_v19 = vsel %vm1824_vm14, %v1811_v7, %v1814_v40  ;;  %v1836_v22 = vsel %vm1824_vm14, %v1814_v40, %v1817_v8  ;;  %v1833_v25 = vsel %vm1827_vm1, %v1820_v12, 920167782  ;;  %v1829_v48 = vsel %vm1827_vm1, %v1817_v8, 2102212464 }
0x1f80   :  { %v1837_v27 = vsel %vm1827_vm1, %v1823_v58, 1326507024  ;;  %v1834_v28 = vsel %vm1826_vm4, %v1817_v8, %v1833_v25  ;;  %v1828_v17 = vsel %vm1824_vm14, %v1808_v5, %v1811_v7 }
0x1f81   :  { %v1838_v31 = vsel %vm1826_vm4, %v1820_v12, %v1837_v27  ;;  %v1835_v34 = vsel %vm1825_vm2, %v1832_v19, %v1834_v28  ;;  %v1830_v12 = vsel %vm1826_vm4, %v1814_v40, %v1829_v48  ;;  %v2161_v48 = vld [vmem:[%s5144_s9 + $0x8] sm:$0xff] }
0x1f82   :  { %v1839_v36 = vsel %vm1825_vm2, %v1836_v22, %v1838_v31  ;;  %v1865_v16 = vand.u32 65535, %v1835_v34  ;;  %v1866_v30 = vshrl.u32 %v1835_v34, 16  ;;  %v1831_v47 = vsel %vm1825_vm2, %v1828_v17, %v1830_v12  ;;  %2183 = vmatpush.msrb.mxu0 %v2161_v48  ;;  %v3670_v48 = vld [vmem:[%s5145_s10] ss:$0 sm:$0xff] }
0x1f83   :  { %v1843_v42 = vand.u32 65535, %v1839_v36  ;;  %v1844_v44 = vshrl.u32 %v1839_v36, 16  ;;  %v1885_v34 = vmul.u32 %v4680_v0, %v1831_v47  ;;  %vm1794_vm2 = vcmp.lt.s32.totalorder %v4661_v20, 0 }
0x1f84   :  { %v1868_v50 = vmul.u32 %v1866_v30, %v1841_v37  ;;  %v1869_v13 = vmul.u32 %v1865_v16, %v1842_v39  ;;  %v1867_v52 = vmul.u32 %v1865_v16, %v1841_v37  ;;  %v1870_v45 = vmul.u32 %v1866_v30, %v1842_v39  ;;  %v2111_v16 = vld [vmem:[#allocation4 + $0x38] sm:$0xff] }
0x1f85   :  { %v1846_v61 = vmul.u32 %v1844_v44, %v1841_v37  ;;  %v1847_v46 = vmul.u32 %v1843_v42, %v1842_v39  ;;  %v1845_v51 = vmul.u32 %v1843_v42, %v1841_v37  ;;  %v1848_v49 = vmul.u32 %v1844_v44, %v1842_v39  ;;  %2144 = vmatpush.msrb.mxu1 %v2111_v16 }
0x1f86   :  { %v1871_v53 = vshll.u32 %v1868_v50, 16  ;;  %v1873_v55 = vshll.u32 %v1869_v13, 16  ;;  %v1872_v9 = vshrl.u32 %v1868_v50, 16  ;;  %v1874_v19 = vshrl.u32 %v1869_v13, 16  ;;  %v2108_v13 = vld [vmem:[#allocation4 + $0x20] sm:$0xff] }
0x1f87   :  { %v1849_v41 = vshll.u32 %v1846_v61, 16  ;;  %v1851_v23 = vshll.u32 %v1847_v46, 16  ;;  %v1850_v10 = vshrl.u32 %v1846_v61, 16  ;;  %v1852_v58 = vshrl.u32 %v1847_v46, 16  ;;  %v2110_v61 = vld [vmem:[#allocation4 + $0x30] sm:$0xff] }
0x1f88   :  { %vm1875_vm10 = vc.u32 %v1867_v52, %v1871_v53  ;;  %v1877_v57 = vadd.s32 %v1871_v53, %v1867_v52  ;;  %2145 = vmatpush.msrb.mxu1 %v2110_v61  ;;  %v2106_v53 = vld [vmem:[#allocation4 + $0x10] sm:$0xff] }
0x1f89   :  { %vm1853_vm5 = vc.u32 %v1845_v51, %v1849_v41  ;;  %v1855_v14 = vadd.s32 %v1849_v41, %v1845_v51  ;;  %v1876_v60 = vsel %vm1875_vm10, 1, %v4100_v1  ;;  %v2107_v51 = vld [vmem:[#allocation4 + $0x18] sm:$0xff] }
0x1f8a   :  { %v1854_v54 = vsel %vm1853_vm5, 1, %v4100_v1  ;;  %v1878_v2 = vadd.s32 %v1876_v60, %v1870_v45  ;;  %vm1879_vm13 = vc.u32 %v1877_v57, %v1873_v55  ;;  %v1881_v27 = vadd.s32 %v1877_v57, %v1873_v55  ;;  %2146 = vmatpush.msrb.mxu1 %v2109_v62  ;;  %v2104_v55 = vld [vmem:[#allocation4] sm:$0xff] }
0x1f8b   :  { %v1856_v59 = vadd.s32 %v1854_v54, %v1848_v49  ;;  %vm1857_vm12 = vc.u32 %v1855_v14, %v1851_v23  ;;  %v1880_v4 = vsel %vm1879_vm13, 1, %v4100_v1  ;;  %v2105_v23 = vld [vmem:[#allocation4 + $0x8] sm:$0xff]  ;;  %vm1793_vm5 = vcmp.le.f32.partialorder %v1792_v3, 0.7853982 }
0x1f8c   :  { %v1858_v63 = vsel %vm1857_vm12, 1, %v4100_v1  ;;  %v1882_v6 = vadd.s32 %v1880_v4, %v1878_v2  ;;  %2147 = vmatpush.msrb.mxu1 %v2108_v13  ;;  %v2159_v2 = vld [vmem:[%s5178_s12] sm:$0x3]  ;;  %vm1935_vm13 = vweird.f32 %v4661_v20  ;;  %v1626_v13 = vld [vmem:[#allocation2 + $0xc] sm:$0x3] }
0x1f8d   :  { %v1860_v11 = vadd.s32 %v1858_v63, %v1856_v59  ;;  %v2160_v63 = vld [vmem:[%s5144_s9] sm:$0xff] }
0x1f8e   :  { %v1883_v22 = vadd.s32 %v1882_v6, %v1872_v9  ;;  %2148 = vmatpush.msrb.mxu1 %v2107_v51  ;;  %2184 = vmatpush.msrb.mxu0 %v2160_v63 }
0x1f8f   :  { %v1861_v8 = vadd.s32 %v1860_v11, %v1850_v10  ;;  %3594 = vmatmul.msk.f32.vlgmr.msrb.gmra.mxu0 %vm590_vm11, %v2159_v2 }
0x1f90   :  { %v1884_v28 = vadd.s32 %v1883_v22, %v1874_v19  ;;  %2149 = vmatpush.msrb.mxu1 %v2106_v53 }
0x1f91   :  { %v1862_v25 = vadd.s32 %v1861_v8, %v1852_v58 }
0x1f92   :  { %v1888_v31 = vadd.s32 1, %v1884_v28  ;;  %2150 = vmatpush.msrb.mxu1 %v2105_v23 }
0x1f93   :  { %vm1887_vm1 = vc.u32 %v1862_v25, %v1881_v27  ;;  %v1886_v41 = vadd.s32 %v1881_v27, %v1862_v25 }
0x1f94   :  { %v1889_v36 = vsel %vm1887_vm1, %v1888_v31, %v1884_v28  ;;  %2151 = vmatpush.msrb.mxu1 %v2104_v55  ;;  %v2202_v55 = vld [vmem:[#allocation7 + $0x8] sm:$0xff] }
0x1f95   :  { %v1890_v37 = vadd.s32 %v1889_v36, %v1885_v34 }
0x1f97   :  { %v1891_v7 = vadd.s32 536870912, %v1890_v37 }
0x1f99   :  { %v1892_v39 = vshrl.u32 %v1891_v7, 30 }
0x1f9b   :  { %v1893_v42 = vshll.u32 %v1892_v39, 30  ;;  %v1916_v6 = vsub.s32 4, %v1892_v39 }
0x1f9d   :  { %v1894_v40 = vsub.s32 %v1890_v37, %v1893_v42  ;;  %v1917_v19 = vsel %vm1794_vm2, %v1916_v6, %v1892_v39 }
0x1f9e   :  { %v1919_v27 = vsel %vm1793_vm5, 0, %v1917_v19 }
0x1f9f   :  { %vm1895_vm14 = vcmp.lt.s32.totalorder %v1894_v40, 0  ;;  %v1896_v44 = vsub.s32 0, %v1894_v40  ;;  %v1936_v36 = vadd.s32 3, %v1919_v27 }
0x1fa1   :  { %v1897_v30 = vsel %vm1895_vm14, %v1896_v44, %v1894_v40 }
0x1fa2   :  { %v1898_v46 = vclz %v1897_v30 }
0x1fa4   :  { %v3587_v50 = vadd.s32 4294967294, %v1898_v46 }
0x1fa6   :  { %vm3588_vm4 = vcmp.lt.s32.totalorder %v3587_v50, 0 }
0x1fa7   :  { %v1901_v0 = vsel %vm3588_vm4, 0, %v3587_v50 }
0x1fa8   :  { %v1902_v49 = vsub.s32 32, %v1901_v0  ;;  %v1906_v52 = vsub.s32 4294967266, %v1901_v0  ;;  %v1903_v14 = vshll.u32 %v1894_v40, %v1901_v0  ;;  %v1937_v40 = vand.u32 3, %v1936_v36 }
0x1faa   :  { %v1904_v45 = vshrl.u32 %v1886_v41, %v1902_v49  ;;  %v1907_v54 = vadd.s32 127, %v1906_v52  ;;  %vm1939_vm11 = vcmp.eq.s32.totalorder %v1937_v40, 0  ;;  %vm1942_vm10 = vcmp.eq.s32.totalorder %v1937_v40, 2  ;;  %v2112_v49 = vld [vmem:[%s5186_s7] sm:$0xff] }
0x1fab   :  { %vm1938_vm12 = vcmp.lt.s32.totalorder %v1937_v40, 2 }
0x1fac   :  { %v1905_v57 = vor.u32 %v1904_v45, %v1903_v14  ;;  %v1908_v59 = vshll.u32 %v1907_v54, 23  ;;  %v2204_v14 = vld [vmem:[#allocation7 + $0x18] sm:$0xff]  ;;  %v2203_v45 = vld [vmem:[#allocation7 + $0x10] sm:$0xff] }
0x1fad   :  { %2231 = vmatpush.msrb.mxu2 %v2204_v14 }
0x1fae   :  { %v1909_v60 = vor.u32 4788187, %v1908_v59  ;;  %v1912_v10 = vcvt.s32.f32 %v1905_v57  ;;  %v2201_v57 = vld [vmem:[#allocation7] sm:$0xff] }
0x1faf   :  { %2232 = vmatpush.msrb.mxu2 %v2203_v45 }
0x1fb0   :  { %v1910_v5 = vand.u32 2147483647, %v1909_v60 }
0x1fb1   :  { %2233 = vmatpush.msrb.mxu2 %v2202_v55 }
0x1fb2   :  { %v1913_v11 = vmul.f32 %v1912_v10, %v1910_v5 }
0x1fb3   :  { %2234 = vmatpush.msrb.mxu2 %v2201_v57 }
0x1fb4   :  { %v1914_v4 = vxor.u32 2147483648, %v1913_v11 }
0x1fb6   :  { %v1915_v9 = vsel %vm1794_vm2, %v1914_v4, %v1913_v11 }
0x1fb7   :  { %v1918_v17 = vsel %vm1793_vm5, %v4661_v20, %v1915_v9 }
0x1fb8   :  { %v1920_v12 = vmul.f32 %v1918_v17, %v1918_v17 }
0x1fba   :  { %v1928_v58 = vmul.f32 -0.00019511016, %v1920_v12  ;;  %v1921_v8 = vmul.f32 -0.001358992, %v1920_v12 }
0x1fbc   :  { %v1929_v22 = vadd.f32 0.008332121, %v1928_v58  ;;  %v1922_v25 = vadd.f32 0.041655596, %v1921_v8 }
0x1fbe   :  { %v1930_v47 = vmul.f32 %v1929_v22, %v1920_v12  ;;  %v1923_v28 = vmul.f32 %v1922_v25, %v1920_v12  ;;  %v4748_v22 = vld [vmem:[%s5184_s25] ss:$0 sm:$0xff] }
0x1fc0   :  { %v1931_v31 = vadd.f32 -0.16666654, %v1930_v47  ;;  %v1924_v34 = vadd.f32 -0.4999988, %v1923_v28 }
0x1fc2   :  { %v1932_v37 = vmul.f32 %v1931_v31, %v1920_v12  ;;  %v1925_v7 = vmul.f32 %v1924_v34, %v1920_v12 }
0x1fc4   :  { %v1933_v42 = vadd.f32 1.0, %v1932_v37  ;;  %v1926_v3 = vadd.f32 1.0, %v1925_v7 }
0x1fc6   :  { %v1934_v44 = vmul.f32 %v1933_v42, %v1918_v17  ;;  %v1943_v16 = vxor.u32 2147483648, %v1926_v3 }
0x1fc8   :  { %v1940_v30 = vxor.u32 2147483648, %v1934_v44  ;;  %v1944_v61 = vsel %vm1942_vm10, %v1943_v16, %v1934_v44  ;;  %v4765_v44 = vld [vmem:[%s5148_s13] ss:$0 sm:$0xff] }
0x1fca   :  { %v1941_v39 = vsel %vm1939_vm11, %v1926_v3, %v1940_v30 }
0x1fcb   :  { %v1945_v46 = vsel %vm1938_vm12, %v1941_v39, %v1944_v61 }
0x1fcc   :  { %v1946_v62 = vsel %vm1935_vm13, nan, %v1945_v46  ;;  %v4771_v46 = vld [vmem:[#allocation9 + $0x10] sm:$0xff] }
0x1fcd   :  { %v2102_v50 = vsel %vm4375_vm3, %v1946_v62, %v4661_v20  ;;  %v4775_v62 = vld [vmem:[#allocation9 + $0x8] sm:$0xff] }
0x1fce   :  { %3592 = vmatmul.msk.f32.vlgmr.msrb.gmra.mxu1 %vm553_vm6, %v2102_v50  ;;  %v4781_v50 = vld [vmem:[#allocation9] sm:$0xff] }
0x1fe7   :  { %v1649_v0 = vpop.f32.mrf.mxu2 }
0x1fe8   :  { %v1652_v51 = vadd.f32 %v1649_v0, %v1626_v13 }
0x1fea   :  { %3790 = vtanh.f32 %v1652_v51  ;;  %v3583_v52 = vmul.f32 -1.442695, %v1652_v51 }
0x1fec   :  { %3792 = vpow2.f32 %v3583_v52 }
0x1ff0   :  { %v3791_v41 = vpop.eup %3790 }
0x1ff1   :  { %1675 = vrot.lane.b32.xlu2 %v3791_v41, %s4101_s30 }
0x1ff2   :  { %v3793_v53 = vpop.eup %3792 }
0x1ff3   :  { %v1656_v23 = vadd.f32 1.0, %v3793_v53 }
0x1ff5   :  { %3794 = vrcp.f32 %v1656_v23  ;;  %v1668_v5 = vand.u32 2147483648, %v1656_v23  ;;  %vm1662_vm14 = vweird.f32 %v1656_v23  ;;  %v1666_v10 = vand.u32 2147483647, %v1656_v23 }
0x1ff7   :  { %v1669_v9 = vor.u32 1.1754944e-38, %v1668_v5  ;;  %vm1667_vm2 = vcmp.eq.f32.partialorder %v1666_v10, 8.507059e+37 }
0x1ff9   :  { %2117 = vperm.xlu2 %3661, %v2112_v49  }
0x1ffb   :  { %v3795_v20 = vpop.eup %3794 }
0x1ffc   :  { %v1658_v54 = vmul.f32 %v3795_v20, %v1656_v23  ;;  %vm1663_vm1 = vweird.f32 %v3795_v20 }
0x1ffd   :  { %vm1664_vm4 = vmor %vm1662_vm14, %vm1663_vm1 }
0x1ffe   :  { %v1659_v59 = vsub.f32 1.0, %v1658_v54 }
0x2000   :  { %v1660_v60 = vmul.f32 %v3795_v20, %v1659_v59 }
0x2002   :  { %v1661_v63 = vadd.f32 %v3795_v20, %v1660_v60 }
0x2004   :  { %v1665_v4 = vsel %vm1664_vm4, %v3795_v20, %v1661_v63 }
0x2005   :  { %v1670_v17 = vsel %vm1667_vm2, %v1669_v9, %v1665_v4 }
0x2006   :  { %v1673_v7 = vmul.f32 %v1670_v17, %v4639_v15  ;;  %v4769_v15 = vld [vmem:[#allocation9 + $0x18] sm:$0xff] }
0x2007   :  { %2259 = vmatpush.msrb.mxu3 %v4769_v15  ;;  %2325 = vmatpush.msra.mxu0 %v4769_v15 }
0x2008   :  { %2523 = vmatpush.msra.mxu2 %v4769_v15  ;;  %2655 = vmatpush.msra.mxu1 %v4769_v15 }
0x2009   :  { %2260 = vmatpush.msrb.mxu3 %v4771_v46  ;;  %2326 = vmatpush.msra.mxu0 %v4771_v46 }
0x200a   :  { %2524 = vmatpush.msra.mxu2 %v4771_v46  ;;  %2656 = vmatpush.msra.mxu1 %v4771_v46 }
0x200b   :  { %2261 = vmatpush.msrb.mxu3 %v4775_v62  ;;  %2327 = vmatpush.msra.mxu0 %v4775_v62 }
0x200c   :  { %v2186_v2 = vpop.f32.mrf.mxu0  ;;  %2525 = vmatpush.msra.mxu2 %v4775_v62  ;;  %2657 = vmatpush.msra.mxu1 %v4775_v62 }
0x200d   :  { %v2187_v11 = vadd.f32 %v3670_v48, %v2186_v2  ;;  %2262 = vmatpush.msrb.mxu3 %v4781_v50  ;;  %2328 = vmatpush.msra.mxu0 %v4781_v50 }
0x200e   :  { %2526 = vmatpush.msra.mxu2 %v4781_v50  ;;  %2658 = vmatpush.msra.mxu1 %v4781_v50 }
0x200f   :  { %v2190_v12 = vrot.slane %v2187_v11, 6  ;;  %v2192_v8 = vrot.slane %v2187_v11, 4  ;;  %v2194_v25 = vrot.slane %v2187_v11, 2  ;;  %2457 = vmatpush.msrb.mxu0 %v4769_v15 }
0x2011   :  { %v2196_v19 = vsel %vm621_vm7, %v2187_v11, %v2190_v12  ;;  %2458 = vmatpush.msrb.mxu0 %v4771_v46 }
0x2012   :  { %v2197_v27 = vsel %vm623_vm8, %v2196_v19, %v2192_v8 }
0x2013   :  { %v4753_v34 = vsel %vm625_vm9, %v2197_v27, %v2194_v25  ;;  %2459 = vmatpush.msrb.mxu0 %v4775_v62 }
0x2015   :  { %2460 = vmatpush.msrb.mxu0 %v4781_v50 }
0x204b   :  { %v1676_v6 = vpop.permute.xlu2 %1675  ;;  %v2153_v31 = vpop.f32.mrf.mxu1 }
0x204c   :  { %v1678_v58 = vmul.f32 %v1676_v6, %v1670_v17 }
0x204e   :  { %1680 = vrot.lane.b32.xlu0 %v1678_v58, %s4101_s30 }
0x2053   :  { %v2118_v47 = vpop.permute.xlu2 %2117 }
0x2054   :  { %v2128_v28 = vmul.f32 %v4748_v22, %v2118_v47 }
0x2056   :  { %v2154_v36 = vadd.f32 %v2153_v31, %v2128_v28 }
0x2058   :  { %v2199_v37 = vadd.f32 %v4753_v34, %v2154_v36 }
0x205a   :  { %3595 = vmatmul.msk.f32.vlgmr.msrb.gmra.mxu2 %vm197_vm0, %v2199_v37 }
0x20c0   :  { %v1681_v42 = vpop.permute.xlu0 %1680 }
0x20c1   :  { %v4758_v3 = vadd.f32 %v1681_v42, %v1673_v7 }
0x20c3   :  { %3796 = vtanh.f32 %v4758_v3 }
0x20c9   :  { %v3797_v40 = vpop.eup %3796 }
0x20ca   :  { %1686 = vrot.lane.b32.xlu1 %v3797_v40, %s4101_s30 }
0x20dd   :  { %v2236_v16 = vpop.f32.mrf.mxu2 }
0x20de   :  { %v2237_v30 = vadd.f32 %v4765_v44, %v2236_v16 }
0x20e0   :  { %2242 = vst [vmem:[#allocation2] sm:$0xff] %v2237_v30 }
0x20e7   :  { %v2244_v51 = vld [vmem:[#allocation2] sm:$0x3] }
0x213c   :  { %v1687_v39 = vpop.permute.xlu1 %1686 }
0x213d   :  { %v1689_v61 = vmul.f32 %v1687_v39, %v1670_v17 }
0x213f   :  { %1692 = vrot.lane.b32.xlu0 %v1689_v61, %s4109_s5 }
0x21b1   :  { %v1693_v13 = vpop.permute.xlu0 %1692 }
0x21b2   :  { %3584 = vmatmul.msk.f32.vlgmr.msra.gmra.mxu3 %vm197_vm0, %v1693_v13 }
0x21b3   :  { %2391 = vmatpush.msra.mxu3 %v4769_v15 }
0x21b5   :  { %2392 = vmatpush.msra.mxu3 %v4771_v46 }
0x21b7   :  { %2393 = vmatpush.msra.mxu3 %v4775_v62 }
0x21b9   :  { %2394 = vmatpush.msra.mxu3 %v4781_v50 }
0x21ba   :  { %3597 = vmatmul.msk.f32.vlgmr.msrb.gmra.mxu3 %vm197_vm0, %v4619_v43 }
0x21bb   :  { %2589 = vmatpush.msrb.mxu3 %v4769_v15 }
0x21bd   :  { %2590 = vmatpush.msrb.mxu3 %v4771_v46 }
0x21bf   :  { %2591 = vmatpush.msrb.mxu3 %v4775_v62 }
0x21c1   :  { %2592 = vmatpush.msrb.mxu3 %v4781_v50 }
0x2235   :  { %v4808_v0 = vpop.f32.mrf.mxu3 }
0x223d   :  { %v2264_v41 = vpop.f32.mrf.mxu3 }
0x223e   :  { %v2267_v49 = vadd.f32 %v2264_v41, %v2244_v51 }
0x2240   :  { %3798 = vtanh.f32 %v2267_v49  ;;  %v3598_v53 = vmul.f32 -1.442695, %v2267_v49 }
0x2242   :  { %3800 = vpow2.f32 %v3598_v53 }
0x2246   :  { %v3799_v52 = vpop.eup %3798 }
0x2247   :  { %2290 = vrot.lane.b32.xlu1 %v3799_v52, %s4101_s30  ;;  %v2376_v52 = vld [vmem:[#allocation2 + $0x4] sm:$0x3] }
0x2248   :  { %v3801_v43 = vpop.eup %3800 }
0x2249   :  { %v2271_v23 = vadd.f32 1.0, %v3801_v43 }
0x224b   :  { %3802 = vrcp.f32 %v2271_v23  ;;  %v2283_v57 = vand.u32 2147483648, %v2271_v23  ;;  %vm2277_vm11 = vweird.f32 %v2271_v23  ;;  %v2281_v59 = vand.u32 2147483647, %v2271_v23 }
0x224d   :  { %v2284_v48 = vor.u32 1.1754944e-38, %v2283_v57  ;;  %vm2282_vm12 = vcmp.eq.f32.partialorder %v2281_v59, 8.507059e+37 }
0x2251   :  { %v3803_v14 = vpop.eup %3802 }
0x2252   :  { %v2273_v20 = vmul.f32 %v3803_v14, %v2271_v23  ;;  %vm2278_vm5 = vweird.f32 %v3803_v14 }
0x2253   :  { %vm2279_vm10 = vmor %vm2277_vm11, %vm2278_vm5 }
0x2254   :  { %v2274_v45 = vsub.f32 1.0, %v2273_v20 }
0x2256   :  { %v2275_v54 = vmul.f32 %v3803_v14, %v2274_v45 }
0x2258   :  { %v2276_v55 = vadd.f32 %v3803_v14, %v2275_v54 }
0x225a   :  { %v2280_v60 = vsel %vm2279_vm10, %v3803_v14, %v2276_v55 }
0x225b   :  { %v2285_v2 = vsel %vm2282_vm12, %v2284_v48, %v2280_v60 }
0x225c   :  { %v2288_v10 = vmul.f32 %v2285_v2, %v4611_v18  ;;  %v2310_v18 = vld [vmem:[#allocation2 + $0x2] sm:$0x3] }
0x22b9   :  { %v2291_v63 = vpop.permute.xlu1 %2290 }
0x22ba   :  { %v2293_v5 = vmul.f32 %v2291_v63, %v2285_v2 }
0x22bc   :  { %2295 = vrot.lane.b32.xlu2 %v2293_v5, %s4101_s30 }
0x2316   :  { %v2296_v11 = vpop.permute.xlu2 %2295 }
0x2317   :  { %v2298_v4 = vadd.f32 %v2296_v11, %v2288_v10 }
0x2319   :  { %3804 = vtanh.f32 %v2298_v4 }
0x231f   :  { %v3805_v9 = vpop.eup %3804 }
0x2320   :  { %2301 = vrot.lane.b32.xlu0 %v3805_v9, %s4101_s30  ;;  %v1755_v9 = vld [vmem:[%s5185_s14 + $0x8] sm:$0xff] }
0x2392   :  { %v2302_v6 = vpop.permute.xlu0 %2301 }
0x2393   :  { %v2304_v17 = vmul.f32 %v2302_v6, %v2285_v2 }
0x2395   :  { %2306 = vrot.lane.b32.xlu1 %v2304_v17, %s4109_s5 }
0x2407   :  { %v2307_v12 = vpop.permute.xlu1 %2306 }
0x2408   :  { %2309 = vst.msk [vmem:[#allocation3] sm:$0x3] %vm738_vm15, %v2307_v12  ;;  %3599 = vmatmul.msk.f32.vlgmr.msra.gmra.mxu0 %vm197_vm0, %v2307_v12 }
0x2409   :  { %2721 = vmatpush.msra.mxu0 %v4769_v15 }
0x240b   :  { %2722 = vmatpush.msra.mxu0 %v4771_v46 }
0x240d   :  { %2723 = vmatpush.msra.mxu0 %v4775_v62 }
0x240f   :  { %2724 = vmatpush.msra.mxu0 %v4781_v50 }
0x2485   :  { %v2330_v58 = vpop.f32.mrf.mxu0 }
0x2486   :  { %v2333_v8 = vadd.f32 %v2330_v58, %v2310_v18 }
0x2488   :  { %3806 = vtanh.f32 %v2333_v8  ;;  %v3600_v25 = vmul.f32 -1.442695, %v2333_v8 }
0x248a   :  { %3808 = vpow2.f32 %v3600_v25 }
0x248e   :  { %v3807_v19 = vpop.eup %3806 }
0x248f   :  { %2356 = vrot.lane.b32.xlu2 %v3807_v19, %s4101_s30 }
0x2490   :  { %v3809_v27 = vpop.eup %3808 }
0x2491   :  { %v2337_v47 = vadd.f32 1.0, %v3809_v27 }
0x2493   :  { %3810 = vrcp.f32 %v2337_v47  ;;  %v2349_v42 = vand.u32 2147483648, %v2337_v47  ;;  %vm2343_vm1 = vweird.f32 %v2337_v47  ;;  %v2347_v40 = vand.u32 2147483647, %v2337_v47 }
0x2495   :  { %v2350_v30 = vor.u32 1.1754944e-38, %v2349_v42  ;;  %vm2348_vm4 = vcmp.eq.f32.partialorder %v2347_v40, 8.507059e+37 }
0x2499   :  { %v3811_v28 = vpop.eup %3810 }
0x249a   :  { %v2339_v31 = vmul.f32 %v3811_v28, %v2337_v47  ;;  %vm2344_vm13 = vweird.f32 %v3811_v28 }
0x249b   :  { %vm2345_vm14 = vmor %vm2343_vm1, %vm2344_vm13 }
0x249c   :  { %v2340_v36 = vsub.f32 1.0, %v2339_v31 }
0x249e   :  { %v2341_v37 = vmul.f32 %v3811_v28, %v2340_v36 }
0x24a0   :  { %v2342_v7 = vadd.f32 %v3811_v28, %v2341_v37 }
0x24a2   :  { %v2346_v16 = vsel %vm2345_vm14, %v3811_v28, %v2342_v7 }
0x24a3   :  { %v2351_v61 = vsel %vm2348_vm4, %v2350_v30, %v2346_v16 }
0x24a4   :  { %v2354_v46 = vmul.f32 %v2351_v61, %v2298_v4 }
0x24e9   :  { %v2357_v39 = vpop.permute.xlu2 %2356 }
0x24ea   :  { %v2359_v15 = vmul.f32 %v2357_v39, %v2351_v61 }
0x24ec   :  { %2361 = vrot.lane.b32.xlu0 %v2359_v15, %s4101_s30 }
0x255e   :  { %v2362_v62 = vpop.permute.xlu0 %2361 }
0x255f   :  { %v2364_v50 = vadd.f32 %v2362_v62, %v2354_v46 }
0x2561   :  { %3812 = vtanh.f32 %v2364_v50 }
0x2567   :  { %v3813_v13 = vpop.eup %3812 }
0x2568   :  { %2367 = vrot.lane.b32.xlu1 %v3813_v13, %s4101_s30 }
0x25da   :  { %v2368_v51 = vpop.permute.xlu1 %2367 }
0x25db   :  { %v2370_v41 = vmul.f32 %v2368_v51, %v2351_v61 }
0x25dd   :  { %2372 = vrot.lane.b32.xlu2 %v2370_v41, %s4109_s5 }
0x2637   :  { %v2373_v49 = vpop.permute.xlu2 %2372 }
0x2638   :  { %2375 = vst.msk [vmem:[#allocation3 + $0x2] sm:$0x3] %vm738_vm15, %v2373_v49  ;;  %3601 = vmatmul.msk.f32.vlgmr.msra.gmra.mxu3 %vm197_vm0, %v2373_v49 }
0x26bb   :  { %v2396_v53 = vpop.f32.mrf.mxu3 }
0x26bc   :  { %v2399_v43 = vadd.f32 %v2396_v53, %v2376_v52 }
0x26be   :  { %3814 = vtanh.f32 %v2399_v43  ;;  %v3602_v14 = vmul.f32 -1.442695, %v2399_v43 }
0x26c0   :  { %3816 = vpow2.f32 %v3602_v14 }
0x26c4   :  { %v3815_v23 = vpop.eup %3814 }
0x26c5   :  { %2422 = vrot.lane.b32.xlu0 %v3815_v23, %s4101_s30 }
0x26c6   :  { %v3817_v20 = vpop.eup %3816 }
0x26c7   :  { %v2403_v45 = vadd.f32 1.0, %v3817_v20 }
0x26c9   :  { %3818 = vrcp.f32 %v2403_v45  ;;  %v2415_v48 = vand.u32 2147483648, %v2403_v45  ;;  %vm2409_vm5 = vweird.f32 %v2403_v45  ;;  %v2413_v63 = vand.u32 2147483647, %v2403_v45 }
0x26cb   :  { %v2416_v5 = vor.u32 1.1754944e-38, %v2415_v48  ;;  %vm2414_vm10 = vcmp.eq.f32.partialorder %v2413_v63, 8.507059e+37 }
0x26cf   :  { %v3819_v54 = vpop.eup %3818 }
0x26d0   :  { %v2405_v55 = vmul.f32 %v3819_v54, %v2403_v45  ;;  %vm2410_vm2 = vweird.f32 %v3819_v54 }
0x26d1   :  { %vm2411_vm11 = vmor %vm2409_vm5, %vm2410_vm2 }
0x26d2   :  { %v2406_v57 = vsub.f32 1.0, %v2405_v55 }
0x26d4   :  { %v2407_v59 = vmul.f32 %v3819_v54, %v2406_v57 }
0x26d6   :  { %v2408_v60 = vadd.f32 %v3819_v54, %v2407_v59 }
0x26d8   :  { %v2412_v2 = vsel %vm2411_vm11, %v3819_v54, %v2408_v60 }
0x26d9   :  { %v2417_v11 = vsel %vm2414_vm10, %v2416_v5, %v2412_v2 }
0x26da   :  { %v2420_v6 = vmul.f32 %v2417_v11, %v2364_v50 }
0x2737   :  { %v2423_v10 = vpop.permute.xlu0 %2422 }
0x2738   :  { %v2425_v4 = vmul.f32 %v2423_v10, %v2417_v11 }
0x273a   :  { %2427 = vrot.lane.b32.xlu1 %v2425_v4, %s4101_s30 }
0x2742   :  { %1775 = vperm.xlu1 %3662, %v1755_v9  }
0x274a   :  { %3663 = vset.pattern.permute.xlu1 %v4100_v1 }
0x27ac   :  { %v2428_v17 = vpop.permute.xlu1 %2427 }
0x27ad   :  { %v4833_v12 = vadd.f32 %v2428_v17, %v2420_v6 }
0x27af   :  { %3820 = vtanh.f32 %v4833_v12 }
0x27b4   :  { %v1776_v8 = vpop.permute.xlu1 %1775 }
0x27b5   :  { %v3821_v18 = vpop.eup %3820  ;;  %v1779_v25 = vmul.f32 %v4647_v21, %v1776_v8 }
0x27b6   :  { %2433 = vrot.lane.b32.xlu2 %v3821_v18, %s4101_s30 }
0x27b7   :  { %v1781_v27 = vadd.f32 %v4653_v33, %v1779_v25 }
0x27be   :  { %1763 = vperm.xlu2 %3661, %v1755_v9  }
0x2810   :  { %v2434_v58 = vpop.permute.xlu2 %2433 }
0x2811   :  { %v2436_v19 = vmul.f32 %v2434_v58, %v2417_v11 }
0x2813   :  { %2438 = vrot.lane.b32.xlu0 %v2436_v19, %s4109_s5 }
0x2818   :  { %v1764_v47 = vpop.permute.xlu2 %1763 }
0x2819   :  { %v1767_v31 = vmul.f32 %v4647_v21, %v1764_v47 }
0x281b   :  { %1786 = vrot.lane.b32.xlu0 %v1781_v27, %s4101_s30  ;;  %v1769_v36 = vadd.f32 %v4653_v33, %v1767_v31 }
0x2885   :  { %v2439_v28 = vpop.permute.xlu0 %2438 }
0x2886   :  { %2441 = vst.msk [vmem:[#allocation3 + $0x4] sm:$0x3] %vm738_vm15, %v2439_v28  ;;  %3603 = vmatmul.msk.f32.vlgmr.msrb.gmra.mxu0 %vm197_vm0, %v2439_v28 }
0x288d   :  { %v1787_v37 = vpop.permute.xlu0 %1786 }
0x288e   :  { %v4846_v7 = vsel %vm197_vm0, %v1769_v36, %v1787_v37 }
0x288f   :  { %v1950_v42 = vand.u32 2139095040, %v4846_v7  ;;  %v1947_v30 = vand.u32 2147483647, %v4846_v7 }
0x2891   :  { %v1951_v40 = vshrl.u32 %v1950_v42, 23  ;;  %v1954_v61 = vand.u32 8388607, %v1947_v30 }
0x2893   :  { %v3589_v16 = vadd.s32 4294967169, %v1951_v40  ;;  %v1955_v62 = vor.u32 8388608, %v1954_v61 }
0x2895   :  { %v1957_v39 = vadd.s32 1, %v3589_v16 }
0x2897   :  { %vm1958_vm12 = vcmp.gt.s32.totalorder %v1957_v39, 0 }
0x2898   :  { %v1959_v15 = vsel %vm1958_vm12, %v1957_v39, 0 }
0x2899   :  { %v1961_v46 = vand.u32 31, %v1959_v15  ;;  %v4852_v33 = vshrl.u32 %v1959_v15, 5 }
0x289b   :  { %v1962_v21 = vsub.s32 32, %v1961_v46  ;;  %v1964_v50 = vshll.u32 %v4102_v24, %v1961_v46  ;;  %v1967_v13 = vshll.u32 %v4103_v26, %v1961_v46  ;;  %v1970_v49 = vshll.u32 %v4104_v29, %v1961_v46 }
0x289c   :  { %v1973_v53 = vshll.u32 %v4105_v32, %v1961_v46  ;;  %v1976_v23 = vshll.u32 %v4106_v35, %v1961_v46  ;;  %vm1979_vm13 = vcmp.lt.s32.totalorder %v4852_v33, 1  ;;  %vm1982_vm1 = vcmp.lt.s32.totalorder %v4852_v33, 4 }
0x289d   :  { %v1965_v51 = vshrl.u32 %v4103_v26, %v1962_v21  ;;  %v1968_v41 = vshrl.u32 %v4104_v29, %v1962_v21  ;;  %v1971_v52 = vshrl.u32 %v4105_v32, %v1962_v21  ;;  %v1974_v43 = vshrl.u32 %v4106_v35, %v1962_v21 }
0x289e   :  { %v1977_v14 = vshrl.u32 %v4107_v38, %v1962_v21  ;;  %v4865_v26 = vshll.u32 %v1955_v62, 8  ;;  %vm1981_vm14 = vcmp.lt.s32.totalorder %v4852_v33, 3  ;;  %vm1980_vm4 = vcmp.lt.s32.totalorder %v4852_v33, 2 }
0x289f   :  { %v1966_v20 = vor.u32 %v1965_v51, %v1964_v50  ;;  %v1969_v45 = vor.u32 %v1968_v41, %v1967_v13  ;;  %v1972_v54 = vor.u32 %v1971_v52, %v1970_v49  ;;  %v1975_v55 = vor.u32 %v1974_v43, %v1973_v53 }
0x28a0   :  { %v1978_v57 = vor.u32 %v1977_v14, %v1976_v23  ;;  %v1996_v2 = vand.u32 65535, %v4865_v26  ;;  %v1997_v5 = vshrl.u32 %v4865_v26, 16  ;;  %v1963_v62 = vshrl.u32 %v4102_v24, %v1962_v21 }
0x28a1   :  { %v1987_v29 = vsel %vm1979_vm13, %v1966_v20, %v1969_v45  ;;  %v1991_v32 = vsel %vm1979_vm13, %v1969_v45, %v1972_v54  ;;  %v1988_v35 = vsel %vm1982_vm1, %v1975_v55, 920167782  ;;  %v1984_v61 = vsel %vm1982_vm1, %v1972_v54, 2102212464 }
0x28a2   :  { %v1992_v38 = vsel %vm1982_vm1, %v1978_v57, 1326507024  ;;  %v1989_v59 = vsel %vm1981_vm14, %v1972_v54, %v1988_v35  ;;  %v1983_v52 = vsel %vm1979_vm13, %v1963_v62, %v1966_v20  ;;  %v1985_v53 = vsel %vm1981_vm14, %v1969_v45, %v1984_v61 }
0x28a3   :  { %v1993_v60 = vsel %vm1981_vm14, %v1975_v55, %v1992_v38  ;;  %v1990_v48 = vsel %vm1980_vm4, %v1987_v29, %v1989_v59  ;;  %v1986_v24 = vsel %vm1980_vm4, %v1983_v52, %v1985_v53  ;;  %vm1949_vm14 = vcmp.lt.s32.totalorder %v4846_v7, 0 }
0x28a4   :  { %v1994_v63 = vsel %vm1980_vm4, %v1991_v32, %v1993_v60  ;;  %v2020_v4 = vand.u32 65535, %v1990_v48  ;;  %v2021_v9 = vshrl.u32 %v1990_v48, 16  ;;  %v2040_v29 = vmul.u32 %v4865_v26, %v1986_v24  ;;  %v2442_v24 = vld [vmem:[#allocation2 + $0x6] sm:$0x3] }
0x28a5   :  { %v1998_v10 = vand.u32 65535, %v1994_v63  ;;  %v1999_v11 = vshrl.u32 %v1994_v63, 16  ;;  %vm1948_vm4 = vcmp.le.f32.partialorder %v1947_v30, 0.7853982 }
0x28a6   :  { %v2023_v18 = vmul.u32 %v2021_v9, %v1996_v2  ;;  %v2024_v58 = vmul.u32 %v2020_v4, %v1997_v5  ;;  %v2022_v27 = vmul.u32 %v2020_v4, %v1996_v2  ;;  %v2025_v36 = vmul.u32 %v2021_v9, %v1997_v5 }
0x28a7   :  { %v2001_v6 = vmul.u32 %v1999_v11, %v1996_v2  ;;  %v2002_v17 = vmul.u32 %v1998_v10, %v1997_v5  ;;  %v2000_v8 = vmul.u32 %v1998_v10, %v1996_v2  ;;  %v2003_v25 = vmul.u32 %v1999_v11, %v1997_v5 }
0x28a8   :  { %v2026_v47 = vshll.u32 %v2023_v18, 16  ;;  %v2028_v42 = vshll.u32 %v2024_v58, 16  ;;  %v2027_v41 = vshrl.u32 %v2023_v18, 16  ;;  %v2029_v14 = vshrl.u32 %v2024_v58, 16 }
0x28a9   :  { %v2004_v19 = vshll.u32 %v2001_v6, 16  ;;  %v2006_v28 = vshll.u32 %v2002_v17, 16  ;;  %v2005_v50 = vshrl.u32 %v2001_v6, 16  ;;  %v2007_v43 = vshrl.u32 %v2002_v17, 16 }
0x28aa   :  { %vm2030_vm5 = vc.u32 %v2022_v27, %v2026_v47  ;;  %v2032_v40 = vadd.s32 %v2026_v47, %v2022_v27 }
0x28ab   :  { %vm2008_vm2 = vc.u32 %v2000_v8, %v2004_v19  ;;  %v2010_v31 = vadd.s32 %v2004_v19, %v2000_v8  ;;  %v2031_v39 = vsel %vm2030_vm5, 1, %v4100_v1 }
0x28ac   :  { %v2009_v37 = vsel %vm2008_vm2, 1, %v4100_v1  ;;  %v2033_v46 = vadd.s32 %v2031_v39, %v2025_v36  ;;  %vm2034_vm10 = vc.u32 %v2032_v40, %v2028_v42  ;;  %v2036_v57 = vadd.s32 %v2032_v40, %v2028_v42 }
0x28ad   :  { %v2011_v16 = vadd.s32 %v2009_v37, %v2003_v25  ;;  %vm2012_vm11 = vc.u32 %v2010_v31, %v2006_v28  ;;  %v2035_v51 = vsel %vm2034_vm10, 1, %v4100_v1  ;;  %vm2090_vm10 = vweird.f32 %v4846_v7 }
0x28ae   :  { %v2013_v15 = vsel %vm2012_vm11, 1, %v4100_v1  ;;  %v2037_v49 = vadd.s32 %v2035_v51, %v2033_v46 }
0x28af   :  { %v2015_v13 = vadd.s32 %v2013_v15, %v2011_v16 }
0x28b0   :  { %v2038_v54 = vadd.s32 %v2037_v49, %v2027_v41 }
0x28b1   :  { %v2016_v23 = vadd.s32 %v2015_v13, %v2005_v50 }
0x28b2   :  { %v2039_v21 = vadd.s32 %v2038_v54, %v2029_v14 }
0x28b3   :  { %v2017_v55 = vadd.s32 %v2016_v23, %v2007_v43 }
0x28b4   :  { %v2043_v1 = vadd.s32 1, %v2039_v21 }
0x28b5   :  { %vm2042_vm12 = vc.u32 %v2017_v55, %v2036_v57  ;;  %v2041_v33 = vadd.s32 %v2036_v57, %v2017_v55 }
0x28b6   :  { %v2044_v32 = vsel %vm2042_vm12, %v2043_v1, %v2039_v21 }
0x28b7   :  { %v2045_v35 = vadd.s32 %v2044_v32, %v2040_v29  ;;  %v1690_v32 = vld [vmem:[#allocation2 + $0xe] sm:$0x3] }
0x28b9   :  { %v2046_v20 = vadd.s32 536870912, %v2045_v35 }
0x28bb   :  { %v2047_v38 = vshrl.u32 %v2046_v20, 30  ;;  %v2113_v20 = vld [vmem:[%s5186_s7 + $0x8] sm:$0xff] }
0x28bd   :  { %v2048_v59 = vshll.u32 %v2047_v38, 30  ;;  %v2071_v47 = vsub.s32 4, %v2047_v38 }
0x28bf   :  { %v2049_v45 = vsub.s32 %v2045_v35, %v2048_v59  ;;  %v2072_v42 = vsel %vm1949_vm14, %v2071_v47, %v2047_v38  ;;  %v1716_v35 = vadd.f32 %v4808_v0, %v1690_v32 }
0x28c0   :  { %v2074_v39 = vsel %vm1948_vm4, 0, %v2072_v42 }
0x28c1   :  { %vm2050_vm13 = vcmp.lt.s32.totalorder %v2049_v45, 0  ;;  %v2051_v60 = vsub.s32 0, %v2049_v45  ;;  %v2091_v50 = vadd.s32 3, %v2074_v39 }
0x28c3   :  { %v2052_v48 = vsel %vm2050_vm13, %v2051_v60, %v2049_v45  ;;  %v2092_v49 = vand.u32 3, %v2091_v50 }
0x28c4   :  { %v2053_v63 = vclz %v2052_v48 }
0x28c5   :  { %vm2094_vm2 = vcmp.eq.s32.totalorder %v2092_v49, 0  ;;  %vm2097_vm5 = vcmp.eq.s32.totalorder %v2092_v49, 2  ;;  %vm2093_vm11 = vcmp.lt.s32.totalorder %v2092_v49, 2 }
0x28c6   :  { %v3590_v2 = vadd.s32 4294967294, %v2053_v63 }
0x28c8   :  { %vm3591_vm1 = vcmp.lt.s32.totalorder %v3590_v2, 0 }
0x28c9   :  { %v2056_v5 = vsel %vm3591_vm1, 0, %v3590_v2 }
0x28ca   :  { %v2057_v10 = vsub.s32 32, %v2056_v5  ;;  %v2061_v11 = vsub.s32 4294967266, %v2056_v5  ;;  %v2058_v4 = vshll.u32 %v2049_v45, %v2056_v5 }
0x28cc   :  { %v2059_v9 = vshrl.u32 %v2041_v33, %v2057_v10  ;;  %v2062_v6 = vadd.s32 127, %v2061_v11 }
0x28ce   :  { %v2060_v26 = vor.u32 %v2059_v9, %v2058_v4  ;;  %v2063_v17 = vshll.u32 %v2062_v6, 23 }
0x28d0   :  { %v2064_v18 = vor.u32 4788187, %v2063_v17  ;;  %v2067_v8 = vcvt.s32.f32 %v2060_v26 }
0x28d2   :  { %v2065_v58 = vand.u32 2147483647, %v2064_v18 }
0x28d4   :  { %v2068_v19 = vmul.f32 %v2067_v8, %v2065_v58 }
0x28d6   :  { %v2069_v25 = vxor.u32 2147483648, %v2068_v19 }
0x28d8   :  { %v2070_v27 = vsel %vm1949_vm14, %v2069_v25, %v2068_v19 }
0x28d9   :  { %v2073_v28 = vsel %vm1948_vm4, %v4846_v7, %v2070_v27 }
0x28da   :  { %v2075_v31 = vmul.f32 %v2073_v28, %v2073_v28 }
0x28dc   :  { %v2076_v36 = vmul.f32 -0.001358992, %v2075_v31  ;;  %v2083_v37 = vmul.f32 -0.00019511016, %v2075_v31 }
0x28de   :  { %v2077_v40 = vadd.f32 0.041655596, %v2076_v36  ;;  %v2084_v16 = vadd.f32 0.008332121, %v2083_v37  ;;  %v2776_v36 = vld [vmem:[#allocation10 + $0x10] sm:$0xff]  ;;  %v2774_v37 = vld [vmem:[#allocation10] sm:$0xff] }
0x28e0   :  { %v2078_v61 = vmul.f32 %v2077_v40, %v2075_v31  ;;  %v2085_v15 = vmul.f32 %v2084_v16, %v2075_v31 }
0x28e2   :  { %v2079_v46 = vadd.f32 -0.4999988, %v2078_v61  ;;  %v2086_v62 = vadd.f32 -0.16666654, %v2085_v15 }
0x28e4   :  { %v2080_v13 = vmul.f32 %v2079_v46, %v2075_v31  ;;  %v2087_v51 = vmul.f32 %v2086_v62, %v2075_v31 }
0x28e6   :  { %v2081_v41 = vadd.f32 1.0, %v2080_v13  ;;  %v2088_v30 = vadd.f32 1.0, %v2087_v51 }
0x28e8   :  { %v2089_v52 = vmul.f32 %v2088_v30, %v2073_v28  ;;  %v2098_v53 = vxor.u32 2147483648, %v2081_v41 }
0x28ea   :  { %v2095_v43 = vxor.u32 2147483648, %v2089_v52  ;;  %v2099_v14 = vsel %vm2097_vm5, %v2098_v53, %v2089_v52 }
0x28ec   :  { %v2096_v23 = vsel %vm2094_vm2, %v2081_v41, %v2095_v43  ;;  %v4934_v41 = vld [vmem:[%s5151_s16] ss:$0 sm:$0xff]  ;;  %s3528_s16 = sshll.u32 %s5158_s23, 4  ;;  %s3529_s16 = int_to_ptr.hbm [resolvable:$true] %s3528_s16 }
0x28ed   :  { %v2100_v54 = vsel %vm2093_vm11, %v2096_v23, %v2099_v14 }
0x28ee   :  { %v2101_v55 = vsel %vm2090_vm10, nan, %v2100_v54 }
0x28ef   :  { %v2103_v57 = vsel %vm4375_vm3, %v2101_v55, %v4846_v7 }
0x28f0   :  { %3593 = vmatmul.msk.f32.gmra.mxu1 %vm553_vm6, %v2103_v57 }
0x2903   :  { %v2462_v21 = vpop.f32.mrf.mxu0 }
0x2904   :  { %v2465_v1 = vadd.f32 %v2462_v21, %v2442_v24 }
0x2906   :  { %3822 = vtanh.f32 %v2465_v1  ;;  %v3604_v7 = vmul.f32 -1.442695, %v2465_v1 }
0x2907   :  { %3824 = vtanh.f32 %v1716_v35 }
0x2908   :  { %3826 = vpow2.f32 %v3604_v7 }
0x290c   :  { %v3823_v29 = vpop.eup %3822 }
0x290d   :  { %2488 = vrot.lane.b32.xlu1 %v3823_v29, %s4101_s30  ;;  %v3825_v56 = vpop.eup %3824 }
0x290e   :  { %v3827_v38 = vpop.eup %3826 }
0x290f   :  { %v2469_v59 = vadd.f32 1.0, %v3827_v38 }
0x2911   :  { %3828 = vrcp.f32 %v2469_v59  ;;  %v2481_v0 = vand.u32 2147483648, %v2469_v59  ;;  %vm2475_vm6 = vweird.f32 %v2469_v59  ;;  %v2479_v5 = vand.u32 2147483647, %v2469_v59 }
0x2913   :  { %v2482_v10 = vor.u32 1.1754944e-38, %v2481_v0  ;;  %vm2480_vm13 = vcmp.eq.f32.partialorder %v2479_v5, 8.507059e+37 }
0x2915   :  { %2122 = vperm.xlu1 %3663, %v2113_v20  }
0x2917   :  { %v3829_v45 = vpop.eup %3828 }
0x2918   :  { %v2471_v60 = vmul.f32 %v3829_v45, %v2469_v59  ;;  %vm2476_vm3 = vweird.f32 %v3829_v45 }
0x2919   :  { %vm2477_vm12 = vmor %vm2475_vm6, %vm2476_vm3 }
0x291a   :  { %v2472_v48 = vsub.f32 1.0, %v2471_v60 }
0x291c   :  { %v2473_v63 = vmul.f32 %v3829_v45, %v2472_v48 }
0x291d   :  { %1739 = vrot.lane.b32.xlu1 %v3825_v56, %s4101_s30 }
0x291e   :  { %v2474_v2 = vadd.f32 %v3829_v45, %v2473_v63 }
0x2920   :  { %v2478_v33 = vsel %vm2477_vm12, %v3829_v45, %v2474_v2 }
0x2921   :  { %v2483_v4 = vsel %vm2480_vm13, %v2482_v10, %v2478_v33 }
0x2922   :  { %v2486_v8 = vmul.f32 %v2483_v4, %v4833_v12  ;;  %v2775_v12 = vld [vmem:[#allocation10 + $0x8] sm:$0xff] }
0x296d   :  { %v2156_v17 = vpop.f32.mrf.mxu1 }
0x297f   :  { %v2489_v11 = vpop.permute.xlu1 %2488 }
0x2980   :  { %v2491_v9 = vmul.f32 %v2489_v11, %v2483_v4 }
0x2982   :  { %2493 = vrot.lane.b32.xlu2 %v2491_v9, %s4101_s30 }
0x2987   :  { %v2123_v6 = vpop.permute.xlu1 %2122 }
0x2988   :  { %v2129_v26 = vmul.f32 %v4748_v22, %v2123_v6 }
0x298a   :  { %v2157_v18 = vadd.f32 %v2156_v17, %v2129_v26 }
0x298c   :  { %v2200_v58 = vadd.f32 %v4753_v34, %v2157_v18  ;;  %v2777_v34 = vld [vmem:[#allocation10 + $0x18] sm:$0xff] }
0x298d   :  { %2804 = vmatpush.msrb.mxu2 %v2777_v34 }
0x298e   :  { %3596 = vmatmul.msk.f32.gmra.mxu2 %vm197_vm0, %v2200_v58  ;;  %v4952_v58 = vld [vmem:[#allocation12 + $0x18] sm:$0xff] }
0x298f   :  { %2805 = vmatpush.msrb.mxu2 %v2776_v36  ;;  %v1740_v54 = vpop.permute.xlu1 %1739  ;;  %2835 = vmatpush.msra.mxu3 %v4952_v58 }
0x2990   :  { %2901 = vmatpush.msrb.mxu1 %v4952_v58  ;;  %2967 = vmatpush.msrb.mxu0 %v4952_v58 }
0x2991   :  { %2806 = vmatpush.msrb.mxu2 %v2775_v12 }
0x2993   :  { %2807 = vmatpush.msrb.mxu2 %v2774_v37 }
0x29dc   :  { %v2494_v19 = vpop.permute.xlu2 %2493 }
0x29dd   :  { %v4922_v25 = vadd.f32 %v2494_v19, %v2486_v8  ;;  %v4954_v8 = vld [vmem:[#allocation12 + $0x10] sm:$0xff]  ;;  %v4958_v19 = vld [vmem:[#allocation12 + $0x8] sm:$0xff] }
0x29de   :  { %2836 = vmatpush.msra.mxu3 %v4954_v8  ;;  %2902 = vmatpush.msrb.mxu1 %v4954_v8 }
0x29df   :  { %3830 = vtanh.f32 %v4922_v25  ;;  %2968 = vmatpush.msrb.mxu0 %v4954_v8 }
0x29e0   :  { %2837 = vmatpush.msra.mxu3 %v4958_v19  ;;  %2903 = vmatpush.msrb.mxu1 %v4958_v19 }
0x29e1   :  { %2969 = vmatpush.msrb.mxu0 %v4958_v19 }
0x29e5   :  { %v3831_v27 = vpop.eup %3830 }
0x29e6   :  { %2499 = vrot.lane.b32.xlu0 %v3831_v27, %s4101_s30 }
0x2a11   :  { %v2239_v47 = vpop.f32.mrf.mxu2 }
0x2a12   :  { %v2240_v28 = vadd.f32 %v4765_v44, %v2239_v47  ;;  %v3585_v44 = vmul.f32 -1.442695, %v1716_v35 }
0x2a14   :  { %2243 = vst [vmem:[#allocation2 + $0x8] sm:$0xff] %v2240_v28  ;;  %3832 = vpow2.f32 %v3585_v44 }
0x2a1a   :  { %v3833_v16 = vpop.eup %3832 }
0x2a1b   :  { %v1720_v39 = vadd.f32 1.0, %v3833_v16  ;;  %v2508_v62 = vld [vmem:[#allocation2 + $0x8] sm:$0x3]  ;;  %v2574_v28 = vld [vmem:[#allocation2 + $0xa] sm:$0x3] }
0x2a1d   :  { %3834 = vrcp.f32 %v1720_v39  ;;  %v1732_v53 = vand.u32 2147483648, %v1720_v39  ;;  %vm1726_vm14 = vweird.f32 %v1720_v39  ;;  %v1730_v23 = vand.u32 2147483647, %v1720_v39 }
0x2a1f   :  { %v1733_v55 = vor.u32 1.1754944e-38, %v1732_v53  ;;  %vm1731_vm2 = vcmp.eq.f32.partialorder %v1730_v23, 8.507059e+37 }
0x2a23   :  { %v3835_v61 = vpop.eup %3834 }
0x2a24   :  { %v1722_v15 = vmul.f32 %v3835_v61, %v1720_v39  ;;  %vm1727_vm1 = vweird.f32 %v3835_v61 }
0x2a25   :  { %vm1728_vm4 = vmor %vm1726_vm14, %vm1727_vm1 }
0x2a26   :  { %v1723_v46 = vsub.f32 1.0, %v1722_v15 }
0x2a28   :  { %v1724_v51 = vmul.f32 %v3835_v61, %v1723_v46 }
0x2a2a   :  { %v1725_v30 = vadd.f32 %v3835_v61, %v1724_v51 }
0x2a2c   :  { %v1729_v14 = vsel %vm1728_vm4, %v3835_v61, %v1725_v30 }
0x2a2d   :  { %v1734_v57 = vsel %vm1731_vm2, %v1733_v55, %v1729_v14 }
0x2a2e   :  { %v1742_v24 = vmul.f32 %v1740_v54, %v1734_v57  ;;  %v1737_v0 = vmul.f32 %v1734_v57, %v4758_v3 }
0x2a58   :  { %v2500_v22 = vpop.permute.xlu0 %2499 }
0x2a59   :  { %v2502_v31 = vmul.f32 %v2500_v22, %v2483_v4 }
0x2a5b   :  { %2504 = vrot.lane.b32.xlu2 %v2502_v31, %s4109_s5 }
0x2ab5   :  { %v2505_v42 = vpop.permute.xlu2 %2504 }
0x2ab6   :  { %2507 = vst.msk [vmem:[#allocation3 + $0x6] sm:$0x3] %vm738_vm15, %v2505_v42  ;;  %3605 = vmatmul.msk.f32.vlgmr.msra.gmra.mxu2 %vm197_vm0, %v2505_v42 }
0x2ab7   :  { %3231 = vmatpush.msra.mxu2 %v4952_v58 }
0x2ab9   :  { %3232 = vmatpush.msra.mxu2 %v4954_v8 }
0x2abb   :  { %3233 = vmatpush.msra.mxu2 %v4958_v19 }
0x2abd   :  { %v2772_v40 = vld [vmem:[#allocation3] sm:$0xff] }
0x2abe   :  { %3613 = vmatmul.msk.f32.vlgmr.msrb.gmra.mxu2 %vm197_vm0, %v2772_v40 }
0x2b39   :  { %v2528_v50 = vpop.f32.mrf.mxu2 }
0x2b3a   :  { %v2531_v13 = vadd.f32 %v2528_v50, %v2508_v62 }
0x2b3c   :  { %3836 = vtanh.f32 %v2531_v13  ;;  %v3606_v21 = vmul.f32 -1.442695, %v2531_v13 }
0x2b3e   :  { %3838 = vpow2.f32 %v3606_v21 }
0x2b41   :  { %v2809_v49 = vpop.f32.mrf.mxu2 }
0x2b42   :  { %v3837_v52 = vpop.eup %3836  ;;  %v2810_v43 = vadd.f32 %v4934_v41, %v2809_v49 }
0x2b43   :  { %2554 = vrot.lane.b32.xlu0 %v3837_v52, %s4101_s30 }
0x2b44   :  { %2815 = vst [vmem:[#allocation2] sm:$0xff] %v2810_v43  ;;  %v3839_v1 = vpop.eup %3838 }
0x2b45   :  { %v2535_v29 = vadd.f32 1.0, %v3839_v1 }
0x2b47   :  { %3840 = vrcp.f32 %v2535_v29  ;;  %v2547_v38 = vand.u32 2147483648, %v2535_v29  ;;  %vm2541_vm11 = vweird.f32 %v2535_v29  ;;  %v2545_v59 = vand.u32 2147483647, %v2535_v29 }
0x2b49   :  { %v2548_v60 = vor.u32 1.1754944e-38, %v2547_v38  ;;  %vm2546_vm3 = vcmp.eq.f32.partialorder %v2545_v59, 8.507059e+37 }
0x2b4b   :  { %1744 = vrot.lane.b32.xlu0 %v1742_v24, %s4101_s30  ;;  %v2817_v34 = vld [vmem:[#allocation2] sm:$0x3] }
0x2b4d   :  { %v3841_v32 = vpop.eup %3840 }
0x2b4e   :  { %v2537_v35 = vmul.f32 %v3841_v32, %v2535_v29  ;;  %vm2542_vm5 = vweird.f32 %v3841_v32 }
0x2b4f   :  { %vm2543_vm10 = vmor %vm2541_vm11, %vm2542_vm5 }
0x2b50   :  { %v2538_v20 = vsub.f32 1.0, %v2537_v35 }
0x2b52   :  { %v2539_v56 = vmul.f32 %v3841_v32, %v2538_v20 }
0x2b54   :  { %v2540_v7 = vadd.f32 %v3841_v32, %v2539_v56 }
0x2b56   :  { %v2544_v45 = vsel %vm2543_vm10, %v3841_v32, %v2540_v7 }
0x2b57   :  { %v2549_v63 = vsel %vm2546_vm3, %v2548_v60, %v2544_v45 }
0x2b58   :  { %v2552_v11 = vmul.f32 %v2549_v63, %v4922_v25  ;;  %v4964_v25 = vld [vmem:[#allocation12] sm:$0xff] }
0x2b59   :  { %2838 = vmatpush.msra.mxu3 %v4964_v25  ;;  %2904 = vmatpush.msrb.mxu1 %v4964_v25 }
0x2b5a   :  { %2970 = vmatpush.msrb.mxu0 %v4964_v25  ;;  %3234 = vmatpush.msra.mxu2 %v4964_v25 }
0x2bb5   :  { %v2555_v48 = vpop.permute.xlu0 %2554 }
0x2bb6   :  { %v2557_v2 = vmul.f32 %v2555_v48, %v2549_v63 }
0x2bb8   :  { %2559 = vrot.lane.b32.xlu2 %v2557_v2, %s4101_s30 }
0x2bbd   :  { %v1745_v5 = vpop.permute.xlu0 %1744 }
0x2bbe   :  { %v4941_v33 = vadd.f32 %v1745_v5, %v1737_v0 }
0x2bc0   :  { %3842 = vtanh.f32 %v4941_v33 }
0x2bc6   :  { %v3843_v10 = vpop.eup %3842 }
0x2bc7   :  { %1750 = vrot.lane.b32.xlu2 %v3843_v10, %s4101_s30 }
0x2c12   :  { %v2560_v4 = vpop.permute.xlu2 %2559 }
0x2c13   :  { %v4946_v9 = vadd.f32 %v2560_v4, %v2552_v11 }
0x2c15   :  { %3844 = vtanh.f32 %v4946_v9 }
0x2c1b   :  { %v3845_v6 = vpop.eup %3844 }
0x2c1c   :  { %2565 = vrot.lane.b32.xlu1 %v3845_v6, %s4101_s30  ;;  %v2640_v6 = vld [vmem:[#allocation2 + $0xc] sm:$0x3] }
0x2c21   :  { %v1751_v26 = vpop.permute.xlu2 %1750 }
0x2c22   :  { %v1753_v3 = vmul.f32 %v1751_v26, %v1734_v57 }
0x2c24   :  { %2819 = vrot.lane.b32.xlu1 %v1753_v3, %s4109_s5 }
0x2c8e   :  { %v2566_v17 = vpop.permute.xlu1 %2565 }
0x2c8f   :  { %v2568_v18 = vmul.f32 %v2566_v17, %v2549_v63 }
0x2c91   :  { %2570 = vrot.lane.b32.xlu0 %v2568_v18, %s4109_s5  ;;  %v2886_v18 = vld [vmem:[#allocation2 + $0x2] sm:$0x3] }
0x2c96   :  { %v2820_v47 = vpop.permute.xlu1 %2819 }
0x2d03   :  { %v2571_v27 = vpop.permute.xlu0 %2570 }
0x2d04   :  { %2573 = vst.msk [vmem:[#allocation3 + $0x8] sm:$0x3] %vm738_vm15, %v2571_v27  ;;  %3607 = vmatmul.msk.f32.vlgmr.msrb.gmra.mxu3 %vm197_vm0, %v2571_v27 }
0x2d05   :  { %3033 = vmatpush.msrb.mxu3 %v4952_v58 }
0x2d07   :  { %3034 = vmatpush.msrb.mxu3 %v4954_v8 }
0x2d09   :  { %3035 = vmatpush.msrb.mxu3 %v4958_v19 }
0x2d0b   :  { %3036 = vmatpush.msrb.mxu3 %v4964_v25 }
0x2d0c   :  { %3615 = vmatmul.msk.f32.vlgmr.msra.gmra.mxu3 %vm197_vm0, %v2820_v47 }
0x2d0d   :  { %3297 = vmatpush.msra.mxu3 %v4952_v58 }
0x2d0f   :  { %3298 = vmatpush.msra.mxu3 %v4954_v8 }
0x2d11   :  { %3299 = vmatpush.msra.mxu3 %v4958_v19 }
0x2d13   :  { %3300 = vmatpush.msra.mxu3 %v4964_v25 }
0x2d87   :  { %v2594_v22 = vpop.f32.mrf.mxu3 }
0x2d88   :  { %v2597_v31 = vadd.f32 %v2594_v22, %v2574_v28 }
0x2d8a   :  { %3846 = vtanh.f32 %v2597_v31  ;;  %v3608_v40 = vmul.f32 -1.442695, %v2597_v31 }
0x2d8f   :  { %v2840_v36 = vpop.f32.mrf.mxu3 }
0x2d90   :  { %v3847_v12 = vpop.eup %3846  ;;  %v2843_v37 = vadd.f32 %v2840_v36, %v2817_v34 }
0x2d91   :  { %2620 = vrot.lane.b32.xlu2 %v3847_v12, %s4101_s30 }
0x2d92   :  { %3848 = vtanh.f32 %v2843_v37  ;;  %v3616_v46 = vmul.f32 -1.442695, %v2843_v37 }
0x2d93   :  { %3850 = vpow2.f32 %v3608_v40 }
0x2d98   :  { %v3849_v42 = vpop.eup %3848 }
0x2d99   :  { %2866 = vrot.lane.b32.xlu0 %v3849_v42, %s4101_s30  ;;  %v3851_v44 = vpop.eup %3850 }
0x2d9a   :  { %v2601_v16 = vadd.f32 1.0, %v3851_v44 }
0x2d9c   :  { %3852 = vrcp.f32 %v2601_v16  ;;  %v2613_v13 = vand.u32 2147483648, %v2601_v16  ;;  %vm2607_vm12 = vweird.f32 %v2601_v16  ;;  %v2611_v51 = vand.u32 2147483647, %v2601_v16 }
0x2d9d   :  { %3854 = vpow2.f32 %v3616_v46 }
0x2d9e   :  { %v2614_v52 = vor.u32 1.1754944e-38, %v2613_v13  ;;  %vm2612_vm1 = vcmp.eq.f32.partialorder %v2611_v51, 8.507059e+37 }
0x2da2   :  { %v3853_v39 = vpop.eup %3852 }
0x2da3   :  { %v2603_v61 = vmul.f32 %v3853_v39, %v2601_v16  ;;  %vm2608_vm6 = vweird.f32 %v3853_v39  ;;  %v3855_v30 = vpop.eup %3854 }
0x2da4   :  { %vm2609_vm13 = vmor %vm2607_vm12, %vm2608_vm6  ;;  %v2847_v53 = vadd.f32 1.0, %v3855_v30 }
0x2da5   :  { %v2604_v15 = vsub.f32 1.0, %v2603_v61 }
0x2da6   :  { %3856 = vrcp.f32 %v2847_v53  ;;  %v2859_v1 = vand.u32 2147483648, %v2847_v53  ;;  %vm2853_vm4 = vweird.f32 %v2847_v53  ;;  %v2857_v29 = vand.u32 2147483647, %v2847_v53 }
0x2da7   :  { %v2605_v62 = vmul.f32 %v3853_v39, %v2604_v15 }
0x2da8   :  { %v2860_v35 = vor.u32 1.1754944e-38, %v2859_v1  ;;  %vm2858_vm5 = vcmp.eq.f32.partialorder %v2857_v29, 8.507059e+37 }
0x2da9   :  { %v2606_v50 = vadd.f32 %v3853_v39, %v2605_v62 }
0x2dab   :  { %v2610_v49 = vsel %vm2609_vm13, %v3853_v39, %v2606_v50 }
0x2dac   :  { %v2615_v43 = vsel %vm2612_vm1, %v2614_v52, %v2610_v49  ;;  %v3857_v54 = vpop.eup %3856 }
0x2dad   :  { %v2849_v55 = vmul.f32 %v3857_v54, %v2847_v53  ;;  %vm2854_vm14 = vweird.f32 %v3857_v54  ;;  %v2618_v38 = vmul.f32 %v2615_v43, %v4946_v9 }
0x2dae   :  { %vm2855_vm2 = vmor %vm2853_vm4, %vm2854_vm14 }
0x2daf   :  { %v2850_v57 = vsub.f32 1.0, %v2849_v55 }
0x2db1   :  { %v2851_v24 = vmul.f32 %v3857_v54, %v2850_v57 }
0x2db3   :  { %v2852_v21 = vadd.f32 %v3857_v54, %v2851_v24 }
0x2db5   :  { %v2856_v32 = vsel %vm2855_vm2, %v3857_v54, %v2852_v21 }
0x2db6   :  { %v2861_v56 = vsel %vm2858_vm5, %v2860_v35, %v2856_v32 }
0x2db7   :  { %v2864_v60 = vmul.f32 %v2861_v56, %v4941_v33 }
0x2deb   :  { %v2621_v23 = vpop.permute.xlu2 %2620 }
0x2dec   :  { %v2623_v14 = vmul.f32 %v2621_v23, %v2615_v43 }
0x2dee   :  { %2625 = vrot.lane.b32.xlu1 %v2623_v14, %s4101_s30 }
0x2e0b   :  { %v2867_v20 = vpop.permute.xlu0 %2866 }
0x2e0c   :  { %v2869_v7 = vmul.f32 %v2867_v20, %v2861_v56 }
0x2e0e   :  { %2871 = vrot.lane.b32.xlu2 %v2869_v7, %s4101_s30 }
0x2e60   :  { %v2626_v59 = vpop.permute.xlu1 %2625 }
0x2e61   :  { %v4992_v45 = vadd.f32 %v2626_v59, %v2618_v38 }
0x2e63   :  { %3858 = vtanh.f32 %v4992_v45 }
0x2e68   :  { %v2872_v48 = vpop.permute.xlu2 %2871 }
0x2e69   :  { %v3859_v63 = vpop.eup %3858  ;;  %v4996_v2 = vadd.f32 %v2872_v48, %v2864_v60 }
0x2e6a   :  { %2631 = vrot.lane.b32.xlu0 %v3859_v63, %s4101_s30 }
0x2e6b   :  { %3860 = vtanh.f32 %v4996_v2 }
0x2e71   :  { %v3861_v0 = vpop.eup %3860 }
0x2e72   :  { %2877 = vrot.lane.b32.xlu1 %v3861_v0, %s4101_s30 }
0x2edc   :  { %v2632_v5 = vpop.permute.xlu0 %2631 }
0x2edd   :  { %v2634_v10 = vmul.f32 %v2632_v5, %v2615_v43  ;;  %v2952_v5 = vld [vmem:[#allocation2 + $0x4] sm:$0x3] }
0x2edf   :  { %2636 = vrot.lane.b32.xlu2 %v2634_v10, %s4109_s5 }
0x2ee4   :  { %v2878_v11 = vpop.permute.xlu1 %2877 }
0x2ee5   :  { %v2880_v4 = vmul.f32 %v2878_v11, %v2861_v56 }
0x2ee7   :  { %2882 = vrot.lane.b32.xlu0 %v2880_v4, %s4109_s5 }
0x2f39   :  { %v2637_v33 = vpop.permute.xlu2 %2636 }
0x2f3a   :  { %2639 = vst.msk [vmem:[#allocation3 + $0xa] sm:$0x3] %vm738_vm15, %v2637_v33  ;;  %3609 = vmatmul.msk.f32.vlgmr.msra.gmra.mxu1 %vm197_vm0, %v2637_v33 }
0x2f3b   :  { %3099 = vmatpush.msra.mxu1 %v4952_v58 }
0x2f3d   :  { %3100 = vmatpush.msra.mxu1 %v4954_v8 }
0x2f3f   :  { %3101 = vmatpush.msra.mxu1 %v4958_v19 }
0x2f41   :  { %3102 = vmatpush.msra.mxu1 %v4964_v25 }
0x2f59   :  { %v2883_v9 = vpop.permute.xlu0 %2882 }
0x2f5a   :  { %2885 = vst.msk [vmem:[#allocation3] sm:$0x3] %vm738_vm15, %v2883_v9  ;;  %3617 = vmatmul.msk.f32.vlgmr.msrb.gmra.mxu1 %vm197_vm0, %v2883_v9 }
0x2fb7   :  { %v2660_v26 = vpop.f32.mrf.mxu1 }
0x2fb8   :  { %v2663_v3 = vadd.f32 %v2660_v26, %v2640_v6 }
0x2fba   :  { %3862 = vtanh.f32 %v2663_v3  ;;  %v3610_v22 = vmul.f32 -1.442695, %v2663_v3 }
0x2fc0   :  { %v3863_v17 = vpop.eup %3862 }
0x2fc1   :  { %2686 = vrot.lane.b32.xlu1 %v3863_v17, %s4101_s30 }
0x2fd7   :  { %v2906_v27 = vpop.f32.mrf.mxu1 }
0x2fd8   :  { %v2909_v47 = vadd.f32 %v2906_v27, %v2886_v18 }
0x2fda   :  { %3864 = vtanh.f32 %v2909_v47  ;;  %v3618_v31 = vmul.f32 -1.442695, %v2909_v47  ;;  %v2706_v47 = vld [vmem:[#allocation2 + $0xe] sm:$0x3] }
0x2fdb   :  { %3866 = vpow2.f32 %v3610_v22 }
0x2fdc   :  { %3868 = vpow2.f32 %v3618_v31 }
0x2fe0   :  { %v3865_v28 = vpop.eup %3864 }
0x2fe1   :  { %2932 = vrot.lane.b32.xlu2 %v3865_v28, %s4101_s30  ;;  %v3867_v34 = vpop.eup %3866 }
0x2fe2   :  { %v2667_v36 = vadd.f32 1.0, %v3867_v34  ;;  %v3869_v12 = vpop.eup %3868 }
0x2fe3   :  { %v2913_v37 = vadd.f32 1.0, %v3869_v12 }
0x2fe4   :  { %3870 = vrcp.f32 %v2667_v36  ;;  %v2679_v62 = vand.u32 2147483648, %v2667_v36  ;;  %vm2673_vm10 = vweird.f32 %v2667_v36  ;;  %v2677_v50 = vand.u32 2147483647, %v2667_v36 }
0x2fe5   :  { %3872 = vrcp.f32 %v2913_v37  ;;  %v2925_v23 = vand.u32 2147483648, %v2913_v37  ;;  %vm2919_vm13 = vweird.f32 %v2913_v37  ;;  %v2923_v14 = vand.u32 2147483647, %v2913_v37 }
0x2fe6   :  { %v2680_v30 = vor.u32 1.1754944e-38, %v2679_v62  ;;  %vm2678_vm6 = vcmp.eq.f32.partialorder %v2677_v50, 8.507059e+37 }
0x2fe7   :  { %v2926_v55 = vor.u32 1.1754944e-38, %v2925_v23  ;;  %vm2924_vm14 = vcmp.eq.f32.partialorder %v2923_v14, 8.507059e+37 }
0x2fea   :  { %v3871_v42 = vpop.eup %3870 }
0x2feb   :  { %v2669_v40 = vmul.f32 %v3871_v42, %v2667_v36  ;;  %v3873_v16 = vpop.eup %3872  ;;  %vm2674_vm11 = vweird.f32 %v3871_v42 }
0x2fec   :  { %v2915_v61 = vmul.f32 %v3873_v16, %v2913_v37  ;;  %vm2675_vm3 = vmor %vm2673_vm10, %vm2674_vm11  ;;  %vm2920_vm12 = vweird.f32 %v3873_v16 }
0x2fed   :  { %v2670_v44 = vsub.f32 1.0, %v2669_v40  ;;  %vm2921_vm1 = vmor %vm2919_vm13, %vm2920_vm12 }
0x2fee   :  { %v2916_v46 = vsub.f32 1.0, %v2915_v61 }
0x2fef   :  { %v2671_v39 = vmul.f32 %v3871_v42, %v2670_v44 }
0x2ff0   :  { %v2917_v51 = vmul.f32 %v3873_v16, %v2916_v46 }
0x2ff1   :  { %v2672_v15 = vadd.f32 %v3871_v42, %v2671_v39 }
0x2ff2   :  { %v2918_v43 = vadd.f32 %v3873_v16, %v2917_v51 }
0x2ff3   :  { %v2676_v13 = vsel %vm2675_vm3, %v3871_v42, %v2672_v15 }
0x2ff4   :  { %v2681_v52 = vsel %vm2678_vm6, %v2680_v30, %v2676_v13  ;;  %v2922_v54 = vsel %vm2921_vm1, %v3873_v16, %v2918_v43 }
0x2ff5   :  { %v2927_v24 = vsel %vm2924_vm14, %v2926_v55, %v2922_v54  ;;  %v2684_v1 = vmul.f32 %v2681_v52, %v4992_v45  ;;  %v3018_v55 = vld [vmem:[#allocation2 + $0x6] sm:$0x3] }
0x2ff6   :  { %v2930_v35 = vmul.f32 %v2927_v24, %v4996_v2 }
0x3033   :  { %v2687_v49 = vpop.permute.xlu1 %2686 }
0x3034   :  { %v2689_v53 = vmul.f32 %v2687_v49, %v2681_v52 }
0x3036   :  { %2691 = vrot.lane.b32.xlu0 %v2689_v53, %s4101_s30 }
0x303b   :  { %v2933_v57 = vpop.permute.xlu2 %2932 }
0x303c   :  { %v2935_v21 = vmul.f32 %v2933_v57, %v2927_v24 }
0x303e   :  { %2937 = vrot.lane.b32.xlu1 %v2935_v21, %s4101_s30 }
0x30a8   :  { %v2692_v29 = vpop.permute.xlu0 %2691 }
0x30a9   :  { %v5016_v32 = vadd.f32 %v2692_v29, %v2684_v1 }
0x30ab   :  { %3874 = vtanh.f32 %v5016_v32 }
0x30b0   :  { %v2938_v20 = vpop.permute.xlu1 %2937 }
0x30b1   :  { %v3875_v56 = vpop.eup %3874  ;;  %v2940_v7 = vadd.f32 %v2938_v20, %v2930_v35 }
0x30b2   :  { %2697 = vrot.lane.b32.xlu2 %v3875_v56, %s4101_s30 }
0x30b3   :  { %3876 = vtanh.f32 %v2940_v7 }
0x30b9   :  { %v3877_v38 = vpop.eup %3876 }
0x30ba   :  { %2943 = vrot.lane.b32.xlu0 %v3877_v38, %s4101_s30 }
0x310c   :  { %v2698_v59 = vpop.permute.xlu2 %2697 }
0x310d   :  { %v2700_v60 = vmul.f32 %v2698_v59, %v2681_v52 }
0x310f   :  { %2702 = vrot.lane.b32.xlu1 %v2700_v60, %s4109_s5 }
0x312c   :  { %v2944_v45 = vpop.permute.xlu0 %2943 }
0x312d   :  { %v2946_v48 = vmul.f32 %v2944_v45, %v2927_v24 }
0x312f   :  { %2948 = vrot.lane.b32.xlu2 %v2946_v48, %s4109_s5 }
0x3181   :  { %v2703_v63 = vpop.permute.xlu1 %2702 }
0x3182   :  { %2705 = vst.msk [vmem:[#allocation3 + $0xc] sm:$0x3] %vm738_vm15, %v2703_v63  ;;  %3611 = vmatmul.msk.f32.vlgmr.msra.gmra.mxu0 %vm197_vm0, %v2703_v63 }
0x3183   :  { %3165 = vmatpush.msra.mxu0 %v4952_v58 }
0x3185   :  { %3166 = vmatpush.msra.mxu0 %v4954_v8 }
0x3187   :  { %3167 = vmatpush.msra.mxu0 %v4958_v19 }
0x3189   :  { %v2949_v2 = vpop.permute.xlu2 %2948  ;;  %3168 = vmatpush.msra.mxu0 %v4964_v25 }
0x318a   :  { %2951 = vst.msk [vmem:[#allocation3 + $0x2] sm:$0x3] %vm738_vm15, %v2949_v2  ;;  %3619 = vmatmul.msk.f32.vlgmr.msrb.gmra.mxu0 %vm197_vm0, %v2949_v2 }
0x31ff   :  { %v2726_v0 = vpop.f32.mrf.mxu0 }
0x3200   :  { %v2729_v28 = vadd.f32 %v2726_v0, %v2706_v47  ;;  %v3353_v47 = vld [vmem:[%s5152_s17 + $0x18] sm:$0xff] }
0x3201   :  { %3376 = vmatpush.msrb.mxu1 %v3353_v47 }
0x3202   :  { %v3612_v44 = vmul.f32 -1.442695, %v2729_v28 }
0x3207   :  { %v2972_v10 = vpop.f32.mrf.mxu0 }
0x3208   :  { %v2975_v11 = vadd.f32 %v2972_v10, %v2952_v5 }
0x320a   :  { %3878 = vtanh.f32 %v2975_v11  ;;  %v3620_v58 = vmul.f32 -1.442695, %v2975_v11 }
0x320c   :  { %3880 = vpow2.f32 %v3620_v58 }
0x3210   :  { %v3879_v4 = vpop.eup %3878 }
0x3211   :  { %2998 = vrot.lane.b32.xlu0 %v3879_v4, %s4101_s30 }
0x3212   :  { %v3881_v8 = vpop.eup %3880 }
0x3213   :  { %v2979_v33 = vadd.f32 1.0, %v3881_v8 }
0x3215   :  { %3882 = vrcp.f32 %v2979_v33  ;;  %v2991_v3 = vand.u32 2147483648, %v2979_v33  ;;  %vm2985_vm2 = vweird.f32 %v2979_v33  ;;  %v2989_v17 = vand.u32 2147483647, %v2979_v33 }
0x3216   :  { %3884 = vtanh.f32 %v2729_v28  ;;  %v3352_v28 = vld [vmem:[%s5152_s17 + $0x10] sm:$0xff] }
0x3217   :  { %v2992_v27 = vor.u32 1.1754944e-38, %v2991_v3  ;;  %vm2990_vm11 = vcmp.eq.f32.partialorder %v2989_v17, 8.507059e+37  ;;  %3377 = vmatpush.msrb.mxu1 %v3352_v28 }
0x321b   :  { %v3883_v19 = vpop.eup %3882 }
0x321c   :  { %v2981_v9 = vmul.f32 %v3883_v19, %v2979_v33  ;;  %vm2986_vm4 = vweird.f32 %v3883_v19  ;;  %v3885_v36 = vpop.eup %3884 }
0x321d   :  { %vm2987_vm5 = vmor %vm2985_vm2, %vm2986_vm4 }
0x321e   :  { %v2982_v25 = vsub.f32 1.0, %v2981_v9 }
0x3220   :  { %v2983_v6 = vmul.f32 %v3883_v19, %v2982_v25 }
0x3222   :  { %v2984_v26 = vadd.f32 %v3883_v19, %v2983_v6 }
0x3224   :  { %v2988_v18 = vsel %vm2987_vm5, %v3883_v19, %v2984_v26 }
0x3225   :  { %v2993_v31 = vsel %vm2990_vm11, %v2992_v27, %v2988_v18 }
0x3226   :  { %v2996_v12 = vmul.f32 %v2993_v31, %v2940_v7 }
0x3283   :  { %v2999_v22 = vpop.permute.xlu0 %2998 }
0x3284   :  { %v3001_v34 = vmul.f32 %v2999_v22, %v2993_v31  ;;  %v3351_v22 = vld [vmem:[%s5152_s17 + $0x8] sm:$0xff] }
0x3285   :  { %3378 = vmatpush.msrb.mxu1 %v3351_v22 }
0x3286   :  { %3003 = vrot.lane.b32.xlu1 %v3001_v34, %s4101_s30 }
0x328e   :  { %2752 = vrot.lane.b32.xlu1 %v3885_v36, %s4101_s30 }
0x32f8   :  { %v3004_v37 = vpop.permute.xlu1 %3003 }
0x32f9   :  { %v5035_v42 = vadd.f32 %v3004_v37, %v2996_v12 }
0x32fb   :  { %3886 = vtanh.f32 %v5035_v42 }
0x32fc   :  { %3888 = vpow2.f32 %v3612_v44 }
0x3300   :  { %v2753_v43 = vpop.permute.xlu1 %2752 }
0x3301   :  { %v3887_v40 = vpop.eup %3886 }
0x3302   :  { %3009 = vrot.lane.b32.xlu2 %v3887_v40, %s4101_s30  ;;  %v3889_v16 = vpop.eup %3888 }
0x3303   :  { %v2733_v39 = vadd.f32 1.0, %v3889_v16 }
0x3305   :  { %3890 = vrcp.f32 %v2733_v39  ;;  %v2745_v30 = vand.u32 2147483648, %v2733_v39  ;;  %vm2739_vm3 = vweird.f32 %v2733_v39  ;;  %v2743_v49 = vand.u32 2147483647, %v2733_v39 }
0x3307   :  { %v2746_v53 = vor.u32 1.1754944e-38, %v2745_v30  ;;  %vm2744_vm12 = vcmp.eq.f32.partialorder %v2743_v49, 8.507059e+37 }
0x330b   :  { %v3891_v61 = vpop.eup %3890 }
0x330c   :  { %v2735_v15 = vmul.f32 %v3891_v61, %v2733_v39  ;;  %vm2740_vm10 = vweird.f32 %v3891_v61 }
0x330d   :  { %vm2741_vm6 = vmor %vm2739_vm3, %vm2740_vm10 }
0x330e   :  { %v2736_v46 = vsub.f32 1.0, %v2735_v15 }
0x3310   :  { %v2737_v62 = vmul.f32 %v3891_v61, %v2736_v46 }
0x3312   :  { %v2738_v13 = vadd.f32 %v3891_v61, %v2737_v62 }
0x3314   :  { %v2742_v52 = vsel %vm2741_vm6, %v3891_v61, %v2738_v13 }
0x3315   :  { %v2747_v23 = vsel %vm2744_vm12, %v2746_v53, %v2742_v52 }
0x3316   :  { %v2755_v14 = vmul.f32 %v2753_v43, %v2747_v23  ;;  %v2750_v1 = vmul.f32 %v2747_v23, %v5016_v32 }
0x335c   :  { %v3010_v50 = vpop.permute.xlu2 %3009 }
0x335d   :  { %v3012_v51 = vmul.f32 %v3010_v50, %v2993_v31  ;;  %v3350_v31 = vld [vmem:[%s5152_s17] sm:$0xff] }
0x335e   :  { %3379 = vmatpush.msrb.mxu1 %v3350_v31 }
0x335f   :  { %3014 = vrot.lane.b32.xlu0 %v3012_v51, %s4109_s5 }
0x3367   :  { %2757 = vrot.lane.b32.xlu0 %v2755_v14, %s4101_s30 }
0x33d1   :  { %v3015_v54 = vpop.permute.xlu0 %3014 }
0x33d2   :  { %3017 = vst.msk [vmem:[#allocation3 + $0x4] sm:$0x3] %vm738_vm15, %v3015_v54  ;;  %3621 = vmatmul.msk.f32.vlgmr.msrb.gmra.mxu3 %vm197_vm0, %v3015_v54 }
0x33d9   :  { %v2758_v21 = vpop.permute.xlu0 %2757 }
0x33da   :  { %v2760_v29 = vadd.f32 %v2758_v21, %v2750_v1 }
0x3455   :  { %v3038_v57 = vpop.f32.mrf.mxu3 }
0x3456   :  { %v3041_v24 = vadd.f32 %v3038_v57, %v3018_v55 }
0x3458   :  { %3892 = vtanh.f32 %v3041_v24  ;;  %v3622_v56 = vmul.f32 -1.442695, %v3041_v24 }
0x3459   :  { %3894 = vtanh.f32 %v2760_v29 }
0x345a   :  { %3896 = vpow2.f32 %v3622_v56 }
0x345e   :  { %v3893_v35 = vpop.eup %3892 }
0x345f   :  { %3064 = vrot.lane.b32.xlu2 %v3893_v35, %s4101_s30  ;;  %v3895_v20 = vpop.eup %3894 }
0x3460   :  { %v3897_v7 = vpop.eup %3896 }
0x3461   :  { %v3045_v38 = vadd.f32 1.0, %v3897_v7 }
0x3463   :  { %3898 = vrcp.f32 %v3045_v38  ;;  %v3057_v32 = vand.u32 2147483648, %v3045_v38  ;;  %vm3051_vm1 = vweird.f32 %v3045_v38  ;;  %v3055_v2 = vand.u32 2147483647, %v3045_v38 }
0x3465   :  { %v3058_v5 = vor.u32 1.1754944e-38, %v3057_v32  ;;  %vm3056_vm4 = vcmp.eq.f32.partialorder %v3055_v2, 8.507059e+37 }
0x3467   :  { %2763 = vrot.lane.b32.xlu2 %v3895_v20, %s4101_s30 }
0x3469   :  { %v3899_v59 = vpop.eup %3898 }
0x346a   :  { %v3047_v60 = vmul.f32 %v3899_v59, %v3045_v38  ;;  %vm3052_vm13 = vweird.f32 %v3899_v59 }
0x346b   :  { %vm3053_vm14 = vmor %vm3051_vm1, %vm3052_vm13 }
0x346c   :  { %v3048_v45 = vsub.f32 1.0, %v3047_v60 }
0x346e   :  { %v3049_v48 = vmul.f32 %v3899_v59, %v3048_v45 }
0x3470   :  { %v3050_v63 = vadd.f32 %v3899_v59, %v3049_v48 }
0x3472   :  { %v3054_v0 = vsel %vm3053_vm14, %v3899_v59, %v3050_v63 }
0x3473   :  { %v3059_v11 = vsel %vm3056_vm4, %v3058_v5, %v3054_v0 }
0x3474   :  { %v3062_v33 = vmul.f32 %v3059_v11, %v5035_v42 }
0x34b9   :  { %v3065_v10 = vpop.permute.xlu2 %3064 }
0x34ba   :  { %v3067_v4 = vmul.f32 %v3065_v10, %v3059_v11 }
0x34bc   :  { %3069 = vrot.lane.b32.xlu1 %v3067_v4, %s4101_s30 }
0x34c1   :  { %v2764_v58 = vpop.permute.xlu2 %2763 }
0x34c2   :  { %v2766_v8 = vmul.f32 %v2764_v58, %v2747_v23 }
0x34c4   :  { %2768 = vrot.lane.b32.xlu1 %v2766_v8, %s4109_s5 }
0x352e   :  { %v3070_v19 = vpop.permute.xlu1 %3069 }
0x352f   :  { %v3072_v9 = vadd.f32 %v3070_v19, %v3062_v33 }
0x3531   :  { %3900 = vtanh.f32 %v3072_v9 }
0x3536   :  { %v2769_v25 = vpop.permute.xlu1 %2768 }
0x3537   :  { %v3901_v6 = vpop.eup %3900  ;;  %2771 = vst.msk [vmem:[#allocation3 + $0xe] sm:$0x3] %vm738_vm15, %v2769_v25 }
0x3538   :  { %3075 = vrot.lane.b32.xlu0 %v3901_v6, %s4101_s30 }
0x353e   :  { %v2773_v26 = vld [vmem:[#allocation3 + $0x8] sm:$0xff] }
0x353f   :  { %3614 = vmatmul.msk.f32.gmra.mxu2 %vm197_vm0, %v2773_v26 }
0x35aa   :  { %v3076_v3 = vpop.permute.xlu0 %3075 }
0x35ab   :  { %v3078_v17 = vmul.f32 %v3076_v3, %v3059_v11 }
0x35ad   :  { %3080 = vrot.lane.b32.xlu2 %v3078_v17, %s4109_s5 }
0x35c2   :  { %v2812_v18 = vpop.f32.mrf.mxu2 }
0x35c3   :  { %v2813_v27 = vadd.f32 %v4934_v41, %v2812_v18 }
0x35c5   :  { %2816 = vst [vmem:[#allocation2 + $0x8] sm:$0xff] %v2813_v27 }
0x35cc   :  { %v3084_v36 = vld [vmem:[#allocation2 + $0x8] sm:$0x3]  ;;  %v3150_v21 = vld [vmem:[#allocation2 + $0xa] sm:$0x3]  ;;  %v3216_v6 = vld [vmem:[#allocation2 + $0xc] sm:$0x3] }
0x3607   :  { %v3081_v41 = vpop.permute.xlu2 %3080 }
0x3608   :  { %3083 = vst.msk [vmem:[#allocation3 + $0x6] sm:$0x3] %vm738_vm15, %v3081_v41  ;;  %3623 = vmatmul.msk.f32.vlgmr.msra.gmra.mxu1 %vm197_vm0, %v3081_v41 }
0x360f   :  { %v3348_v34 = vld [vmem:[#allocation3] sm:$0xff] }
0x3610   :  { %3631 = vmatmul.msk.f32.vlgmr.msrb.gmra.mxu1 %vm197_vm0, %v3348_v34 }
0x3685   :  { %v3104_v12 = vpop.f32.mrf.mxu1 }
0x3686   :  { %v3107_v37 = vadd.f32 %v3104_v12, %v3084_v36 }
0x3688   :  { %3902 = vtanh.f32 %v3107_v37  ;;  %v3624_v40 = vmul.f32 -1.442695, %v3107_v37 }
0x368a   :  { %3904 = vpow2.f32 %v3624_v40 }
0x368e   :  { %v3903_v42 = vpop.eup %3902 }
0x368f   :  { %3130 = vrot.lane.b32.xlu0 %v3903_v42, %s4101_s30 }
0x3690   :  { %v3905_v44 = vpop.eup %3904 }
0x3691   :  { %v3111_v16 = vadd.f32 1.0, %v3905_v44 }
0x3693   :  { %3906 = vrcp.f32 %v3111_v16  ;;  %v3123_v50 = vand.u32 2147483648, %v3111_v16  ;;  %vm3117_vm5 = vweird.f32 %v3111_v16  ;;  %v3121_v13 = vand.u32 2147483647, %v3111_v16 }
0x3695   :  { %v3124_v30 = vor.u32 1.1754944e-38, %v3123_v50  ;;  %vm3122_vm10 = vcmp.eq.f32.partialorder %v3121_v13, 8.507059e+37 }
0x3699   :  { %v3907_v39 = vpop.eup %3906 }
0x369a   :  { %v3113_v61 = vmul.f32 %v3907_v39, %v3111_v16  ;;  %vm3118_vm2 = vweird.f32 %v3907_v39 }
0x369b   :  { %vm3119_vm11 = vmor %vm3117_vm5, %vm3118_vm2 }
0x369c   :  { %v3114_v15 = vsub.f32 1.0, %v3113_v61 }
0x369e   :  { %v3115_v46 = vmul.f32 %v3907_v39, %v3114_v15 }
0x36a0   :  { %v3116_v62 = vadd.f32 %v3907_v39, %v3115_v46 }
0x36a2   :  { %v3120_v51 = vsel %vm3119_vm11, %v3907_v39, %v3116_v62 }
0x36a3   :  { %v3125_v52 = vsel %vm3122_vm10, %v3124_v30, %v3120_v51  ;;  %v3282_v51 = vld [vmem:[#allocation2 + $0xe] sm:$0x3] }
0x36a4   :  { %v3128_v43 = vmul.f32 %v3125_v52, %v3072_v9 }
0x3701   :  { %v3131_v49 = vpop.permute.xlu0 %3130 }
0x3702   :  { %v3133_v53 = vmul.f32 %v3131_v49, %v3125_v52 }
0x3704   :  { %3135 = vrot.lane.b32.xlu1 %v3133_v53, %s4101_s30 }
0x3776   :  { %v3136_v23 = vpop.permute.xlu1 %3135 }
0x3777   :  { %v3138_v14 = vadd.f32 %v3136_v23, %v3128_v43 }
0x3779   :  { %3908 = vtanh.f32 %v3138_v14 }
0x377f   :  { %v3909_v54 = vpop.eup %3908 }
0x3780   :  { %3141 = vrot.lane.b32.xlu2 %v3909_v54, %s4101_s30 }
0x37da   :  { %v3142_v55 = vpop.permute.xlu2 %3141 }
0x37db   :  { %v3144_v57 = vmul.f32 %v3142_v55, %v3125_v52 }
0x37dd   :  { %3146 = vrot.lane.b32.xlu0 %v3144_v57, %s4109_s5 }
0x384f   :  { %v3147_v24 = vpop.permute.xlu0 %3146 }
0x3850   :  { %3149 = vst.msk [vmem:[#allocation3 + $0x8] sm:$0x3] %vm738_vm15, %v3147_v24  ;;  %3625 = vmatmul.msk.f32.vlgmr.msra.gmra.mxu0 %vm197_vm0, %v3147_v24 }
0x38cd   :  { %v3170_v1 = vpop.f32.mrf.mxu0 }
0x38ce   :  { %v3173_v29 = vadd.f32 %v3170_v1, %v3150_v21 }
0x38d0   :  { %3910 = vtanh.f32 %v3173_v29  ;;  %v3626_v20 = vmul.f32 -1.442695, %v3173_v29 }
0x38d2   :  { %3912 = vpow2.f32 %v3626_v20 }
0x38d6   :  { %v3911_v35 = vpop.eup %3910 }
0x38d7   :  { %3196 = vrot.lane.b32.xlu1 %v3911_v35, %s4101_s30 }
0x38d8   :  { %v3913_v56 = vpop.eup %3912 }
0x38d9   :  { %v3177_v7 = vadd.f32 1.0, %v3913_v56 }
0x38db   :  { %3914 = vrcp.f32 %v3177_v7  ;;  %v3189_v63 = vand.u32 2147483648, %v3177_v7  ;;  %vm3183_vm6 = vweird.f32 %v3177_v7  ;;  %v3187_v32 = vand.u32 2147483647, %v3177_v7 }
0x38dd   :  { %v3190_v0 = vor.u32 1.1754944e-38, %v3189_v63  ;;  %vm3188_vm13 = vcmp.eq.f32.partialorder %v3187_v32, 8.507059e+37 }
0x38e1   :  { %v3915_v38 = vpop.eup %3914 }
0x38e2   :  { %v3179_v59 = vmul.f32 %v3915_v38, %v3177_v7  ;;  %vm3184_vm3 = vweird.f32 %v3915_v38 }
0x38e3   :  { %vm3185_vm12 = vmor %vm3183_vm6, %vm3184_vm3 }
0x38e4   :  { %v3180_v60 = vsub.f32 1.0, %v3179_v59 }
0x38e6   :  { %v3181_v45 = vmul.f32 %v3915_v38, %v3180_v60 }
0x38e8   :  { %v3182_v48 = vadd.f32 %v3915_v38, %v3181_v45 }
0x38ea   :  { %v3186_v2 = vsel %vm3185_vm12, %v3915_v38, %v3182_v48 }
0x38eb   :  { %v3191_v10 = vsel %vm3188_vm13, %v3190_v0, %v3186_v2  ;;  %v4110_v0 = vmov 16.0  }
0x38ec   :  { %v3194_v4 = vmul.f32 %v3191_v10, %v3138_v14 }
0x3949   :  { %v3197_v5 = vpop.permute.xlu1 %3196 }
0x394a   :  { %v3199_v11 = vmul.f32 %v3197_v5, %v3191_v10  ;;  %v3381_v5 = vpop.f32.mrf.mxu1 }
0x394c   :  { %3201 = vrot.lane.b32.xlu2 %v3199_v11, %s4101_s30 }
0x39a6   :  { %v3202_v58 = vpop.permute.xlu2 %3201 }
0x39a7   :  { %v3204_v8 = vadd.f32 %v3202_v58, %v3194_v4 }
0x39a9   :  { %3916 = vtanh.f32 %v3204_v8 }
0x39af   :  { %v3917_v33 = vpop.eup %3916 }
0x39b0   :  { %3207 = vrot.lane.b32.xlu0 %v3917_v33, %s4101_s30 }
0x3a22   :  { %v3208_v19 = vpop.permute.xlu0 %3207 }
0x3a23   :  { %v3210_v9 = vmul.f32 %v3208_v19, %v3191_v10  ;;  %v3674_v10 = vld [vmem:[%s5153_s18] ss:$0 sm:$0xff] }
0x3a24   :  { %v3382_v4 = vadd.f32 %v3674_v10, %v3381_v5 }
0x3a25   :  { %3212 = vrot.lane.b32.xlu1 %v3210_v9, %s4109_s5 }
0x3a26   :  { %v3387_v19 = vsel %vm197_vm0, %v3382_v4, 0.0 }
0x3a97   :  { %v3213_v25 = vpop.permute.xlu1 %3212 }
0x3a98   :  { %3215 = vst.msk [vmem:[#allocation3 + $0xa] sm:$0x3] %vm738_vm15, %v3213_v25  ;;  %3627 = vmatmul.msk.f32.vlgmr.msra.gmra.mxu2 %vm197_vm0, %v3213_v25 }
0x3b1b   :  { %v3236_v26 = vpop.f32.mrf.mxu2 }
0x3b1c   :  { %v3239_v3 = vadd.f32 %v3236_v26, %v3216_v6 }
0x3b1e   :  { %3918 = vtanh.f32 %v3239_v3  ;;  %v3628_v18 = vmul.f32 -1.442695, %v3239_v3 }
0x3b20   :  { %3920 = vpow2.f32 %v3628_v18 }
0x3b24   :  { %v3919_v17 = vpop.eup %3918 }
0x3b25   :  { %3262 = vrot.lane.b32.xlu2 %v3919_v17, %s4101_s30 }
0x3b26   :  { %v3921_v27 = vpop.eup %3920 }
0x3b27   :  { %v3243_v47 = vadd.f32 1.0, %v3921_v27 }
0x3b29   :  { %3922 = vrcp.f32 %v3243_v47  ;;  %v3255_v36 = vand.u32 2147483648, %v3243_v47  ;;  %vm3249_vm14 = vweird.f32 %v3243_v47  ;;  %v3253_v12 = vand.u32 2147483647, %v3243_v47 }
0x3b2b   :  { %v3256_v42 = vor.u32 1.1754944e-38, %v3255_v36  ;;  %vm3254_vm2 = vcmp.eq.f32.partialorder %v3253_v12, 8.507059e+37 }
0x3b2f   :  { %v3923_v28 = vpop.eup %3922 }
0x3b30   :  { %v3245_v22 = vmul.f32 %v3923_v28, %v3243_v47  ;;  %vm3250_vm1 = vweird.f32 %v3923_v28 }
0x3b31   :  { %vm3251_vm4 = vmor %vm3249_vm14, %vm3250_vm1  ;;  %vm3498_vm1 = vcmask 1040384   ;;  %vm3501_vm14 = vcmask 1042432  }
0x3b32   :  { %v3246_v31 = vsub.f32 1.0, %v3245_v22 }
0x3b34   :  { %v3247_v41 = vmul.f32 %v3923_v28, %v3246_v31 }
0x3b36   :  { %v3248_v34 = vadd.f32 %v3923_v28, %v3247_v41 }
0x3b38   :  { %v3252_v37 = vsel %vm3251_vm4, %v3923_v28, %v3248_v34  ;;  %vm3507_vm4 = vcmask 1046528  }
0x3b39   :  { %v3257_v44 = vsel %vm3254_vm2, %v3256_v42, %v3252_v37 }
0x3b3a   :  { %v3260_v39 = vmul.f32 %v3257_v44, %v3204_v8 }
0x3b7f   :  { %v3263_v40 = vpop.permute.xlu2 %3262 }
0x3b80   :  { %v3265_v16 = vmul.f32 %v3263_v40, %v3257_v44 }
0x3b82   :  { %3267 = vrot.lane.b32.xlu0 %v3265_v16, %s4101_s30 }
0x3bf4   :  { %v3268_v61 = vpop.permute.xlu0 %3267 }
0x3bf5   :  { %v3270_v15 = vadd.f32 %v3268_v61, %v3260_v39 }
0x3bf7   :  { %3924 = vtanh.f32 %v3270_v15 }
0x3bfd   :  { %v3925_v46 = vpop.eup %3924 }
0x3bfe   :  { %3273 = vrot.lane.b32.xlu1 %v3925_v46, %s4101_s30 }
0x3c70   :  { %v3274_v62 = vpop.permute.xlu1 %3273 }
0x3c71   :  { %v3276_v50 = vmul.f32 %v3274_v62, %v3257_v44  ;;  %v3447_v62 = vld [vmem:[%s5156_s21 + $0x10] sm:$0xff] }
0x3c73   :  { %3278 = vrot.lane.b32.xlu2 %v3276_v50, %s4109_s5 }
0x3ccd   :  { %v3279_v13 = vpop.permute.xlu2 %3278 }
0x3cce   :  { %3281 = vst.msk [vmem:[#allocation3 + $0xc] sm:$0x3] %vm738_vm15, %v3279_v13  ;;  %3629 = vmatmul.msk.f32.vlgmr.msra.gmra.mxu3 %vm197_vm0, %v3279_v13  ;;  %v3446_v13 = vld [vmem:[%s5156_s21 + $0x8] sm:$0xff] }
0x3d51   :  { %v3302_v30 = vpop.f32.mrf.mxu3 }
0x3d52   :  { %v3305_v49 = vadd.f32 %v3302_v30, %v3282_v51  ;;  %v3445_v51 = vld [vmem:[%s5156_s21] sm:$0xff] }
0x3d54   :  { %3926 = vtanh.f32 %v3305_v49  ;;  %v3630_v53 = vmul.f32 -1.442695, %v3305_v49 }
0x3d56   :  { %3928 = vpow2.f32 %v3630_v53 }
0x3d5a   :  { %v3927_v52 = vpop.eup %3926 }
0x3d5b   :  { %3328 = vrot.lane.b32.xlu0 %v3927_v52, %s4101_s30 }
0x3d5c   :  { %v3929_v43 = vpop.eup %3928 }
0x3d5d   :  { %v3309_v23 = vadd.f32 1.0, %v3929_v43 }
0x3d5f   :  { %3930 = vrcp.f32 %v3309_v23  ;;  %v3321_v21 = vand.u32 2147483648, %v3309_v23  ;;  %vm3315_vm11 = vweird.f32 %v3309_v23  ;;  %v3319_v1 = vand.u32 2147483647, %v3309_v23 }
0x3d61   :  { %v3322_v35 = vor.u32 1.1754944e-38, %v3321_v21  ;;  %vm3320_vm3 = vcmp.eq.f32.partialorder %v3319_v1, 8.507059e+37  ;;  %v3676_v1 = vld [vmem:[%s5155_s20] ss:$0 sm:$0xff] }
0x3d65   :  { %v3931_v14 = vpop.eup %3930 }
0x3d66   :  { %v3311_v54 = vmul.f32 %v3931_v14, %v3309_v23  ;;  %vm3316_vm5 = vweird.f32 %v3931_v14 }
0x3d67   :  { %vm3317_vm10 = vmor %vm3315_vm11, %vm3316_vm5 }
0x3d68   :  { %v3312_v55 = vsub.f32 1.0, %v3311_v54 }
0x3d6a   :  { %v3313_v57 = vmul.f32 %v3931_v14, %v3312_v55 }
0x3d6c   :  { %v3314_v24 = vadd.f32 %v3931_v14, %v3313_v57  ;;  %v3675_v57 = vld [vmem:[%s5154_s19] ss:$0 sm:$0xff]  ;;  %s4111_s19 = smov [#allocation13]  }
0x3d6d   :  { %s3526_s20 = sshll.u32 %s4111_s19, 4  ;;  %s3527_s20 = int_to_ptr.vmem [resolvable:$true] %s3526_s20 }
0x3d6e   :  { %v3318_v29 = vsel %vm3317_vm10, %v3931_v14, %v3314_v24 }
0x3d6f   :  { %v3323_v56 = vsel %vm3320_vm3, %v3322_v35, %v3318_v29 }
0x3d70   :  { %v3326_v38 = vmul.f32 %v3323_v56, %v3270_v15  ;;  %v3448_v15 = vld [vmem:[%s5156_s21 + $0x18] sm:$0xff] }
0x3d71   :  { %3471 = vmatpush.msrb.mxu0 %v3448_v15 }
0x3d73   :  { %3472 = vmatpush.msrb.mxu0 %v3447_v62 }
0x3d75   :  { %3473 = vmatpush.msrb.mxu0 %v3446_v13 }
0x3d77   :  { %3474 = vmatpush.msrb.mxu0 %v3445_v51 }
0x3dcd   :  { %v3329_v20 = vpop.permute.xlu0 %3328 }
0x3dce   :  { %v3331_v7 = vmul.f32 %v3329_v20, %v3323_v56 }
0x3dd0   :  { %3333 = vrot.lane.b32.xlu1 %v3331_v7, %s4101_s30 }
0x3e42   :  { %v3334_v59 = vpop.permute.xlu1 %3333 }
0x3e43   :  { %v3336_v60 = vadd.f32 %v3334_v59, %v3326_v38 }
0x3e45   :  { %3932 = vtanh.f32 %v3336_v60  ;;  %v3677_v60 = vld [vmem:[%s5157_s22] ss:$0 sm:$0xff] }
0x3e46   :  { %3934 = vrcp.f32 %v4110_v0 }
0x3e4b   :  { %v3933_v45 = vpop.eup %3932 }
0x3e4c   :  { %3339 = vrot.lane.b32.xlu2 %v3933_v45, %s4101_s30  ;;  %v3935_v11 = vpop.eup %3934 }
0x3e4d   :  { %v3397_v58 = vmul.f32 16.0, %v3935_v11 }
0x3e4f   :  { %v3398_v25 = vsub.f32 1.0, %v3397_v58 }
0x3e51   :  { %v3399_v3 = vmul.f32 %v3935_v11, %v3398_v25 }
0x3e53   :  { %v3400_v27 = vadd.f32 %v3935_v11, %v3399_v3 }
0x3ea6   :  { %v3340_v48 = vpop.permute.xlu2 %3339 }
0x3ea7   :  { %v3342_v63 = vmul.f32 %v3340_v48, %v3323_v56 }
0x3ea9   :  { %3344 = vrot.lane.b32.xlu0 %v3342_v63, %s4109_s5 }
0x3f1b   :  { %v3345_v32 = vpop.permute.xlu0 %3344 }
0x3f1c   :  { %3347 = vst.msk [vmem:[#allocation3 + $0xe] sm:$0x3] %vm738_vm15, %v3345_v32  ;;  %vm3401_vm15 = vweird.f32 %v3935_v11 }
0x3f1d   :  { %v3402_v22 = vsel %vm3401_vm15, %v3935_v11, %v3400_v27 }
0x3f23   :  { %v3349_v2 = vld [vmem:[#allocation3 + $0x8] sm:$0xff] }
0x3f24   :  { %3632 = vmatmul.msk.f32.gmra.mxu1 %vm197_vm0, %v3349_v2 }
0x3fa1   :  { %v3384_v8 = vpop.f32.mrf.mxu1 }
0x3fa2   :  { %v3385_v33 = vadd.f32 %v3674_v10, %v3384_v8 }
0x3fa4   :  { %v3388_v9 = vsel %vm197_vm0, %v3385_v33, 0.0 }
0x3fa5   :  { %v3389_v6 = vadd.f32 %v3388_v9, %v3387_v19 }
0x3fa7   :  { %v3390_v26 = vrot.slane %v3389_v6, 4 }
0x3fa9   :  { %v3391_v17 = vadd.f32 %v3390_v26, %v3389_v6 }
0x3fab   :  { %v3392_v18 = vrot.slane %v3391_v17, 2 }
0x3fad   :  { %v3393_v47 = vadd.f32 %v3392_v18, %v3391_v17 }
0x3faf   :  { %v3394_v28 = vrot.slane %v3393_v47, 1 }
0x3fb1   :  { %v3395_v31 = vadd.f32 %v3394_v28, %v3393_v47 }
0x3fb3   :  { %v3403_v41 = vmul.f32 %v3402_v22, %v3395_v31 }
0x3fb5   :  { %v3404_v34 = vsub.f32 %v3382_v4, %v3403_v41  ;;  %v3405_v36 = vsub.f32 %v3385_v33, %v3403_v41 }
0x3fb7   :  { %v3406_v12 = vmul.f32 %v3404_v34, %v3404_v34  ;;  %v3407_v37 = vmul.f32 %v3405_v36, %v3405_v36 }
0x3fb9   :  { %v3408_v42 = vsel %vm197_vm0, %v3406_v12, 0.0  ;;  %v3409_v40 = vsel %vm197_vm0, %v3407_v37, 0.0 }
0x3fba   :  { %v3410_v44 = vadd.f32 %v3409_v40, %v3408_v42 }
0x3fbc   :  { %v3411_v16 = vrot.slane %v3410_v44, 4 }
0x3fbe   :  { %v3412_v39 = vadd.f32 %v3411_v16, %v3410_v44 }
0x3fc0   :  { %v3413_v61 = vrot.slane %v3412_v39, 2 }
0x3fc2   :  { %v3414_v46 = vadd.f32 %v3413_v61, %v3412_v39 }
0x3fc4   :  { %v3415_v50 = vrot.slane %v3414_v46, 1 }
0x3fc6   :  { %v3416_v30 = vadd.f32 %v3415_v50, %v3414_v46 }
0x3fc8   :  { %v3417_v49 = vmul.f32 %v3416_v30, %v3402_v22 }
0x3fca   :  { %v3418_v52 = vadd.f32 1e-05, %v3417_v49 }
0x3fcc   :  { %3936 = vrsqrt.f32 %v3418_v52  ;;  %vm3425_vm12 = vweird.f32 %v3418_v52 }
0x3fd2   :  { %v3937_v53 = vpop.eup %3936 }
0x3fd3   :  { %v3420_v43 = vmul.f32 %v3937_v53, %v3418_v52  ;;  %vm3426_vm6 = vweird.f32 %v3937_v53 }
0x3fd4   :  { %vm3427_vm13 = vmor %vm3425_vm12, %vm3426_vm6 }
0x3fd5   :  { %v3421_v23 = vmul.f32 %v3937_v53, %v3420_v43 }
0x3fd7   :  { %v3422_v14 = vmul.f32 0.5, %v3421_v23 }
0x3fd9   :  { %v3423_v54 = vsub.f32 1.5, %v3422_v14 }
0x3fdb   :  { %v3424_v55 = vmul.f32 %v3937_v53, %v3423_v54 }
0x3fdd   :  { %v3428_v24 = vsel %vm3427_vm13, %v3937_v53, %v3424_v55 }
0x3fde   :  { %v3429_v21 = vmul.f32 %v3428_v24, %v3404_v34  ;;  %v3430_v29 = vmul.f32 %v3428_v24, %v3405_v36 }
0x3fe0   :  { %v3435_v35 = vmul.f32 %v3675_v57, %v3429_v21  ;;  %v3436_v7 = vmul.f32 %v3675_v57, %v3430_v29 }
0x3fe2   :  { %v3441_v20 = vadd.f32 %v3676_v1, %v3435_v35  ;;  %v3442_v38 = vadd.f32 %v3676_v1, %v3436_v7 }
0x3fe4   :  { %v3443_v56 = vmax.f32 %v3441_v20, 0.0  ;;  %v3444_v59 = vmax.f32 %v3442_v38, 0.0 }
0x3fe6   :  { %3633 = vmatmul.msk.f32.vlgmr.msrb.gmra.mxu0 %vm197_vm0, %v3443_v56 }
0x3fee   :  { %3634 = vmatmul.msk.f32.gmra.mxu0 %vm197_vm0, %v3444_v59  ;;  %vm3504_vm0 = vcmask 1044480  }
0x4063   :  { %v3476_v45 = vpop.f32.mrf.mxu0 }
0x4064   :  { %v3477_v48 = vadd.f32 %v3677_v60, %v3476_v45 }
0x4066   :  { %v3483_v63 = vrot.slane %v3477_v48, 1  ;;  %v3485_v32 = vrot.slane %v3477_v48, 2  ;;  %v3487_v2 = vrot.slane %v3477_v48, 3  ;;  %v3511_v8 = vrot.slane %v3477_v48, 4 }
0x4068   :  { %v3499_v0 = vsel %vm3498_vm1, %v3477_v48, %v3483_v63  ;;  %v3513_v5 = vsel %vm3498_vm1, %v3483_v63, %v3485_v32 }
0x4069   :  { %v3500_v11 = vsel %vm621_vm7, %v3499_v0, %v3485_v32  ;;  %v3514_v4 = vsel %vm621_vm7, %v3513_v5, %v3487_v2  ;;  %vm3509_vm7 = vcmask 64512  }
0x406a   :  { %v3502_v25 = vsel %vm3501_vm14, %v3500_v11, %v3487_v2  ;;  %v3515_v6 = vsel %vm3501_vm14, %v3514_v4, %v3511_v8 }
0x406b   :  { %v3479_v10 = vpop.f32.mrf.mxu0 }
0x406c   :  { %v3480_v58 = vadd.f32 %v3677_v60, %v3479_v10 }
0x406e   :  { %v3490_v33 = vrot.slane %v3480_v58, 4  ;;  %v3492_v19 = vrot.slane %v3480_v58, 5  ;;  %v3494_v9 = vrot.slane %v3480_v58, 6  ;;  %v3496_v26 = vrot.slane %v3480_v58, 7 }
0x4070   :  { %v3503_v3 = vsel %vm623_vm8, %v3502_v25, %v3490_v33  ;;  %v3516_v17 = vsel %vm623_vm8, %v3515_v6, %v3492_v19 }
0x4071   :  { %v3505_v18 = vsel %vm3504_vm0, %v3503_v3, %v3492_v19  ;;  %v3517_v27 = vsel %vm3504_vm0, %v3516_v17, %v3494_v9 }
0x4072   :  { %v3506_v47 = vsel %vm625_vm9, %v3505_v18, %v3494_v9  ;;  %v3518_v28 = vsel %vm625_vm9, %v3517_v27, %v3496_v26 }
0x4073   :  { %v3508_v22 = vsel %vm3507_vm4, %v3506_v47, %v3496_v26  ;;  %v3519_v31 = vsel %vm3507_vm4, %v3518_v28, %v3480_v58 }
0x4074   :  { %3510 = vst.msk [vmem:[#allocation13] sm:$0xff] %vm3509_vm7, %v3508_v22 }
0x4075   :  { %3521 = vst.msk [vmem:[#allocation13 + $0x8] sm:$0xff] %vm3509_vm7, %v3519_v31 }
0x4076   :  { %3534 = dma.vmem_to_hbm [thread:$0]  %s3527_s20, 256, %s3529_s16, [#allocation6], %s4093_s6, %s4093_s6, %s4094_s27  }
0x4077   :  { %4090 = dma.done.wait [#allocation6], 256  }
0x4078   :  { %4091 = vsyncadd [#allocation6], 4294967040 }
0x4079   :  { %3539 = vsyncpa [#allocation5], 1 }
0x407a   :  { %3540 = vsyncpa [#allocation8], 1 }
0x407b   :  { %3541 = vsyncpa [#allocation11], 1 }
0x407c   :  { %3542 = vsyncpa [#allocation6], 1 }

</bundles_post_ra>
